<compile_context>
chip_gen: v6e
topology: v6e:2x2x1
jax: 0.10.0
libtpu: 0.0.40
codegen_flags: <defaults>
</compile_context>

<pallas_src>
import functools

import jax
import jax.numpy as jnp
from jax.experimental import pallas as pl
from jax.experimental.pallas import tpu as pltpu

# Logical sizes (from the PyTorch module).
F_IN, H1, H2, F_OUT = 58, 300, 100, 1
# Lane/sublane padded sizes.
FP_IN = 64      # 58 -> 64
H1P = 384       # 300 -> 384
H2P = 128       # 100 -> 128
FP_OUT = 128    # 1 -> 128 (lane-dense output slab)
TM = 256        # node-row block (tiled path)
TK = 256        # lhat column block (tiled path, k-reduction axis)


# ---------------------------------------------------------------------------
# VMEM budgeting
# ---------------------------------------------------------------------------
def _vmem_limit_bytes():
    """~3/4 of physical VMEM (96 MiB on v5e/v6e, 48 MiB on v7x)."""
    try:
        cap = int(pltpu.get_tpu_info().vmem_capacity_bytes)
    except Exception:
        cap = 64 * 1024 * 1024
    return max(32 * 1024 * 1024, (cap * 3) // 4)


def _fused_fits(n_pad, vmem_limit):
    # bf16 lhat + a conservative per-node bound on fused intermediates + weights.
    est = 2 * n_pad * n_pad + 12 * 1024 * n_pad + 2 * 1024 * 1024
    return est <= int(0.7 * vmem_limit)


# ---------------------------------------------------------------------------
# Kernels: fused single-call path (lhat resident in VMEM)
# ---------------------------------------------------------------------------
def fused_kernel(lhat_ref, x_ref, w1a_ref, w1b_ref, b1_ref,
                 w2_ref, b2_ref, w3_ref, b3_ref, out_ref):
    lhat = lhat_ref[...]                      # (N, N) bf16, VMEM-resident
    x = x_ref[...]                            # (N, 64) bf16

    # Layer 1: h1 = relu(x @ W1_0 + (lhat @ x) @ W1_1 + b1)
    tx1 = jnp.dot(lhat, x, preferred_element_type=jnp.float32)
    h1 = jnp.dot(x, w1a_ref[...], preferred_element_type=jnp.float32)
    h1 = h1 + jnp.dot(tx1.astype(jnp.bfloat16), w1b_ref[...],
                      preferred_element_type=jnp.float32)
    h1 = jnp.maximum(h1 + b1_ref[...], 0.0)

    # Layer 2 (reassociated propagation: lhat @ (h1 @ W2_1)).
    z2 = jnp.dot(h1.astype(jnp.bfloat16), w2_ref[...],
                 preferred_element_type=jnp.float32)
    p2 = jnp.dot(lhat, z2[:, H2P:].astype(jnp.bfloat16),
                 preferred_element_type=jnp.float32)
    h2 = jnp.maximum(z2[:, :H2P] + p2 + b2_ref[...], 0.0)

    # Layer 3.
    z3 = jnp.dot(h2.astype(jnp.bfloat16), w3_ref[...],
                 preferred_element_type=jnp.float32)
    p3 = jnp.dot(lhat, z3[:, FP_OUT:].astype(jnp.bfloat16),
                 preferred_element_type=jnp.float32)
    out_ref[...] = z3[:, :FP_OUT] + p3 + b3_ref[...]


# ---------------------------------------------------------------------------
# Kernels: tiled path (grid = (row blocks, lhat-column blocks))
# ---------------------------------------------------------------------------
def layer1_tiled_kernel(lhat_ref, xk_ref, xb_ref, w1a_ref, w1b_ref, b1_ref,
                        w2_ref, z2a_ref, z2b_ref, acc_ref):
    """k-accumulate Tx_1 = lhat @ x; at last k: layer-1 combine + layer-2 weights."""
    k = pl.program_id(1)

    @pl.when(k == 0)
    def _():
        acc_ref[...] = jnp.zeros_like(acc_ref)

    acc_ref[...] += jnp.dot(lhat_ref[...], xk_ref[...],
                            preferred_element_type=jnp.float32)

    @pl.when(k == pl.num_programs(1) - 1)
    def _():
        h1 = jnp.dot(xb_ref[...], w1a_ref[...],
                     preferred_element_type=jnp.float32)
        h1 = h1 + jnp.dot(acc_ref[...].astype(jnp.bfloat16), w1b_ref[...],
                          preferred_element_type=jnp.float32)
        h1 = jnp.maximum(h1 + b1_ref[...], 0.0)
        z2 = jnp.dot(h1.astype(jnp.bfloat16), w2_ref[...],
                     preferred_element_type=jnp.float32)
        z2a_ref[...] = z2[:, :H2P]                       # f32 local term
        z2b_ref[...] = z2[:, H2P:].astype(z2b_ref.dtype)  # bf16 (re-enters MXU)


def layer2_tiled_kernel(lhat_ref, z2bk_ref, z2a_ref, b2_ref, w3_ref,
                        z3a_ref, z3b_ref, acc_ref):
    """k-accumulate lhat @ (h1 @ W2_1); at last k: combine + ReLU + layer-3 weights."""
    k = pl.program_id(1)

    @pl.when(k == 0)
    def _():
        acc_ref[...] = jnp.zeros_like(acc_ref)

    acc_ref[...] += jnp.dot(lhat_ref[...], z2bk_ref[...],
                            preferred_element_type=jnp.float32)

    @pl.when(k == pl.num_programs(1) - 1)
    def _():
        h2 = jnp.maximum(z2a_ref[...] + acc_ref[...] + b2_ref[...], 0.0)
        z3 = jnp.dot(h2.astype(jnp.bfloat16), w3_ref[...],
                     preferred_element_type=jnp.float32)
        z3a_ref[...] = z3[:, :FP_OUT]
        z3b_ref[...] = z3[:, FP_OUT:].astype(z3b_ref.dtype)


def layer3_tiled_kernel(lhat_ref, z3bk_ref, z3a_ref, b3_ref, out_ref, acc_ref):
    """k-accumulate lhat @ (h2 @ W3_1); at last k: final combine into (TM,128) slab."""
    k = pl.program_id(1)

    @pl.when(k == 0)
    def _():
        acc_ref[...] = jnp.zeros_like(acc_ref)

    acc_ref[...] += jnp.dot(lhat_ref[...], z3bk_ref[...],
                            preferred_element_type=jnp.float32)

    @pl.when(k == pl.num_programs(1) - 1)
    def _():
        out_ref[...] = z3a_ref[...] + acc_ref[...] + b3_ref[...]


# ---------------------------------------------------------------------------
# Parameter / input packing (done once, outside the hot path)
# ---------------------------------------------------------------------------
def _pad2(w, rows, cols):
    return jnp.zeros((rows, cols), jnp.float32).at[:w.shape[0], :w.shape[1]].set(w)


def pack_params(params):
    w1_0, w1_1, b1, w2_0, w2_1, b2, w3_0, w3_1, b3 = params
    bf = jnp.bfloat16
    w1a = _pad2(w1_0, FP_IN, H1P).astype(bf)
    w1b = _pad2(w1_1, FP_IN, H1P).astype(bf)
    b1_p = _pad2(b1, 1, H1P)
    w2_cat = jnp.concatenate([_pad2(w2_0, H1P, H2P),
                              _pad2(w2_1, H1P, H2P)], axis=1).astype(bf)
    b2_p = _pad2(b2, 1, H2P)
    w3_cat = jnp.concatenate([_pad2(w3_0, H2P, FP_OUT),
                              _pad2(w3_1, H2P, FP_OUT)], axis=1).astype(bf)
    b3_p = _pad2(b3, 1, FP_OUT)
    return (w1a, w1b, b1_p, w2_cat, b2_p, w3_cat, b3_p)


def pad_graph_inputs(x, lhat):
    """Pad/cast graph inputs once (reusable across forwards).

    NOTE: padded rows AND columns must be zero (they are here) -- zero lhat
    columns guarantee padded-node garbage never contaminates real rows."""
    n = x.shape[0]
    n_pad = pl.cdiv(n, TM) * TM
    x_p = (jnp.zeros((n_pad, FP_IN), jnp.float32)
           .at[:n, :F_IN].set(x).astype(jnp.bfloat16))
    lhat_p = (jnp.zeros((n_pad, n_pad), jnp.float32)
              .at[:n, :n].set(lhat).astype(jnp.bfloat16))
    return x_p, lhat_p


# ---------------------------------------------------------------------------
# Forward
# ---------------------------------------------------------------------------
@functools.partial(jax.jit, static_argnames=("num_nodes", "force_tiled"))
def emogi_forward(x_p, lhat_p, packed, *, num_nodes, force_tiled=False):
    """x_p: (n_pad, 64) bf16, lhat_p: (n_pad, n_pad) bf16 (pre-padded, zero pads)."""
    n_pad = x_p.shape[0]
    assert n_pad % TM == 0 and n_pad % TK == 0 and lhat_p.shape == (n_pad, n_pad)
    w1a, w1b, b1_p, w2_cat, b2_p, w3_cat, b3_p = packed
    bf = jnp.bfloat16
    vmem_limit = _vmem_limit_bytes()

    # ---- small-graph path: one fused call, lhat VMEM-resident --------------
    if _fused_fits(n_pad, vmem_limit) and not force_tiled:
        flops = (2 * n_pad * n_pad * (FP_IN + H2P + FP_OUT)
                 + 2 * n_pad * (2 * FP_IN * H1P + H1P * 2 * H2P + H2P * 2 * FP_OUT))
        byts = (2 * n_pad * n_pad + 2 * n_pad * FP_IN + 4 * n_pad * FP_OUT
                + 2 * (2 * FP_IN * H1P + H1P * 2 * H2P + H2P * 2 * FP_OUT))
        out_pad = pl.pallas_call(
            fused_kernel,
            out_shape=jax.ShapeDtypeStruct((n_pad, FP_OUT), jnp.float32),
            compiler_params=pltpu.CompilerParams(vmem_limit_bytes=vmem_limit),
            cost_estimate=pl.CostEstimate(flops=flops, transcendentals=0,
                                          bytes_accessed=byts),
        )(lhat_p, x_p, w1a, w1b, b1_p, w2_cat, b2_p, w3_cat, b3_p)
        return out_pad[:num_nodes, :F_OUT]

    # ---- large-graph path: 3 pipelined calls, lhat columns k-tiled ----------
    grid = (n_pad // TM, n_pad // TK)
    params2 = pltpu.CompilerParams(
        dimension_semantics=("parallel", "arbitrary"),
        vmem_limit_bytes=vmem_limit)

    lhat_blk = pl.BlockSpec((TM, TK), lambda i, k: (i, k))
    row_blk = lambda c: pl.BlockSpec((TM, c), lambda i, k: (i, 0))
    col_blk = lambda c: pl.BlockSpec((TK, c), lambda i, k: (k, 0))
    const = lambda r, c: pl.BlockSpec((r, c), lambda i, k: (0, 0))

    nn2 = 2 * n_pad * n_pad

    # Call A: layer 1 (Tx_1 accumulation + combine + ReLU) + layer-2 weights.
    z2a, z2b = pl.pallas_call(
        layer1_tiled_kernel,
        grid=grid,
        in_specs=[lhat_blk, col_blk(FP_IN), row_blk(FP_IN),
                  const(FP_IN, H1P), const(FP_IN, H1P), const(1, H1P),
                  const(H1P, 2 * H2P)],
        out_specs=[row_blk(H2P), row_blk(H2P)],
        out_shape=[jax.ShapeDtypeStruct((n_pad, H2P), jnp.float32),
                   jax.ShapeDtypeStruct((n_pad, H2P), bf)],
        scratch_shapes=[pltpu.VMEM((TM, FP_IN), jnp.float32)],
        compiler_params=params2,
        cost_estimate=pl.CostEstimate(
            flops=nn2 * FP_IN + 2 * n_pad * (2 * FP_IN * H1P + H1P * 2 * H2P),
            transcendentals=0,
            bytes_accessed=nn2 + 6 * n_pad * H2P + 2 * n_pad * FP_IN),
    )(lhat_p, x_p, x_p, w1a, w1b, b1_p, w2_cat)

    # Call B: layer 2 propagation/combine + ReLU + layer-3 weights.
    z3a, z3b = pl.pallas_call(
        layer2_tiled_kernel,
        grid=grid,
        in_specs=[lhat_blk, col_blk(H2P), row_blk(H2P),
                  const(1, H2P), const(H2P, 2 * FP_OUT)],
        out_specs=[row_blk(FP_OUT), row_blk(FP_OUT)],
        out_shape=[jax.ShapeDtypeStruct((n_pad, FP_OUT), jnp.float32),
                   jax.ShapeDtypeStruct((n_pad, FP_OUT), bf)],
        scratch_shapes=[pltpu.VMEM((TM, H2P), jnp.float32)],
        compiler_params=params2,
        cost_estimate=pl.CostEstimate(
            flops=nn2 * H2P + 2 * n_pad * H2P * 2 * FP_OUT,
            transcendentals=0,
            bytes_accessed=nn2 + 8 * n_pad * H2P + 6 * n_pad * FP_OUT),
    )(lhat_p, z2b, z2a, b2_p, w3_cat)

    # Call C: layer 3 propagation/combine -> lane-dense (N, 128) f32 slab.
    out_pad = pl.pallas_call(
        layer3_tiled_kernel,
        grid=grid,
        in_specs=[lhat_blk, col_blk(FP_OUT), row_blk(FP_OUT),
                  const(1, FP_OUT)],
        out_specs=row_blk(FP_OUT),
        out_shape=jax.ShapeDtypeStruct((n_pad, FP_OUT), jnp.float32),
        scratch_shapes=[pltpu.VMEM((TM, FP_OUT), jnp.float32)],
        compiler_params=params2,
        cost_estimate=pl.CostEstimate(
            flops=nn2 * FP_OUT, transcendentals=0,
            bytes_accessed=nn2 + 10 * n_pad * FP_OUT),
    )(lhat_p, z3b, z3a, b3_p)

    return out_pad[:num_nodes, :F_OUT]


# ---------------------------------------------------------------------------
# Test harness
# ---------------------------------------------------------------------------
def glorot(key, shape):
    fan_in, fan_out = shape
    limit = (6.0 / (fan_in + fan_out)) ** 0.5
    return jax.random.uniform(key, shape, jnp.float32, -limit, limit)


def make_params(key):
    ks = jax.random.split(key, 6)
    return [glorot(ks[0], (F_IN, H1)), glorot(ks[1], (F_IN, H1)),
            jnp.zeros((1, H1), jnp.float32),
            glorot(ks[2], (H1, H2)), glorot(ks[3], (H1, H2)),
            jnp.zeros((1, H2), jnp.float32),
            glorot(ks[4], (H2, F_OUT)), glorot(ks[5], (H2, F_OUT)),
            jnp.zeros((1, F_OUT), jnp.float32)]


def build_lhat(key, n):
    """Dense scaled Laplacian L_hat = -D^{-1/2} A D^{-1/2} of a random
    symmetric adjacency (PyG sym norm with lambda_max=2)."""
    upper = jax.random.bernoulli(key, p=0.15, shape=(n, n)).astype(jnp.float32)
    upper = jnp.triu(upper, k=1)
    adj = upper + upper.T
    deg = adj.sum(axis=-1)
    dinv = jnp.where(deg > 0, jax.lax.rsqrt(jnp.maximum(deg, 1e-12)), 0.0)
    return -(dinv[:, None] * adj * dinv[None, :])


def reference_forward(x, lhat, params):
    w1_0, w1_1, b1, w2_0, w2_1, b2, w3_0, w3_1, b3 = params

    def cheb(h, w0, w1, b):
        return h @ w0 + (lhat @ h) @ w1 + b

    h = jax.nn.relu(cheb(x, w1_0, w1_1, b1))
    h = jax.nn.relu(cheb(h, w2_0, w2_1, b2))
    return cheb(h, w3_0, w3_1, b3)


def _run_case(key, n, params, packed, force_tiled):
    k_x, k_adj = jax.random.split(key)
    x = jax.random.normal(k_x, (n, F_IN), jnp.float32)
    lhat = build_lhat(k_adj, n)
    x_p, lhat_p = pad_graph_inputs(x, lhat)            # once, outside hot path
    out = jax.block_until_ready(
        emogi_forward(x_p, lhat_p, packed, num_nodes=n, force_tiled=force_tiled))
    ref = reference_forward(x, lhat, params)
    assert out.shape == (n, F_OUT)
    max_err = float(jnp.max(jnp.abs(out - ref)))
    assert jnp.allclose(out, ref, atol=5e-2, rtol=5e-2), \
        f"mismatch vs JAX reference (n={n}, tiled={force_tiled}, max abs err {max_err})"


if __name__ == "__main__":
    key = jax.random.PRNGKey(0)
    k1, k2, k_p = jax.random.split(key, 3)

    params = make_params(k_p)
    packed = pack_params(params)                        # once, outside hot path

    # Small graph -> fused single-call path (lhat VMEM-resident).
    _run_case(k1, 250, params, packed, force_tiled=False)
    # Larger graph, forced tiled path -> exercises row grid + k accumulation.
    _run_case(k2, 700, params, packed, force_tiled=True)

    print("KERNEL_OK")
</pallas_src>

<mosaic_0001>
module attributes {stable_mosaic.version = 11 : i64} {
  func.func @fused_kernel(%arg0: memref<256x256xbf16, #tpu.memory_space<vmem>>, %arg1: memref<256x64xbf16, #tpu.memory_space<vmem>>, %arg2: memref<64x384xbf16, #tpu.memory_space<vmem>>, %arg3: memref<64x384xbf16, #tpu.memory_space<vmem>>, %arg4: memref<1x384xf32, #tpu.memory_space<vmem>>, %arg5: memref<384x256xbf16, #tpu.memory_space<vmem>>, %arg6: memref<1x128xf32, #tpu.memory_space<vmem>>, %arg7: memref<128x256xbf16, #tpu.memory_space<vmem>>, %arg8: memref<1x128xf32, #tpu.memory_space<vmem>>, %arg9: memref<256x128xf32, #tpu.memory_space<vmem>>) attributes {dimension_semantics = [], scalar_prefetch = 0 : i64, scratch_operands = 0 : i64, tpu.core_type = #tpu.core_type<tc>} {
    %c0 = arith.constant 0 : index
    %c0_0 = arith.constant 0 : index
    %0 = vector.load %arg0[%c0, %c0_0] : memref<256x256xbf16, #tpu.memory_space<vmem>>, vector<256x256xbf16>
    %c0_1 = arith.constant 0 : index
    %c0_2 = arith.constant 0 : index
    %1 = vector.load %arg1[%c0_1, %c0_2] : memref<256x64xbf16, #tpu.memory_space<vmem>>, vector<256x64xbf16>
    %cst = arith.constant dense<0.000000e+00> : vector<256x64xf32>
    %2 = tpu.matmul %0, %1, %cst {dimension_numbers = #tpu.dot_dimension_numbers<[1], [0], [0], [1], [0, 0, 1, 1], [], []>} : vector<256x256xbf16>, vector<256x64xbf16>, vector<256x64xf32> -> vector<256x64xf32>
    %c0_3 = arith.constant 0 : index
    %c0_4 = arith.constant 0 : index
    %3 = vector.load %arg2[%c0_3, %c0_4] : memref<64x384xbf16, #tpu.memory_space<vmem>>, vector<64x384xbf16>
    %cst_5 = arith.constant dense<0.000000e+00> : vector<256x384xf32>
    %4 = tpu.matmul %1, %3, %cst_5 {dimension_numbers = #tpu.dot_dimension_numbers<[1], [0], [0], [1], [0, 0, 1, 1], [], []>} : vector<256x64xbf16>, vector<64x384xbf16>, vector<256x384xf32> -> vector<256x384xf32>
    %5 = arith.truncf %2 : vector<256x64xf32> to vector<256x64xbf16>
    %c0_6 = arith.constant 0 : index
    %c0_7 = arith.constant 0 : index
    %6 = vector.load %arg3[%c0_6, %c0_7] : memref<64x384xbf16, #tpu.memory_space<vmem>>, vector<64x384xbf16>
    %cst_8 = arith.constant dense<0.000000e+00> : vector<256x384xf32>
    %7 = tpu.matmul %5, %6, %cst_8 {dimension_numbers = #tpu.dot_dimension_numbers<[1], [0], [0], [1], [0, 0, 1, 1], [], []>} : vector<256x64xbf16>, vector<64x384xbf16>, vector<256x384xf32> -> vector<256x384xf32>
    %8 = arith.addf %4, %7 : vector<256x384xf32>
    %c0_9 = arith.constant 0 : index
    %c0_10 = arith.constant 0 : index
    %9 = vector.load %arg4[%c0_9, %c0_10] : memref<1x384xf32, #tpu.memory_space<vmem>>, vector<1x384xf32>
    %10 = vector.broadcast %9 : vector<1x384xf32> to vector<256x384xf32>
    %11 = arith.addf %8, %10 : vector<256x384xf32>
    %cst_11 = arith.constant 0.000000e+00 : f32
    %12 = vector.broadcast %cst_11 : f32 to vector<256x384xf32>
    %13 = arith.maximumf %11, %12 : vector<256x384xf32>
    %14 = arith.truncf %13 : vector<256x384xf32> to vector<256x384xbf16>
    %c0_12 = arith.constant 0 : index
    %c0_13 = arith.constant 0 : index
    %15 = vector.load %arg5[%c0_12, %c0_13] : memref<384x256xbf16, #tpu.memory_space<vmem>>, vector<384x256xbf16>
    %cst_14 = arith.constant dense<0.000000e+00> : vector<256x256xf32>
    %16 = tpu.matmul %14, %15, %cst_14 {dimension_numbers = #tpu.dot_dimension_numbers<[1], [0], [0], [1], [0, 0, 1, 1], [], []>} : vector<256x384xbf16>, vector<384x256xbf16>, vector<256x256xf32> -> vector<256x256xf32>
    %17 = vector.extract_strided_slice %16 {offsets = [0, 128], sizes = [256, 128], strides = [1, 1]} : vector<256x256xf32> to vector<256x128xf32>
    %18 = arith.truncf %17 : vector<256x128xf32> to vector<256x128xbf16>
    %cst_15 = arith.constant dense<0.000000e+00> : vector<256x128xf32>
    %19 = tpu.matmul %0, %18, %cst_15 {dimension_numbers = #tpu.dot_dimension_numbers<[1], [0], [0], [1], [0, 0, 1, 1], [], []>} : vector<256x256xbf16>, vector<256x128xbf16>, vector<256x128xf32> -> vector<256x128xf32>
    %20 = vector.extract_strided_slice %16 {offsets = [0, 0], sizes = [256, 128], strides = [1, 1]} : vector<256x256xf32> to vector<256x128xf32>
    %21 = arith.addf %20, %19 : vector<256x128xf32>
    %c0_16 = arith.constant 0 : index
    %c0_17 = arith.constant 0 : index
    %22 = vector.load %arg6[%c0_16, %c0_17] : memref<1x128xf32, #tpu.memory_space<vmem>>, vector<1x128xf32>
    %23 = vector.broadcast %22 : vector<1x128xf32> to vector<256x128xf32>
    %24 = arith.addf %21, %23 : vector<256x128xf32>
    %cst_18 = arith.constant 0.000000e+00 : f32
    %25 = vector.broadcast %cst_18 : f32 to vector<256x128xf32>
    %26 = arith.maximumf %24, %25 : vector<256x128xf32>
    %27 = arith.truncf %26 : vector<256x128xf32> to vector<256x128xbf16>
    %c0_19 = arith.constant 0 : index
    %c0_20 = arith.constant 0 : index
    %28 = vector.load %arg7[%c0_19, %c0_20] : memref<128x256xbf16, #tpu.memory_space<vmem>>, vector<128x256xbf16>
    %cst_21 = arith.constant dense<0.000000e+00> : vector<256x256xf32>
    %29 = tpu.matmul %27, %28, %cst_21 {dimension_numbers = #tpu.dot_dimension_numbers<[1], [0], [0], [1], [0, 0, 1, 1], [], []>} : vector<256x128xbf16>, vector<128x256xbf16>, vector<256x256xf32> -> vector<256x256xf32>
    %30 = vector.extract_strided_slice %29 {offsets = [0, 128], sizes = [256, 128], strides = [1, 1]} : vector<256x256xf32> to vector<256x128xf32>
    %31 = arith.truncf %30 : vector<256x128xf32> to vector<256x128xbf16>
    %cst_22 = arith.constant dense<0.000000e+00> : vector<256x128xf32>
    %32 = tpu.matmul %0, %31, %cst_22 {dimension_numbers = #tpu.dot_dimension_numbers<[1], [0], [0], [1], [0, 0, 1, 1], [], []>} : vector<256x256xbf16>, vector<256x128xbf16>, vector<256x128xf32> -> vector<256x128xf32>
    %33 = vector.extract_strided_slice %29 {offsets = [0, 0], sizes = [256, 128], strides = [1, 1]} : vector<256x256xf32> to vector<256x128xf32>
    %34 = arith.addf %33, %32 : vector<256x128xf32>
    %c0_23 = arith.constant 0 : index
    %c0_24 = arith.constant 0 : index
    %35 = vector.load %arg8[%c0_23, %c0_24] : memref<1x128xf32, #tpu.memory_space<vmem>>, vector<1x128xf32>
    %36 = vector.broadcast %35 : vector<1x128xf32> to vector<256x128xf32>
    %37 = arith.addf %34, %36 : vector<256x128xf32>
    %c0_25 = arith.constant 0 : index
    %c0_26 = arith.constant 0 : index
    %38 = vector.load %arg9[%c0_25, %c0_26] : memref<256x128xf32, #tpu.memory_space<vmem>>, vector<256x128xf32>
    tpu.vector_store %arg9[%c0_25, %c0_26], %37 {strides = array<i32>} : memref<256x128xf32, #tpu.memory_space<vmem>>, vector<256x128xf32>,
    return
  }
}

</mosaic_0001>

<bundles_post_ra>
// kernel: emogi_forward.1
= control target key start
LH: loop header
LB: loop body
LE: loop exit
PB: predicated region body
PF: predicated region fallthrough
CT: control target
= control target key end

     0   :  { %14 = vsyncpa [#allocation3], 0  ;;  %s5966_s0 = inlined_call_operand.hbm [shape: bf16[256,256], index: 0, kind: input, shape index: {}]   ;;  %s5967_s1 = inlined_call_operand.vmem [shape: bf16[256,64], index: 1, kind: input, shape index: {}]   ;;  %s5968_s2 = inlined_call_operand.hbm [shape: bf16[64,384], index: 2, kind: input, shape index: {}]   ;;  %s5969_s3 = inlined_call_operand.hbm [shape: bf16[64,384], index: 3, kind: input, shape index: {}]   ;;  %s5970_s4 = inlined_call_operand.vmem [shape: f32[1,384], index: 4, kind: input, shape index: {}]   ;;  %s5971_s5 = inlined_call_operand.hbm [shape: bf16[384,256], index: 5, kind: input, shape index: {}]   ;;  %s5972_s6 = inlined_call_operand.vmem [shape: f32[1,128], index: 6, kind: input, shape index: {}]   ;;  %s5973_s7 = inlined_call_operand.vmem [shape: bf16[128,256], index: 7, kind: input, shape index: {}]   ;;  %s5974_s8 = inlined_call_operand.vmem [shape: f32[1,128], index: 8, kind: input, shape index: {}]   ;;  %s5975_s9 = inlined_call_operand.vmem [shape: f32[256,128], index: 9, kind: output, shape index: {}]  }
   0x1   :  { %15 = vsyncpa [#allocation5], 0 }
   0x2   :  { %16 = vsyncpa [#allocation8], 0  ;;  %s4348_s30 = smov [#allocation4]  }
   0x3   :  { %s36_s10 = sshll.u32 %s4348_s30, 4  ;;  %s37_s10 = int_to_ptr.vmem [resolvable:$true] %s36_s10 }
   0x4   :  { %s4270_s11 = scalar_lea.vmem %s37_s10, 1536  ;;  %p4275_p1 = scmp.lt.s32.totalorder %s37_s10, %s37_s10 }
   0x5   :  { %p4271_p0 = scmp.ne.s32.totalorder %s37_s10, %s4270_s11  ;;  %p4276_p2 = scmp.lt.s32.totalorder %s4270_s11, %s4270_s11 }
   0x7   :  { %p4277_p3 = por %p4276_p2, %p4275_p1 }
   0x9   :  { %p4278_p4 = pnand %p4277_p3, %p4271_p0 }
   0xb   :  { %4281 = shalt.err (!%p4278_p4)
}
   0xc   :  { %s4349_s12 = smov 192   ;;  %s4350_s13 = smov 12  }
   0xd   :  { %42 = dma.hbm_to_vmem [thread:$0]  %s5968_s2, 1536, %s37_s10, [#allocation5], %s4349_s12, %s4349_s12, %s4350_s13  }
   0xe   :  { %s4351_s16 = smov [#allocation2]  }
   0xf   :  { %s22_s17 = sshll.u32 %s4351_s16, 4  ;;  %s23_s17 = int_to_ptr.vmem [resolvable:$true] %s22_s17 }
  0x10   :  { %s4290_s18 = scalar_lea.vmem %s23_s17, 4096  ;;  %p4295_p6 = scmp.lt.s32.totalorder %s23_s17, %s23_s17 }
  0x11   :  { %p4291_p5 = scmp.ne.s32.totalorder %s23_s17, %s4290_s18  ;;  %p4296_p7 = scmp.lt.s32.totalorder %s4290_s18, %s4290_s18 }
  0x13   :  { %p4297_p8 = por %p4296_p7, %p4295_p6 }
  0x15   :  { %p4298_p9 = pnand %p4297_p8, %p4291_p5 }
  0x17   :  { %4301 = shalt.err (!%p4298_p9)
}
  0x18   :  { %s4352_s19 = smov 128   ;;  %s4353_s20 = smov 8  }
  0x19   :  { %28 = dma.hbm_to_vmem [thread:$0]  %s5966_s0, 4096, %s23_s17, [#allocation3], %s4352_s19, %s4352_s19, %s4353_s20  }
  0x1a   :  { %s4354_s23 = smov [#allocation6]   ;;  %s4355_s25 = smov [#allocation7]  }
  0x1b   :  { %s48_s24 = sshll.u32 %s4354_s23, 4  ;;  %s62_s2 = sshll.u32 %s4355_s25, 4  ;;  %s49_s24 = int_to_ptr.vmem [resolvable:$true] %s48_s24  ;;  %s63_s2 = int_to_ptr.vmem [resolvable:$true] %s62_s2 }
  0x1c   :  { %s4310_s26 = scalar_lea.vmem %s49_s24, 1536  ;;  %p4315_p11 = scmp.lt.s32.totalorder %s49_s24, %s49_s24 }
  0x1d   :  { %p4311_p10 = scmp.ne.s32.totalorder %s49_s24, %s4310_s26  ;;  %p4316_p12 = scmp.lt.s32.totalorder %s4310_s26, %s4310_s26 }
  0x1f   :  { %p4317_p13 = por %p4316_p12, %p4315_p11 }
  0x21   :  { %p4318_p0 = pnand %p4317_p13, %p4311_p10 }
  0x23   :  { %4321 = shalt.err (!%p4318_p0)
}
  0x24   :  { %54 = dma.hbm_to_vmem [thread:$0]  %s5969_s3, 1536, %s49_s24, [#allocation5], %s4349_s12, %s4349_s12, %s4350_s13  }
  0x25   :  { %s4330_s0 = scalar_lea.vmem %s63_s2, 6144  ;;  %p4335_p2 = scmp.lt.s32.totalorder %s63_s2, %s63_s2 }
  0x26   :  { %p4331_p1 = scmp.ne.s32.totalorder %s63_s2, %s4330_s0  ;;  %p4336_p3 = scmp.lt.s32.totalorder %s4330_s0, %s4330_s0 }
  0x28   :  { %p4337_p4 = por %p4336_p3, %p4335_p2 }
  0x2a   :  { %p4338_p5 = pnand %p4337_p4, %p4331_p1 }
  0x2c   :  { %4341 = shalt.err (!%p4338_p5)
}
  0x2d   :  { %68 = dma.hbm_to_vmem [thread:$0]  %s5971_s5, 6144, %s63_s2, [#allocation8], %s4352_s19, %s4352_s19, %s4353_s20  }
  0x2e   :  { %4342 = dma.done.wait [#allocation3], 4096  }
  0x2f   :  { %4343 = vsyncadd [#allocation3], 4294963200 }
  0x30   :  { %4344 = dma.done.wait [#allocation5], 3072  }
  0x31   :  { %4345 = vsyncadd [#allocation5], 4294964224 }
  0x32   :  { %4346 = dma.done.wait [#allocation8], 6144  }
  0x33   :  { %4347 = vsyncadd [#allocation8], 4294961152  ;;  %v4428_v0 = vld [vmem:[%s5967_s1 + $0x78] sm:$0xff]   ;;  %v4439_v2 = vld [vmem:[%s5967_s1 + $0x70] sm:$0xff]   ;;  %v5976_v45 = vmov 0   ;;  %vm681_vm0 = vcmask 523264  }
  0x34   :  { %v4433_v1 = vld [vmem:[%s5967_s1 + $0x38] sm:$0xff]   ;;  %3555 = vmatprep.subr.bf16.mxu0 %v4428_v0  ;;  %v4445_v3 = vld [vmem:[%s5967_s1 + $0x30] sm:$0xff]   ;;  %v4451_v4 = vld [vmem:[%s5967_s1 + $0x68] sm:$0xff]   ;;  %832 = vmatprep.mubr.bf16.mxu1 %v5976_v45 }
  0x35   :  { %3556 = vmatpush3.bf16.msra.mxu0 %v4433_v1  ;;  %v4457_v5 = vld [vmem:[%s5967_s1 + $0x28] sm:$0xff]   ;;  %v4463_v6 = vld [vmem:[%s5967_s1 + $0x60] sm:$0xff]   ;;  %v4475_v8 = vld [vmem:[%s5967_s1 + $0x58] sm:$0xff]  }
  0x36   :  { %3557 = vmatprep.subr.bf16.mxu0 %v4439_v2  ;;  %v4469_v7 = vld [vmem:[%s5967_s1 + $0x20] sm:$0xff]   ;;  %v4480_v9 = vld [vmem:[%s5967_s1 + $0x18] sm:$0xff]   ;;  %v4486_v10 = vld [vmem:[%s5967_s1 + $0x50] sm:$0xff]  }
  0x37   :  { %v4044_v11 = vld [vmem:[#allocation2 + $0x4] ss:$8 sps:$4 sm:$0xff]   ;;  %v4493_v12 = vld [vmem:[%s5967_s1 + $0x10] sm:$0xff]   ;;  %v4046_v17 = vld [vmem:[#allocation2] ss:$8 sps:$4 sm:$0xff]  }
  0x38   :  { %440 = vmatprep.mubr.bf16.mxu0 %v4044_v11  ;;  %v4499_v13 = vld [vmem:[%s5967_s1 + $0x48] sm:$0xff]   ;;  %v4511_v15 = vld [vmem:[%s5967_s1 + $0x40] sm:$0xff]   ;;  %v4047_v18 = vld [vmem:[#allocation2 + $0x14] ss:$8 sps:$4 sm:$0xff]  }
  0x39   :  { %3558 = vmatpush3.bf16.msra.mxu0 %v4445_v3  ;;  %v4505_v14 = vld [vmem:[%s5967_s1 + $0x8] sm:$0xff]   ;;  %v4517_v16 = vld [vmem:[%s5967_s1] sm:$0xff]   ;;  %v4049_v19 = vld [vmem:[#allocation2 + $0x10] ss:$8 sps:$4 sm:$0xff]  }
  0x3a   :  { %3559 = vmatprep.subr.bf16.mxu0 %v4451_v4  ;;  %v4050_v20 = vld [vmem:[#allocation2 + $0x24] ss:$8 sps:$4 sm:$0xff]   ;;  %v4092_v21 = vld [vmem:[#allocation6 + $0x48] ss:$12 sps:$4 sm:$0xff]   ;;  %v4095_v23 = vld [vmem:[#allocation6 + $0x30] ss:$12 sps:$4 sm:$0xff]  }
  0x3b   :  { %v4094_v22 = vld [vmem:[#allocation6 + $0x4c] ss:$12 sps:$4 sm:$0xff]   ;;  %v4097_v24 = vld [vmem:[#allocation6 + $0x34] ss:$12 sps:$4 sm:$0xff]   ;;  %v4100_v39 = vld [vmem:[#allocation6 + $0x1c] ss:$12 sps:$4 sm:$0xff]  }
  0x3c   :  { %4011 = vmatprep.subr.bf16.mxu1 %v4094_v22  ;;  %v4052_v25 = vld [vmem:[#allocation2 + $0x20] ss:$8 sps:$4 sm:$0xff]   ;;  %v4053_v26 = vld [vmem:[#allocation2 + $0x34] ss:$8 sps:$4 sm:$0xff]   ;;  %v4055_v27 = vld [vmem:[#allocation2 + $0x30] ss:$8 sps:$4 sm:$0xff]  }
  0x3d   :  { %3560 = vmatpush3.bf16.msra.mxu0 %v4457_v5  ;;  %4015 = vmatpush1.bf16.msra.mxu1 %v4092_v21  ;;  %v4056_v28 = vld [vmem:[#allocation2 + $0x44] ss:$8 sps:$4 sm:$0xff]   ;;  %v4058_v29 = vld [vmem:[#allocation2 + $0x40] ss:$8 sps:$4 sm:$0xff]   ;;  %v4059_v30 = vld [vmem:[#allocation2 + $0x54] ss:$8 sps:$4 sm:$0xff]  }
  0x3e   :  { %3561 = vmatprep.subr.bf16.mxu0 %v4463_v6  ;;  %4012 = vmatprep.subr.bf16.mxu1 %v4097_v24  ;;  %v4061_v31 = vld [vmem:[#allocation2 + $0x50] ss:$8 sps:$4 sm:$0xff]   ;;  %v4062_v32 = vld [vmem:[#allocation2 + $0x64] ss:$8 sps:$4 sm:$0xff]   ;;  %v4064_v33 = vld [vmem:[#allocation2 + $0x60] ss:$8 sps:$4 sm:$0xff]  }
  0x3f   :  { %v4065_v34 = vld [vmem:[#allocation2 + $0x74] ss:$8 sps:$4 sm:$0xff]   ;;  %v4067_v35 = vld [vmem:[#allocation2 + $0x70] ss:$8 sps:$4 sm:$0xff]   ;;  %v4068_v36 = vld [vmem:[#allocation2 + $0x84] ss:$8 sps:$4 sm:$0xff]  }
  0x40   :  { %v4070_v37 = vld [vmem:[#allocation2 + $0x80] ss:$8 sps:$4 sm:$0xff]   ;;  %v4071_v38 = vld [vmem:[#allocation2 + $0x94] ss:$8 sps:$4 sm:$0xff]   ;;  %v4098_v40 = vld [vmem:[#allocation6 + $0x18] ss:$12 sps:$4 sm:$0xff]  }
  0x41   :  { %3562 = vmatpush3.bf16.msra.mxu0 %v4469_v7  ;;  %4016 = vmatpush1.bf16.msra.mxu1 %v4095_v23  ;;  %v4073_v41 = vld [vmem:[#allocation2 + $0x90] ss:$8 sps:$4 sm:$0xff]   ;;  %v4074_v42 = vld [vmem:[#allocation2 + $0xa4] ss:$8 sps:$4 sm:$0xff]   ;;  %v4076_v46 = vld [vmem:[#allocation2 + $0xa0] ss:$8 sps:$4 sm:$0xff]  }
  0x42   :  { %3563 = vmatprep.subr.bf16.mxu0 %v4475_v8  ;;  %4013 = vmatprep.subr.bf16.mxu1 %v4100_v39  ;;  %v4103_v43 = vld [vmem:[#allocation6 + $0x4] ss:$12 sps:$4 sm:$0xff]   ;;  %v4101_v44 = vld [vmem:[#allocation6] ss:$12 sps:$4 sm:$0xff]   ;;  %v4077_v47 = vld [vmem:[#allocation2 + $0xb4] ss:$8 sps:$4 sm:$0xff]  }
  0x43   :  { %v4079_v48 = vld [vmem:[#allocation2 + $0xb0] ss:$8 sps:$4 sm:$0xff]   ;;  %v4080_v49 = vld [vmem:[#allocation2 + $0xc4] ss:$8 sps:$4 sm:$0xff]   ;;  %v4082_v50 = vld [vmem:[#allocation2 + $0xc0] ss:$8 sps:$4 sm:$0xff]  }
  0x44   :  { %v4083_v51 = vld [vmem:[#allocation2 + $0xd4] ss:$8 sps:$4 sm:$0xff]   ;;  %v4085_v52 = vld [vmem:[#allocation2 + $0xd0] ss:$8 sps:$4 sm:$0xff]   ;;  %v4086_v53 = vld [vmem:[#allocation2 + $0xe4] ss:$8 sps:$4 sm:$0xff]  }
  0x45   :  { %3564 = vmatpush3.bf16.msra.mxu0 %v4480_v9  ;;  %4017 = vmatpush1.bf16.msra.mxu1 %v4098_v40  ;;  %v4088_v54 = vld [vmem:[#allocation2 + $0xe0] ss:$8 sps:$4 sm:$0xff]   ;;  %v4089_v55 = vld [vmem:[#allocation2 + $0xf4] ss:$8 sps:$4 sm:$0xff]   ;;  %v4106_v56 = vld [vmem:[#allocation4 + $0x4c] ss:$12 sps:$4 sm:$0xff]  }
  0x46   :  { %3565 = vmatprep.subr.bf16.mxu0 %v4486_v10  ;;  %4014 = vmatprep.subr.bf16.mxu1 %v4103_v43  ;;  %v4091_v57 = vld [vmem:[#allocation2 + $0xf0] ss:$8 sps:$4 sm:$0xff]  }
  0x47   :  { %v4523_v58 = vld [vmem:[#allocation6 + $0x50] ss:$12 sps:$4 sm:$0xff]  }
  0x49   :  { %3566 = vmatpush3.bf16.msra.mxu0 %v4493_v12  ;;  %4018 = vmatpush1.bf16.msra.mxu1 %v4101_v44 }
  0x4a   :  { %3567 = vmatprep.subr.bf16.mxu0 %v4499_v13  ;;  %3931 = vmatprep.subr.bf16.mxu1 %v4523_v58 }
  0x4d   :  { %3568 = vmatpush3.bf16.msra.mxu0 %v4505_v14 }
  0x4e   :  { %3569 = vmatprep.subr.bf16.mxu0 %v4511_v15 }
  0x51   :  { %3570 = vmatpush3.bf16.msra.mxu0 %v4517_v16 }
  0x52   :  { %738 = vmatprep.subr.bf16.mxu0 %v4094_v22 }
  0x54   :  { %441 = vmatmul.mubr.bf16.vlgmr.msra.gmra.mxu0 %v4046_v17 }
  0x55   :  { %448 = vmatprep.mubr.bf16.mxu0 %v4047_v18  ;;  %739 = vmatpush1.bf16.msra.mxu0 %v4092_v21  ;;  %v4104_v18 = vld [vmem:[#allocation4 + $0x48] ss:$12 sps:$4 sm:$0xff]  }
  0x56   :  { %740 = vmatprep.subr.bf16.mxu0 %v4097_v24  ;;  %v4112_v24 = vld [vmem:[#allocation4 + $0x1c] ss:$12 sps:$4 sm:$0xff]  }
  0x59   :  { %741 = vmatpush1.bf16.msra.mxu0 %v4095_v23  ;;  %v4107_v23 = vld [vmem:[#allocation4 + $0x30] ss:$12 sps:$4 sm:$0xff]  }
  0x5a   :  { %742 = vmatprep.subr.bf16.mxu0 %v4100_v39 }
  0x5c   :  { %449 = vmatmul.mubr.bf16.gmra.mxu0 %v4049_v19 }
  0x5d   :  { %456 = vmatprep.mubr.bf16.mxu0 %v4050_v20  ;;  %743 = vmatpush1.bf16.msra.mxu0 %v4098_v40  ;;  %v4109_v20 = vld [vmem:[#allocation4 + $0x34] ss:$12 sps:$4 sm:$0xff]  }
  0x5e   :  { %744 = vmatprep.subr.bf16.mxu0 %v4103_v43 }
  0x61   :  { %745 = vmatpush1.bf16.msra.mxu0 %v4101_v44 }
  0x62   :  { %1204 = vmatprep.subr.bf16.mxu0 %v4106_v56 }
  0x64   :  { %457 = vmatmul.mubr.bf16.gmra.mxu0 %v4052_v25 }
  0x65   :  { %464 = vmatprep.mubr.bf16.mxu0 %v4053_v26 }
  0x6c   :  { %465 = vmatmul.mubr.bf16.gmra.mxu0 %v4055_v27 }
  0x6d   :  { %472 = vmatprep.mubr.bf16.mxu0 %v4056_v28 }
  0x74   :  { %473 = vmatmul.mubr.bf16.gmra.mxu0 %v4058_v29  ;;  %v4110_v29 = vld [vmem:[#allocation4 + $0x18] ss:$12 sps:$4 sm:$0xff]  }
  0x75   :  { %480 = vmatprep.mubr.bf16.mxu0 %v4059_v30 }
  0x7c   :  { %481 = vmatmul.mubr.bf16.gmra.mxu0 %v4061_v31  ;;  %v4115_v31 = vld [vmem:[#allocation4 + $0x4] ss:$12 sps:$4 sm:$0xff]  }
  0x7d   :  { %488 = vmatprep.mubr.bf16.mxu0 %v4062_v32 }
  0x84   :  { %489 = vmatmul.mubr.bf16.gmra.mxu0 %v4064_v33 }
  0x85   :  { %496 = vmatprep.mubr.bf16.mxu0 %v4065_v34  ;;  %v4113_v34 = vld [vmem:[#allocation4] ss:$12 sps:$4 sm:$0xff]  }
  0x8c   :  { %497 = vmatmul.mubr.bf16.gmra.mxu0 %v4067_v35 }
  0x8d   :  { %504 = vmatprep.mubr.bf16.mxu0 %v4068_v36 }
  0x94   :  { %505 = vmatmul.mubr.bf16.gmra.mxu0 %v4070_v37 }
  0x95   :  { %512 = vmatprep.mubr.bf16.mxu0 %v4071_v38 }
  0x9c   :  { %513 = vmatmul.mubr.bf16.gmra.mxu0 %v4073_v41 }
  0x9d   :  { %520 = vmatprep.mubr.bf16.mxu0 %v4074_v42 }
  0xa4   :  { %521 = vmatmul.mubr.bf16.gmra.mxu0 %v4076_v46 }
  0xa5   :  { %528 = vmatprep.mubr.bf16.mxu0 %v4077_v47 }
  0xac   :  { %529 = vmatmul.mubr.bf16.gmra.mxu0 %v4079_v48 }
  0xad   :  { %536 = vmatprep.mubr.bf16.mxu0 %v4080_v49 }
  0xb4   :  { %537 = vmatmul.mubr.bf16.gmra.mxu0 %v4082_v50 }
  0xb5   :  { %544 = vmatprep.mubr.bf16.mxu0 %v4083_v51 }
  0xbc   :  { %545 = vmatmul.mubr.bf16.gmra.mxu0 %v4085_v52 }
  0xbd   :  { %552 = vmatprep.mubr.bf16.mxu0 %v4086_v53 }
  0xc4   :  { %553 = vmatmul.mubr.bf16.gmra.mxu0 %v4088_v54 }
  0xc5   :  { %560 = vmatprep.mubr.bf16.mxu0 %v4089_v55 }
  0xcc   :  { %561 = vmatmul.mubr.bf16.gmra.mxu0 %v4091_v57 }
  0xcd   :  { %762 = vmatprep.mubr.bf16.mxu0 %v5976_v45 }
 0x114   :  { %v3571_v59 = vpop.f32.mrf.mxu0 }
 0x116   :  { %v3572_v60 = vpop.f32.mrf.mxu0 }
 0x117   :  { %v3573_v63 = vadd.f32 %v3572_v60, %v3571_v59 }
 0x118   :  { %v3574_v61 = vpop.f32.mrf.mxu0 }
 0x11a   :  { %v3575_v62 = vpop.f32.mrf.mxu0 }
 0x11b   :  { %v3576_v11 = vadd.f32 %v3575_v62, %v3574_v61 }
 0x11c   :  { %v3577_v17 = vpop.f32.mrf.mxu0 }
 0x11d   :  { %v4526_v19 = vpack.c.bf16 %v3576_v11, %v3573_v63 }
 0x11e   :  { %v3578_v21 = vpop.f32.mrf.mxu0 }
 0x11f   :  { %3413 = vmatmul.mubr.msk.bf16.vlgmr.msra.gmra.mxu0 %vm681_vm0, %v4526_v19  ;;  %v3579_v26 = vadd.f32 %v3578_v21, %v3577_v17 }
 0x120   :  { %v3580_v22 = vpop.f32.mrf.mxu0  ;;  %772 = vmatprep.mubr.bf16.mxu0 %v5976_v45  ;;  %1205 = vmatpush1.bf16.msra.mxu0 %v4104_v18 }
 0x121   :  { %1206 = vmatprep.subr.bf16.mxu0 %v4109_v20 }
 0x122   :  { %v3581_v25 = vpop.f32.mrf.mxu0 }
 0x123   :  { %v3582_v27 = vadd.f32 %v3581_v25, %v3580_v22 }
 0x124   :  { %v3583_v28 = vpop.f32.mrf.mxu0  ;;  %1207 = vmatpush1.bf16.msra.mxu0 %v4107_v23 }
 0x125   :  { %v4531_v30 = vpack.c.bf16 %v3582_v27, %v3579_v26  ;;  %1208 = vmatprep.subr.bf16.mxu0 %v4112_v24 }
 0x126   :  { %v3584_v32 = vpop.f32.mrf.mxu0 }
 0x127   :  { %3414 = vmatmul.mubr.msk.bf16.gmra.mxu0 %vm681_vm0, %v4531_v30  ;;  %v3585_v36 = vadd.f32 %v3584_v32, %v3583_v28  ;;  %v4117_v32 = vld [vmem:[#allocation6 + $0x38] ss:$12 sps:$4 sm:$0xff]  }
 0x128   :  { %v3586_v33 = vpop.f32.mrf.mxu0  ;;  %782 = vmatprep.mubr.bf16.mxu0 %v5976_v45  ;;  %1209 = vmatpush1.bf16.msra.mxu0 %v4110_v29 }
 0x129   :  { %1210 = vmatprep.subr.bf16.mxu0 %v4115_v31 }
 0x12a   :  { %v3587_v35 = vpop.f32.mrf.mxu0 }
 0x12b   :  { %v3588_v37 = vadd.f32 %v3587_v35, %v3586_v33  ;;  %v4118_v35 = vld [vmem:[#allocation6 + $0x20] ss:$12 sps:$4 sm:$0xff]  }
 0x12c   :  { %v3589_v38 = vpop.f32.mrf.mxu0  ;;  %1211 = vmatpush1.bf16.msra.mxu0 %v4113_v34 }
 0x12d   :  { %v4536_v39 = vpack.c.bf16 %v3588_v37, %v3585_v36 }
 0x12e   :  { %v3590_v40 = vpop.f32.mrf.mxu0 }
 0x12f   :  { %3415 = vmatmul.mubr.msk.bf16.gmra.mxu0 %vm681_vm0, %v4536_v39  ;;  %v3591_v43 = vadd.f32 %v3590_v40, %v3589_v38 }
 0x130   :  { %v3592_v41 = vpop.f32.mrf.mxu0  ;;  %792 = vmatprep.mubr.bf16.mxu0 %v5976_v45 }
 0x132   :  { %v3593_v42 = vpop.f32.mrf.mxu0 }
 0x133   :  { %v3594_v44 = vadd.f32 %v3593_v42, %v3592_v41  ;;  %v4119_v42 = vld [vmem:[#allocation6 + $0x8] ss:$12 sps:$4 sm:$0xff]  }
 0x134   :  { %v3595_v46 = vpop.f32.mrf.mxu0 }
 0x135   :  { %v4541_v47 = vpack.c.bf16 %v3594_v44, %v3591_v43  ;;  %v4578_v44 = vld [vmem:[#allocation4 + $0x50] ss:$12 sps:$4 sm:$0xff]  }
 0x136   :  { %v3596_v48 = vpop.f32.mrf.mxu0 }
 0x137   :  { %3416 = vmatmul.mubr.msk.bf16.gmra.mxu0 %vm681_vm0, %v4541_v47  ;;  %v3597_v51 = vadd.f32 %v3596_v48, %v3595_v46 }
 0x138   :  { %v3598_v49 = vpop.f32.mrf.mxu0  ;;  %802 = vmatprep.mubr.bf16.mxu0 %v5976_v45 }
 0x13a   :  { %v3599_v50 = vpop.f32.mrf.mxu0 }
 0x13b   :  { %v3600_v52 = vadd.f32 %v3599_v50, %v3598_v49 }
 0x13c   :  { %v3601_v53 = vpop.f32.mrf.mxu0 }
 0x13d   :  { %v4546_v54 = vpack.c.bf16 %v3600_v52, %v3597_v51 }
 0x13e   :  { %v3602_v55 = vpop.f32.mrf.mxu0 }
 0x13f   :  { %3417 = vmatmul.mubr.msk.bf16.gmra.mxu0 %vm681_vm0, %v4546_v54  ;;  %v3603_v59 = vadd.f32 %v3602_v55, %v3601_v53 }
 0x140   :  { %v3604_v56 = vpop.f32.mrf.mxu0  ;;  %812 = vmatprep.mubr.bf16.mxu0 %v5976_v45 }
 0x142   :  { %v3605_v57 = vpop.f32.mrf.mxu0 }
 0x143   :  { %v3606_v60 = vadd.f32 %v3605_v57, %v3604_v56 }
 0x144   :  { %v3607_v61 = vpop.f32.mrf.mxu0 }
 0x145   :  { %v4551_v62 = vpack.c.bf16 %v3606_v60, %v3603_v59 }
 0x146   :  { %v3608_v63 = vpop.f32.mrf.mxu0 }
 0x147   :  { %3418 = vmatmul.mubr.msk.bf16.gmra.mxu0 %vm681_vm0, %v4551_v62  ;;  %v3609_v18 = vadd.f32 %v3608_v63, %v3607_v61 }
 0x148   :  { %v3610_v11 = vpop.f32.mrf.mxu0  ;;  %822 = vmatprep.mubr.bf16.mxu0 %v5976_v45 }
 0x14a   :  { %v3611_v17 = vpop.f32.mrf.mxu0 }
 0x14b   :  { %v3612_v20 = vadd.f32 %v3611_v17, %v3610_v11 }
 0x14c   :  { %v3613_v21 = vpop.f32.mrf.mxu0 }
 0x14d   :  { %v4556_v22 = vpack.c.bf16 %v3612_v20, %v3609_v18 }
 0x14e   :  { %v3614_v23 = vpop.f32.mrf.mxu0 }
 0x14f   :  { %3419 = vmatmul.mubr.msk.bf16.gmra.mxu0 %vm681_vm0, %v4556_v22  ;;  %v3615_v26 = vadd.f32 %v3614_v23, %v3613_v21 }
 0x150   :  { %v3616_v24 = vpop.f32.mrf.mxu0  ;;  %1228 = vmatprep.mubr.bf16.mxu0 %v5976_v45 }
 0x152   :  { %v3617_v25 = vpop.f32.mrf.mxu0 }
 0x153   :  { %v3618_v27 = vadd.f32 %v3617_v25, %v3616_v24 }
 0x154   :  { %v3619_v28 = vpop.f32.mrf.mxu0 }
 0x155   :  { %v4561_v29 = vpack.c.bf16 %v3618_v27, %v3615_v26 }
 0x156   :  { %v3620_v31 = vpop.f32.mrf.mxu0 }
 0x157   :  { %3420 = vmatmul.mubr.msk.bf16.vlgmr.msra.gmra.mxu1 %vm681_vm0, %v4561_v29  ;;  %3457 = vmatmul.mubr.msk.bf16.vlgmr.msra.gmra.mxu0 %vm681_vm0, %v4517_v16  ;;  %v3621_v36 = vadd.f32 %v3620_v31, %v3619_v28 }
 0x158   :  { %v3622_v33 = vpop.f32.mrf.mxu0  ;;  %842 = vmatprep.mubr.bf16.mxu1 %v5976_v45  ;;  %1238 = vmatprep.mubr.bf16.mxu0 %v5976_v45 }
 0x159   :  { %3932 = vmatpush3.bf16.msra.mxu1 %v4523_v58 }
 0x15a   :  { %v3623_v34 = vpop.f32.mrf.mxu0  ;;  %3933 = vmatprep.subr.bf16.mxu1 %v4117_v32 }
 0x15b   :  { %v3624_v37 = vadd.f32 %v3623_v34, %v3622_v33 }
 0x15c   :  { %v3625_v38 = vpop.f32.mrf.mxu0 }
 0x15d   :  { %v4570_v40 = vpack.c.bf16 %v3624_v37, %v3621_v36  ;;  %3934 = vmatpush3.bf16.msra.mxu1 %v4117_v32 }
 0x15e   :  { %v3626_v41 = vpop.f32.mrf.mxu0  ;;  %3935 = vmatprep.subr.bf16.mxu1 %v4118_v35 }
 0x15f   :  { %3421 = vmatmul.mubr.msk.bf16.gmra.mxu1 %vm681_vm0, %v4570_v40  ;;  %3458 = vmatmul.mubr.msk.bf16.gmra.mxu0 %vm681_vm0, %v4505_v14  ;;  %v3627_v46 = vadd.f32 %v3626_v41, %v3625_v38 }
 0x160   :  { %v3628_v43 = vpop.f32.mrf.mxu0  ;;  %852 = vmatprep.mubr.bf16.mxu1 %v5976_v45  ;;  %1248 = vmatprep.mubr.bf16.mxu0 %v5976_v45 }
 0x161   :  { %3936 = vmatpush3.bf16.msra.mxu1 %v4118_v35 }
 0x162   :  { %v3629_v58 = vpop.f32.mrf.mxu0  ;;  %3937 = vmatprep.subr.bf16.mxu1 %v4119_v42 }
 0x163   :  { %v3630_v48 = vadd.f32 %v3629_v58, %v3628_v43 }
 0x164   :  { %v3631_v49 = vpop.f32.mrf.mxu0 }
 0x165   :  { %v4580_v50 = vpack.c.bf16 %v3630_v48, %v3627_v46  ;;  %3938 = vmatpush3.bf16.msra.mxu1 %v4119_v42 }
 0x166   :  { %v3632_v51 = vpop.f32.mrf.mxu0  ;;  %3971 = vmatprep.subr.bf16.mxu1 %v4578_v44 }
 0x167   :  { %3422 = vmatmul.mubr.msk.bf16.gmra.mxu1 %vm681_vm0, %v4580_v50  ;;  %3459 = vmatmul.mubr.msk.bf16.gmra.mxu0 %vm681_vm0, %v4493_v12  ;;  %v3633_v55 = vadd.f32 %v3632_v51, %v3631_v49 }
 0x168   :  { %v3634_v52 = vpop.f32.mrf.mxu0  ;;  %862 = vmatprep.mubr.bf16.mxu1 %v5976_v45  ;;  %1258 = vmatprep.mubr.bf16.mxu0 %v5976_v45 }
 0x16a   :  { %v3635_v53 = vpop.f32.mrf.mxu0 }
 0x16b   :  { %v3636_v56 = vadd.f32 %v3635_v53, %v3634_v52 }
 0x16c   :  { %v3637_v57 = vpop.f32.mrf.mxu0 }
 0x16d   :  { %v4589_v59 = vpack.c.bf16 %v3636_v56, %v3633_v55  ;;  %v4122_v55 = vld [vmem:[#allocation4 + $0x20] ss:$12 sps:$4 sm:$0xff]  }
 0x16e   :  { %v3638_v60 = vpop.f32.mrf.mxu0  ;;  %v4139_v56 = vld [vmem:[#allocation7 + $0x20] ss:$8 sps:$4 sm:$0xff]  }
 0x16f   :  { %3423 = vmatmul.mubr.msk.bf16.gmra.mxu1 %vm681_vm0, %v4589_v59  ;;  %3460 = vmatmul.mubr.msk.bf16.gmra.mxu0 %vm681_vm0, %v4480_v9  ;;  %v3639_v11 = vadd.f32 %v3638_v60, %v3637_v57 }
 0x170   :  { %v3640_v61 = vpop.f32.mrf.mxu0  ;;  %872 = vmatprep.mubr.bf16.mxu1 %v5976_v45  ;;  %1268 = vmatprep.mubr.bf16.mxu0 %v5976_v45 }
 0x172   :  { %v3641_v63 = vpop.f32.mrf.mxu0 }
 0x173   :  { %v3642_v17 = vadd.f32 %v3641_v63, %v3640_v61  ;;  %v4142_v61 = vld [vmem:[#allocation7 + $0x10] ss:$8 sps:$4 sm:$0xff]  }
 0x174   :  { %v3643_v18 = vpop.f32.mrf.mxu0 }
 0x175   :  { %v4597_v20 = vpack.c.bf16 %v3642_v17, %v3639_v11  ;;  %v4147_v11 = vld [vmem:[#allocation7 + $0x4] ss:$8 sps:$4 sm:$0xff]  }
 0x176   :  { %v3644_v21 = vpop.f32.mrf.mxu0 }
 0x177   :  { %3424 = vmatmul.mubr.msk.bf16.gmra.mxu1 %vm681_vm0, %v4597_v20  ;;  %3461 = vmatmul.mubr.msk.bf16.gmra.mxu0 %vm681_vm0, %v4469_v7  ;;  %v3645_v25 = vadd.f32 %v3644_v21, %v3643_v18  ;;  %v4222_v18 = vld [vmem:[%s5967_s1 + $0x38] sm:$0xff]  }
 0x178   :  { %v3646_v23 = vpop.f32.mrf.mxu0  ;;  %882 = vmatprep.mubr.bf16.mxu1 %v5976_v45  ;;  %1278 = vmatprep.mubr.bf16.mxu0 %v5976_v45 }
 0x17a   :  { %v3647_v24 = vpop.f32.mrf.mxu0 }
 0x17b   :  { %v3648_v26 = vadd.f32 %v3647_v24, %v3646_v23  ;;  %v4150_v23 = vld [vmem:[#allocation7 + $0xf4] ss:$8 sps:$4 sm:$0xff]  }
 0x17c   :  { %v3649_v27 = vpop.f32.mrf.mxu0 }
 0x17d   :  { %v4605_v28 = vpack.c.bf16 %v3648_v26, %v3645_v25  ;;  %v4148_v25 = vld [vmem:[#allocation7 + $0xf0] ss:$8 sps:$4 sm:$0xff]  }
 0x17e   :  { %v3650_v31 = vpop.f32.mrf.mxu0 }
 0x17f   :  { %3425 = vmatmul.mubr.msk.bf16.gmra.mxu1 %vm681_vm0, %v4605_v28  ;;  %3462 = vmatmul.mubr.msk.bf16.gmra.mxu0 %vm681_vm0, %v4457_v5  ;;  %v3651_v34 = vadd.f32 %v3650_v31, %v3649_v27  ;;  %v4153_v27 = vld [vmem:[#allocation7 + $0xe4] ss:$8 sps:$4 sm:$0xff]   ;;  %v4224_v31 = vld [vmem:[%s5967_s1 + $0x50] sm:$0xff]  }
 0x180   :  { %v3652_v32 = vpop.f32.mrf.mxu0  ;;  %892 = vmatprep.mubr.bf16.mxu1 %v5976_v45  ;;  %1288 = vmatprep.mubr.bf16.mxu0 %v5976_v45 }
 0x182   :  { %v3653_v33 = vpop.f32.mrf.mxu0 }
 0x183   :  { %v3654_v35 = vadd.f32 %v3653_v33, %v3652_v32  ;;  %v4151_v32 = vld [vmem:[#allocation7 + $0xe0] ss:$8 sps:$4 sm:$0xff]  }
 0x184   :  { %v3655_v36 = vpop.f32.mrf.mxu0 }
 0x185   :  { %v598_v37 = vpack.c.bf16 %v3654_v35, %v3651_v34  ;;  %v4156_v34 = vld [vmem:[#allocation7 + $0xd4] ss:$8 sps:$4 sm:$0xff]  }
 0x186   :  { %v3656_v38 = vpop.f32.mrf.mxu0 }
 0x187   :  { %3426 = vmatmul.mubr.msk.bf16.gmra.mxu1 %vm681_vm0, %v598_v37  ;;  %3463 = vmatmul.mubr.msk.bf16.gmra.mxu0 %vm681_vm0, %v4445_v3  ;;  %v3657_v42 = vadd.f32 %v3656_v38, %v3655_v36  ;;  %v4154_v36 = vld [vmem:[#allocation7 + $0xd0] ss:$8 sps:$4 sm:$0xff]   ;;  %v4159_v38 = vld [vmem:[#allocation7 + $0xc4] ss:$8 sps:$4 sm:$0xff]  }
 0x188   :  { %v3658_v41 = vpop.f32.mrf.mxu0  ;;  %902 = vmatprep.mubr.bf16.mxu1 %v5976_v45  ;;  %1298 = vmatprep.mubr.bf16.mxu0 %v5976_v45 }
 0x18a   :  { %v3659_v5 = vpop.f32.mrf.mxu0 }
 0x18b   :  { %v3660_v43 = vadd.f32 %v3659_v5, %v3658_v41  ;;  %v4225_v5 = vld [vmem:[%s5967_s1 + $0x58] sm:$0xff]  }
 0x18c   :  { %v3661_v58 = vpop.f32.mrf.mxu0 }
 0x18d   :  { %v599_v46 = vpack.c.bf16 %v3660_v43, %v3657_v42  ;;  %v4226_v42 = vld [vmem:[%s5967_s1 + $0x60] sm:$0xff]  }
 0x18e   :  { %v3662_v48 = vpop.f32.mrf.mxu0  ;;  %v4157_v43 = vld [vmem:[#allocation7 + $0xc0] ss:$8 sps:$4 sm:$0xff]  }
 0x18f   :  { %3427 = vmatmul.mubr.msk.bf16.gmra.mxu1 %vm681_vm0, %v599_v46  ;;  %3464 = vmatmul.mubr.msk.bf16.gmra.mxu0 %vm681_vm0, %v4433_v1  ;;  %v3663_v51 = vadd.f32 %v3662_v48, %v3661_v58  ;;  %v4121_v1 = vld [vmem:[#allocation4 + $0x38] ss:$12 sps:$4 sm:$0xff]  }
 0x190   :  { %v3664_v49 = vpop.f32.mrf.mxu0  ;;  %912 = vmatprep.mubr.bf16.mxu1 %v5976_v45  ;;  %1308 = vmatprep.mubr.bf16.mxu0 %v5976_v45 }
 0x192   :  { %v3665_v3 = vpop.f32.mrf.mxu0 }
 0x193   :  { %v3666_v52 = vadd.f32 %v3665_v3, %v3664_v49  ;;  %v4160_v49 = vld [vmem:[#allocation7 + $0xb0] ss:$8 sps:$4 sm:$0xff]   ;;  %v4174_v3 = vld [vmem:[#allocation7 + $0x174] ss:$8 sps:$4 sm:$0xff]  }
 0x194   :  { %2288 = vmatprep.subr.bf16.mxu0 %v4174_v3  ;;  %v4184_v3 = vld [vmem:[#allocation7 + $0x130] ss:$8 sps:$4 sm:$0xff]  }
 0x195   :  { %v600_v53 = vpack.c.bf16 %v3666_v52, %v3663_v51  ;;  %v4165_v52 = vld [vmem:[#allocation7 + $0xa4] ss:$8 sps:$4 sm:$0xff]  }
 0x197   :  { %3428 = vmatmul.mubr.msk.bf16.gmra.mxu1 %vm681_vm0, %v600_v53  ;;  %3465 = vmatmul.mubr.msk.bf16.gmra.mxu0 %vm681_vm0, %v4511_v15 }
 0x198   :  { %3939 = vmatprep.mubr.msk.bf16.mxu1 %vm681_vm0, %v4526_v19  ;;  %1318 = vmatprep.mubr.bf16.mxu0 %v5976_v45  ;;  %v4123_v19 = vld [vmem:[#allocation4 + $0x8] ss:$12 sps:$4 sm:$0xff]  }
 0x19f   :  { %3940 = vmatmul.mubr.msk.bf16.vlgmr.msra.gmra.mxu1 %vm681_vm0, %v4531_v30  ;;  %3466 = vmatmul.mubr.msk.bf16.gmra.mxu0 %vm681_vm0, %v4499_v13  ;;  %v4126_v13 = vld [vmem:[#allocation7 + $0x74] ss:$8 sps:$4 sm:$0xff]  }
 0x1a0   :  { %3943 = vmatprep.mubr.msk.bf16.mxu1 %vm681_vm0, %v4536_v39  ;;  %1328 = vmatprep.mubr.bf16.mxu0 %v5976_v45 }
 0x1a1   :  { %3972 = vmatpush3.bf16.msra.mxu1 %v4578_v44  ;;  %v4141_v44 = vld [vmem:[#allocation7 + $0x24] ss:$8 sps:$4 sm:$0xff]  }
 0x1a2   :  { %3973 = vmatprep.subr.bf16.mxu1 %v4121_v1 }
 0x1a5   :  { %3974 = vmatpush3.bf16.msra.mxu1 %v4121_v1 }
 0x1a6   :  { %3975 = vmatprep.subr.bf16.mxu1 %v4122_v55 }
 0x1a7   :  { %3944 = vmatmul.mubr.msk.bf16.gmra.mxu1 %vm681_vm0, %v4541_v47  ;;  %3467 = vmatmul.mubr.msk.bf16.gmra.mxu0 %vm681_vm0, %v4486_v10  ;;  %v4132_v10 = vld [vmem:[#allocation7 + $0x54] ss:$8 sps:$4 sm:$0xff]   ;;  %v4135_v47 = vld [vmem:[#allocation7 + $0x44] ss:$8 sps:$4 sm:$0xff]  }
 0x1a8   :  { %3947 = vmatprep.mubr.msk.bf16.mxu1 %vm681_vm0, %v4546_v54  ;;  %1338 = vmatprep.mubr.bf16.mxu0 %v5976_v45 }
 0x1a9   :  { %3976 = vmatpush3.bf16.msra.mxu1 %v4122_v55  ;;  %v4227_v55 = vld [vmem:[%s5967_s1 + $0x68] sm:$0xff]  }
 0x1aa   :  { %3977 = vmatprep.subr.bf16.mxu1 %v4123_v19 }
 0x1ad   :  { %3978 = vmatpush3.bf16.msra.mxu1 %v4123_v19  ;;  %v1552_v19 = vlaneseq }
 0x1ae   :  { %2095 = vmatprep.subr.bf16.mxu1 %v4126_v13  ;;  %v4228_v13 = vld [vmem:[%s5967_s1 + $0x70] sm:$0xff]  }
 0x1af   :  { %3948 = vmatmul.mubr.msk.bf16.gmra.mxu1 %vm681_vm0, %v4551_v62  ;;  %3468 = vmatmul.mubr.msk.bf16.gmra.mxu0 %vm681_vm0, %v4475_v8  ;;  %v4138_v62 = vld [vmem:[#allocation7 + $0x34] ss:$8 sps:$4 sm:$0xff]  }
 0x1b0   :  { %3951 = vmatprep.mubr.msk.bf16.mxu1 %vm681_vm0, %v4556_v22  ;;  %1348 = vmatprep.mubr.bf16.mxu0 %v5976_v45 }
 0x1b7   :  { %3952 = vmatmul.mubr.msk.bf16.gmra.mxu1 %vm681_vm0, %v4561_v29  ;;  %3469 = vmatmul.mubr.msk.bf16.gmra.mxu0 %vm681_vm0, %v4463_v6  ;;  %v4136_v29 = vld [vmem:[#allocation7 + $0x30] ss:$8 sps:$4 sm:$0xff]  }
 0x1b8   :  { %3955 = vmatprep.mubr.msk.bf16.mxu1 %vm681_vm0, %v4570_v40  ;;  %1358 = vmatprep.mubr.bf16.mxu0 %v5976_v45 }
 0x1bf   :  { %3956 = vmatmul.mubr.msk.bf16.gmra.mxu1 %vm681_vm0, %v4580_v50  ;;  %3470 = vmatmul.mubr.msk.bf16.gmra.mxu0 %vm681_vm0, %v4451_v4  ;;  %v4129_v4 = vld [vmem:[#allocation7 + $0x64] ss:$8 sps:$4 sm:$0xff]  }
 0x1c0   :  { %3959 = vmatprep.mubr.msk.bf16.mxu1 %vm681_vm0, %v4589_v59  ;;  %1368 = vmatprep.mubr.bf16.mxu0 %v5976_v45  ;;  %v4144_v59 = vld [vmem:[#allocation7 + $0x14] ss:$8 sps:$4 sm:$0xff]  }
 0x1c7   :  { %3960 = vmatmul.mubr.msk.bf16.gmra.mxu1 %vm681_vm0, %v4597_v20  ;;  %3471 = vmatmul.mubr.msk.bf16.gmra.mxu0 %vm681_vm0, %v4439_v2  ;;  %v4124_v2 = vld [vmem:[#allocation7 + $0x70] ss:$8 sps:$4 sm:$0xff]   ;;  %v4145_v20 = vld [vmem:[#allocation7] ss:$8 sps:$4 sm:$0xff]  }
 0x1c8   :  { %3963 = vmatprep.mubr.msk.bf16.mxu1 %vm681_vm0, %v4605_v28  ;;  %1378 = vmatprep.mubr.bf16.mxu0 %v5976_v45 }
 0x1cf   :  { %3964 = vmatmul.mubr.msk.bf16.gmra.mxu1 %vm681_vm0, %v598_v37  ;;  %3472 = vmatmul.mubr.msk.bf16.gmra.mxu0 %vm681_vm0, %v4428_v0  ;;  %v4127_v0 = vld [vmem:[#allocation7 + $0x60] ss:$8 sps:$4 sm:$0xff]  }
 0x1d0   :  { %3967 = vmatprep.mubr.msk.bf16.mxu1 %vm681_vm0, %v599_v46  ;;  %2320 = vmatprep.mubr.bf16.mxu0 %v5976_v45  ;;  %v4162_v46 = vld [vmem:[#allocation7 + $0xb4] ss:$8 sps:$4 sm:$0xff]  }
 0x1d7   :  { %3968 = vmatmul.mubr.msk.bf16.gmra.mxu1 %vm681_vm0, %v600_v53  ;;  %v4172_v53 = vld [vmem:[#allocation7 + $0x170] ss:$8 sps:$4 sm:$0xff]  }
 0x1d8   :  { %3979 = vmatprep.mubr.msk.bf16.mxu1 %vm681_vm0, %v4517_v16  ;;  %v4130_v16 = vld [vmem:[#allocation7 + $0x50] ss:$8 sps:$4 sm:$0xff]   ;;  %2289 = vmatpush1.bf16.msra.mxu0 %v4172_v53 }
 0x1df   :  { %v4680_v6 = vpop.f32.mrf.mxu0  ;;  %3980 = vmatmul.mubr.msk.bf16.vlgmr.msra.gmra.mxu1 %vm681_vm0, %v4505_v14 }
 0x1e0   :  { %3983 = vmatprep.mubr.msk.bf16.mxu1 %vm681_vm0, %v4493_v12  ;;  %2096 = vmatpush1.bf16.msra.mxu1 %v4124_v2  ;;  %v4133_v12 = vld [vmem:[#allocation7 + $0x40] ss:$8 sps:$4 sm:$0xff]  }
 0x1e1   :  { %v4686_v8 = vpop.f32.mrf.mxu0  ;;  %2097 = vmatprep.subr.bf16.mxu1 %v4129_v4  ;;  %v4163_v2 = vld [vmem:[#allocation7 + $0xa0] ss:$8 sps:$4 sm:$0xff]   ;;  %v4177_v4 = vld [vmem:[#allocation7 + $0x164] ss:$8 sps:$4 sm:$0xff]  }
 0x1e2   :  { %2290 = vmatprep.subr.bf16.mxu0 %v4177_v4 }
 0x1e3   :  { %v4688_v30 = vpop.f32.mrf.mxu0 }
 0x1e4   :  { %2098 = vmatpush1.bf16.msra.mxu1 %v4127_v0 }
 0x1e5   :  { %v4690_v39 = vpop.f32.mrf.mxu0  ;;  %2099 = vmatprep.subr.bf16.mxu1 %v4132_v10  ;;  %v4168_v10 = vld [vmem:[#allocation7 + $0x94] ss:$8 sps:$4 sm:$0xff]  }
 0x1e7   :  { %v4692_v54 = vpop.f32.mrf.mxu0  ;;  %3984 = vmatmul.mubr.msk.bf16.gmra.mxu1 %vm681_vm0, %v4480_v9  ;;  %v4221_v9 = vld [vmem:[%s5967_s1 + $0x30] sm:$0xff]  }
 0x1e8   :  { %3987 = vmatprep.mubr.msk.bf16.mxu1 %vm681_vm0, %v4469_v7  ;;  %2100 = vmatpush1.bf16.msra.mxu1 %v4130_v16  ;;  %v4220_v7 = vld [vmem:[%s5967_s1 + $0x28] sm:$0xff]  }
 0x1e9   :  { %v4698_v14 = vpop.f32.mrf.mxu0  ;;  %2101 = vmatprep.subr.bf16.mxu1 %v4135_v47  ;;  %v4175_v16 = vld [vmem:[#allocation7 + $0x160] ss:$8 sps:$4 sm:$0xff]  }
 0x1ea   :  { %2291 = vmatpush1.bf16.msra.mxu0 %v4175_v16 }
 0x1eb   :  { %v4700_v22 = vpop.f32.mrf.mxu0 }
 0x1ec   :  { %2102 = vmatpush1.bf16.msra.mxu1 %v4133_v12  ;;  %v4780_v12 = vshrl.u32 %v1552_v19, 7 }
 0x1ed   :  { %v4702_v40 = vpop.f32.mrf.mxu0  ;;  %2103 = vmatprep.subr.bf16.mxu1 %v4138_v62  ;;  %v4166_v62 = vld [vmem:[#allocation7 + $0x90] ss:$8 sps:$4 sm:$0xff]  }
 0x1ef   :  { %v4704_v50 = vpop.f32.mrf.mxu0  ;;  %3988 = vmatmul.mubr.msk.bf16.gmra.mxu1 %vm681_vm0, %v4220_v7  ;;  %v4171_v7 = vld [vmem:[#allocation7 + $0x84] ss:$8 sps:$4 sm:$0xff]  }
 0x1f0   :  { %3991 = vmatprep.mubr.msk.bf16.mxu1 %vm681_vm0, %v4221_v9  ;;  %2104 = vmatpush1.bf16.msra.mxu1 %v4136_v29  ;;  %v4180_v29 = vld [vmem:[#allocation7 + $0x154] ss:$8 sps:$4 sm:$0xff]   ;;  %v4178_v9 = vld [vmem:[#allocation7 + $0x150] ss:$8 sps:$4 sm:$0xff]  }
 0x1f1   :  { %v4714_v57 = vpop.f32.mrf.mxu0  ;;  %2105 = vmatprep.subr.bf16.mxu1 %v4141_v44  ;;  %2292 = vmatprep.subr.bf16.mxu0 %v4180_v29 }
 0x1f2   :  { %2293 = vmatpush1.bf16.msra.mxu0 %v4178_v9 }
 0x1f3   :  { %v4716_v60 = vpop.f32.mrf.mxu0 }
 0x1f4   :  { %2106 = vmatpush1.bf16.msra.mxu1 %v4139_v56  ;;  %v1558_v56 = vsub.s32 1, %v4780_v12 }
 0x1f5   :  { %v4718_v63 = vpop.f32.mrf.mxu0  ;;  %2107 = vmatprep.subr.bf16.mxu1 %v4144_v59 }
 0x1f7   :  { %v4720_v17 = vpop.f32.mrf.mxu0  ;;  %3992 = vmatmul.mubr.msk.bf16.gmra.mxu1 %vm681_vm0, %v4222_v18  ;;  %v4229_v18 = vld [vmem:[%s5967_s1 + $0x78] sm:$0xff]  }
 0x1f8   :  { %3995 = vmatprep.mubr.msk.bf16.mxu1 %vm681_vm0, %v4511_v15  ;;  %2108 = vmatpush1.bf16.msra.mxu1 %v4142_v61  ;;  %v4223_v15 = vld [vmem:[%s5967_s1 + $0x48] sm:$0xff]  }
 0x1f9   :  { %v4728_v21 = vpop.f32.mrf.mxu0  ;;  %2109 = vmatprep.subr.bf16.mxu1 %v4147_v11  ;;  %v1554_v11 = vsub.s32 0, %v4780_v12 }
 0x1fb   :  { %v4730_v24 = vpop.f32.mrf.mxu0 }
 0x1fc   :  { %2110 = vmatpush1.bf16.msra.mxu1 %v4145_v20  ;;  %v4795_v20 = vld [vmem:[%s5970_s4] sm:$0x7] }
 0x1fd   :  { %v4732_v26 = vpop.f32.mrf.mxu0  ;;  %2111 = vmatprep.subr.bf16.mxu1 %v4150_v23  ;;  %v4169_v23 = vld [vmem:[#allocation7 + $0x80] ss:$8 sps:$4 sm:$0xff]  }
 0x1ff   :  { %v4734_v28 = vpop.f32.mrf.mxu0  ;;  %3996 = vmatmul.mubr.msk.bf16.gmra.mxu1 %vm681_vm0, %v4223_v15 }
 0x200   :  { %3999 = vmatprep.mubr.msk.bf16.mxu1 %vm681_vm0, %v4224_v31  ;;  %2112 = vmatpush2.bf16.msra.mxu1 %v4148_v25  ;;  %v4183_v25 = vld [vmem:[#allocation7 + $0x144] ss:$8 sps:$4 sm:$0xff]   ;;  %v4181_v31 = vld [vmem:[#allocation7 + $0x140] ss:$8 sps:$4 sm:$0xff]  }
 0x201   :  { %v4744_v33 = vpop.f32.mrf.mxu0  ;;  %2113 = vmatprep.subr.bf16.mxu1 %v4153_v27  ;;  %2294 = vmatprep.subr.bf16.mxu0 %v4183_v25  ;;  %v4192_v25 = vld [vmem:[#allocation7 + $0x114] ss:$8 sps:$4 sm:$0xff]  }
 0x202   :  { %2295 = vmatpush1.bf16.msra.mxu0 %v4181_v31 }
 0x203   :  { %v4746_v35 = vpop.f32.mrf.mxu0 }
 0x204   :  { %2114 = vmatpush2.bf16.msra.mxu1 %v4151_v32 }
 0x205   :  { %v4748_v37 = vpop.f32.mrf.mxu0  ;;  %2115 = vmatprep.subr.bf16.mxu1 %v4156_v34  ;;  %v4801_v34 = vrot.slane %v4795_v20, %v1558_v56 }
 0x207   :  { %v4750_v41 = vpop.f32.mrf.mxu0  ;;  %4000 = vmatmul.mubr.msk.bf16.gmra.mxu1 %vm681_vm0, %v4225_v5 }
 0x208   :  { %4003 = vmatprep.mubr.msk.bf16.mxu1 %vm681_vm0, %v4226_v42  ;;  %2116 = vmatpush2.bf16.msra.mxu1 %v4154_v36 }
 0x209   :  { %v4760_v58 = vpop.f32.mrf.mxu0  ;;  %2117 = vmatprep.subr.bf16.mxu1 %v4159_v38  ;;  %v4805_v38 = vrot.slane %v4795_v20, %v1554_v11 }
 0x20b   :  { %v4762_v48 = vpop.f32.mrf.mxu0 }
 0x20c   :  { %2118 = vmatpush2.bf16.msra.mxu1 %v4157_v43 }
 0x20d   :  { %v4764_v51 = vpop.f32.mrf.mxu0  ;;  %2119 = vmatprep.subr.bf16.mxu1 %v4162_v46  ;;  %v4186_v46 = vld [vmem:[#allocation7 + $0x134] ss:$8 sps:$4 sm:$0xff]  }
 0x20e   :  { %2296 = vmatprep.subr.bf16.mxu0 %v4186_v46 }
 0x20f   :  { %v4766_v1 = vpop.f32.mrf.mxu0  ;;  %4004 = vmatmul.mubr.msk.bf16.gmra.mxu1 %vm681_vm0, %v4227_v55  ;;  %2297 = vmatpush1.bf16.msra.mxu0 %v4184_v3  ;;  %v4195_v3 = vld [vmem:[#allocation7 + $0x104] ss:$8 sps:$4 sm:$0xff]  }
 0x210   :  { %4007 = vmatprep.mubr.msk.bf16.mxu1 %vm681_vm0, %v4228_v13  ;;  %2120 = vmatpush2.bf16.msra.mxu1 %v4160_v49 }
 0x211   :  { %v4776_v0 = vpop.f32.mrf.mxu0  ;;  %2121 = vmatprep.subr.bf16.mxu1 %v4165_v52 }
 0x213   :  { %v4778_v47 = vpop.f32.mrf.mxu0 }
 0x214   :  { %2122 = vmatpush2.bf16.msra.mxu1 %v4163_v2  ;;  %v4189_v2 = vld [vmem:[#allocation7 + $0x124] ss:$8 sps:$4 sm:$0xff]  }
 0x215   :  { %v4782_v44 = vpop.f32.mrf.mxu0  ;;  %2123 = vmatprep.subr.bf16.mxu1 %v4168_v10  ;;  %2298 = vmatprep.subr.bf16.mxu0 %v4189_v2 }
 0x217   :  { %v4785_v59 = vpop.f32.mrf.mxu1  ;;  %v1230_v61 = vpop.f32.mrf.mxu0  ;;  %4008 = vmatmul.mubr.msk.bf16.gmra.mxu1 %vm681_vm0, %v4229_v18 }
 0x218   :  { %2124 = vmatpush2.bf16.msra.mxu1 %v4166_v62  ;;  %v1231_v36 = vadd.f32 %v1230_v61, %v4680_v6  ;;  %v4187_v62 = vld [vmem:[#allocation7 + $0x120] ss:$8 sps:$4 sm:$0xff]  }
 0x219   :  { %v4797_v27 = vpop.f32.mrf.mxu1  ;;  %v1232_v15 = vpop.f32.mrf.mxu0  ;;  %2125 = vmatprep.subr.bf16.mxu1 %v4171_v7  ;;  %2299 = vmatpush1.bf16.msra.mxu0 %v4187_v62 }
 0x21a   :  { %v1233_v32 = vadd.f32 %v1232_v15, %v4686_v8  ;;  %v1567_v55 = vadd.f32 %v4805_v38, %v1231_v36  ;;  %v4190_v36 = vld [vmem:[#allocation7 + $0x110] ss:$8 sps:$4 sm:$0xff]   ;;  %2300 = vmatprep.subr.bf16.mxu0 %v4192_v25 }
 0x21b   :  { %v4807_v5 = vpop.f32.mrf.mxu1  ;;  %v1234_v42 = vpop.f32.mrf.mxu0 }
 0x21c   :  { %v1235_v43 = vadd.f32 %v1234_v42, %v4688_v30  ;;  %2126 = vmatpush2.bf16.msra.mxu1 %v4169_v23  ;;  %v1568_v52 = vadd.f32 %v4801_v34, %v1233_v32 }
 0x21d   :  { %v4810_v49 = vpop.f32.mrf.mxu1  ;;  %v1236_v8 = vpop.f32.mrf.mxu0  ;;  %2301 = vmatpush1.bf16.msra.mxu0 %v4190_v36 }
 0x21e   :  { %v1570_v53 = vadd.f32 %v4805_v38, %v1235_v43  ;;  %v1237_v6 = vadd.f32 %v1236_v8, %v4690_v39  ;;  %v1664_v29 = vmax.f32 %v1568_v52, 0.0  ;;  %v1663_v39 = vmax.f32 %v1567_v55, 0.0  ;;  %v4193_v55 = vld [vmem:[#allocation7 + $0x100] ss:$8 sps:$4 sm:$0xff]   ;;  %2302 = vmatprep.subr.bf16.mxu0 %v4195_v3 }
 0x21f   :  { %v4816_v19 = vpop.f32.mrf.mxu1  ;;  %v1240_v13 = vpop.f32.mrf.mxu0 }
 0x220   :  { %v1571_v30 = vadd.f32 %v4801_v34, %v1237_v6  ;;  %v1666_v4 = vmax.f32 %v1570_v53, 0.0  ;;  %v1241_v56 = vadd.f32 %v1240_v13, %v4692_v54 }
 0x221   :  { %v4819_v10 = vpop.f32.mrf.mxu1  ;;  %v1242_v16 = vpop.f32.mrf.mxu0  ;;  %2303 = vmatpush1.bf16.msra.mxu0 %v4193_v55 }
 0x222   :  { %v1667_v7 = vmax.f32 %v1571_v30, 0.0  ;;  %v1243_v9 = vadd.f32 %v1242_v16, %v4698_v14  ;;  %v1759_v15 = vpack.c.bf16 %v1666_v4, %v1663_v39  ;;  %v1573_v54 = vadd.f32 %v4805_v38, %v1241_v56 }
 0x223   :  { %v4823_v61 = vpop.f32.mrf.mxu1  ;;  %v1244_v11 = vpop.f32.mrf.mxu0 }
 0x224   :  { %v1245_v18 = vadd.f32 %v1244_v11, %v4700_v22  ;;  %v1760_v23 = vpack.c.bf16 %v1667_v7, %v1664_v29  ;;  %v1574_v42 = vadd.f32 %v4801_v34, %v1243_v9  ;;  %v1669_v2 = vmax.f32 %v1573_v54, 0.0 }
 0x225   :  { %v4826_v31 = vpop.f32.mrf.mxu1  ;;  %v1246_v32 = vpop.f32.mrf.mxu0 }
 0x226   :  { %v1576_v14 = vadd.f32 %v4805_v38, %v1245_v18  ;;  %v1247_v43 = vadd.f32 %v1246_v32, %v4702_v40  ;;  %2127 = vmatprep.mubr.bf16.mxu1 %v1760_v23  ;;  %v1670_v13 = vmax.f32 %v1574_v42, 0.0 }
 0x227   :  { %v4832_v46 = vpop.f32.mrf.mxu1  ;;  %v1250_v22 = vpop.f32.mrf.mxu0  ;;  %2128 = vmatmul.mubr.bf16.vlgmr.msra.gmra.mxu1 %v1759_v15 }
 0x228   :  { %v1577_v8 = vadd.f32 %v4801_v34, %v1247_v43  ;;  %v1672_v52 = vmax.f32 %v1576_v14, 0.0  ;;  %v1251_v4 = vadd.f32 %v1250_v22, %v4704_v50 }
 0x229   :  { %v4835_v53 = vpop.f32.mrf.mxu1  ;;  %v1252_v6 = vpop.f32.mrf.mxu0 }
 0x22a   :  { %v1673_v30 = vmax.f32 %v1577_v8, 0.0  ;;  %v1253_v40 = vadd.f32 %v1252_v6, %v4714_v57  ;;  %v1762_v56 = vpack.c.bf16 %v1672_v52, %v1669_v2  ;;  %v1579_v50 = vadd.f32 %v4805_v38, %v1251_v4 }
 0x22b   :  { %v4839_v16 = vpop.f32.mrf.mxu1  ;;  %v1254_v62 = vpop.f32.mrf.mxu0 }
 0x22c   :  { %v1255_v29 = vadd.f32 %v1254_v62, %v4716_v60  ;;  %v1763_v7 = vpack.c.bf16 %v1673_v30, %v1670_v13  ;;  %v1580_v11 = vadd.f32 %v4801_v34, %v1253_v40  ;;  %v1675_v54 = vmax.f32 %v1579_v50, 0.0 }
 0x22d   :  { %v4842_v9 = vpop.f32.mrf.mxu1  ;;  %v1256_v39 = vpop.f32.mrf.mxu0 }
 0x22e   :  { %v1582_v18 = vadd.f32 %v4805_v38, %v1255_v29  ;;  %v1257_v57 = vadd.f32 %v1256_v39, %v4718_v63  ;;  %2137 = vmatprep.mubr.bf16.mxu1 %v1763_v7  ;;  %v1676_v42 = vmax.f32 %v1580_v11, 0.0 }
 0x22f   :  { %v4848_v23 = vpop.f32.mrf.mxu1  ;;  %v1260_v25 = vpop.f32.mrf.mxu0  ;;  %2138 = vmatmul.mubr.bf16.gmra.mxu1 %v1762_v56 }
 0x230   :  { %v1583_v60 = vadd.f32 %v4801_v34, %v1257_v57  ;;  %v1678_v15 = vmax.f32 %v1582_v18, 0.0  ;;  %v1261_v63 = vadd.f32 %v1260_v25, %v4720_v17 }
 0x231   :  { %v4851_v32 = vpop.f32.mrf.mxu1  ;;  %v1262_v36 = vpop.f32.mrf.mxu0 }
 0x232   :  { %v1679_v14 = vmax.f32 %v1583_v60, 0.0  ;;  %v1263_v43 = vadd.f32 %v1262_v36, %v4728_v21  ;;  %v1765_v13 = vpack.c.bf16 %v1678_v15, %v1675_v54  ;;  %v1585_v21 = vadd.f32 %v4805_v38, %v1261_v63 }
 0x233   :  { %v4855_v22 = vpop.f32.mrf.mxu1  ;;  %v1264_v8 = vpop.f32.mrf.mxu0 }
 0x234   :  { %v1265_v3 = vadd.f32 %v1264_v8, %v4730_v24  ;;  %v1766_v52 = vpack.c.bf16 %v1679_v14, %v1676_v42  ;;  %v1586_v30 = vadd.f32 %v4801_v34, %v1263_v43  ;;  %v1681_v18 = vmax.f32 %v1585_v21, 0.0 }
 0x235   :  { %v4858_v6 = vpop.f32.mrf.mxu1  ;;  %v1266_v55 = vpop.f32.mrf.mxu0 }
 0x236   :  { %v1588_v40 = vadd.f32 %v4805_v38, %v1265_v3  ;;  %v1267_v2 = vadd.f32 %v1266_v55, %v4732_v26  ;;  %2147 = vmatprep.mubr.bf16.mxu1 %v1766_v52  ;;  %v1682_v39 = vmax.f32 %v1586_v30, 0.0 }
 0x237   :  { %v4864_v17 = vpop.f32.mrf.mxu1  ;;  %v1270_v4 = vpop.f32.mrf.mxu0  ;;  %2148 = vmatmul.mubr.bf16.gmra.mxu1 %v1765_v13 }
 0x238   :  { %v1589_v24 = vadd.f32 %v4801_v34, %v1267_v2  ;;  %v1684_v62 = vmax.f32 %v1588_v40, 0.0  ;;  %v1271_v26 = vadd.f32 %v1270_v4, %v4734_v28 }
 0x239   :  { %v4867_v29 = vpop.f32.mrf.mxu1  ;;  %v1272_v7 = vpop.f32.mrf.mxu0 }
 0x23a   :  { %v1685_v56 = vmax.f32 %v1589_v24, 0.0  ;;  %v1273_v11 = vadd.f32 %v1272_v7, %v4744_v33  ;;  %v1768_v15 = vpack.c.bf16 %v1684_v62, %v1681_v18  ;;  %v1591_v33 = vadd.f32 %v4805_v38, %v1271_v26 }
 0x23b   :  { %v4871_v57 = vpop.f32.mrf.mxu1  ;;  %v1274_v50 = vpop.f32.mrf.mxu0 }
 0x23c   :  { %v1275_v25 = vadd.f32 %v1274_v50, %v4746_v35  ;;  %v1769_v60 = vpack.c.bf16 %v1685_v56, %v1682_v39  ;;  %v1592_v14 = vadd.f32 %v4801_v34, %v1273_v11  ;;  %v1687_v40 = vmax.f32 %v1591_v33, 0.0 }
 0x23d   :  { %v4874_v36 = vpop.f32.mrf.mxu1  ;;  %v1276_v42 = vpop.f32.mrf.mxu0 }
 0x23e   :  { %v1594_v43 = vadd.f32 %v4805_v38, %v1275_v25  ;;  %v1277_v54 = vadd.f32 %v1276_v42, %v4748_v37  ;;  %2157 = vmatprep.mubr.bf16.mxu1 %v1769_v60  ;;  %v1688_v55 = vmax.f32 %v1592_v14, 0.0 }
 0x23f   :  { %v4880_v28 = vpop.f32.mrf.mxu1  ;;  %v1280_v63 = vpop.f32.mrf.mxu0  ;;  %2158 = vmatmul.mubr.bf16.gmra.mxu1 %v1768_v15 }
 0x240   :  { %v1595_v35 = vadd.f32 %v4801_v34, %v1277_v54  ;;  %v1690_v8 = vmax.f32 %v1594_v43, 0.0  ;;  %v1281_v37 = vadd.f32 %v1280_v63, %v4750_v41 }
 0x241   :  { %v4883_v3 = vpop.f32.mrf.mxu1  ;;  %v1282_v52 = vpop.f32.mrf.mxu0 }
 0x242   :  { %v1691_v13 = vmax.f32 %v1595_v35, 0.0  ;;  %v1283_v30 = vadd.f32 %v1282_v52, %v4760_v58  ;;  %v1771_v62 = vpack.c.bf16 %v1690_v8, %v1687_v40  ;;  %v1597_v58 = vadd.f32 %v4805_v38, %v1281_v37 }
 0x243   :  { %v4887_v2 = vpop.f32.mrf.mxu1  ;;  %v1284_v21 = vpop.f32.mrf.mxu0 }
 0x244   :  { %v1285_v4 = vadd.f32 %v1284_v21, %v4762_v48  ;;  %v1772_v24 = vpack.c.bf16 %v1691_v13, %v1688_v55  ;;  %v1598_v56 = vadd.f32 %v4801_v34, %v1283_v30  ;;  %v1693_v43 = vmax.f32 %v1597_v58, 0.0 }
 0x245   :  { %v4890_v7 = vpop.f32.mrf.mxu1  ;;  %v1286_v39 = vpop.f32.mrf.mxu0 }
 0x246   :  { %v1600_v11 = vadd.f32 %v4805_v38, %v1285_v4  ;;  %v1287_v18 = vadd.f32 %v1286_v39, %v4764_v51  ;;  %2167 = vmatprep.mubr.bf16.mxu1 %v1772_v24  ;;  %v1694_v15 = vmax.f32 %v1598_v56, 0.0 }
 0x247   :  { %v4896_v41 = vpop.f32.mrf.mxu1  ;;  %v1290_v26 = vpop.f32.mrf.mxu0  ;;  %2168 = vmatmul.mubr.bf16.gmra.mxu1 %v1771_v62 }
 0x248   :  { %v1601_v48 = vadd.f32 %v4801_v34, %v1287_v18  ;;  %v1696_v50 = vmax.f32 %v1600_v11, 0.0  ;;  %v1291_v51 = vadd.f32 %v1290_v26, %v4766_v1 }
 0x249   :  { %v4899_v25 = vpop.f32.mrf.mxu1  ;;  %v1292_v60 = vpop.f32.mrf.mxu0 }
 0x24a   :  { %v1697_v42 = vmax.f32 %v1601_v48, 0.0  ;;  %v1293_v14 = vadd.f32 %v1292_v60, %v4776_v0  ;;  %v1774_v8 = vpack.c.bf16 %v1696_v50, %v1693_v43  ;;  %v1603_v0 = vadd.f32 %v4805_v38, %v1291_v51 }
 0x24b   :  { %v4903_v54 = vpop.f32.mrf.mxu1  ;;  %v1294_v33 = vpop.f32.mrf.mxu0 }
 0x24c   :  { %v1295_v63 = vadd.f32 %v1294_v33, %v4778_v47  ;;  %v1775_v35 = vpack.c.bf16 %v1697_v42, %v1694_v15  ;;  %v1604_v13 = vadd.f32 %v4801_v34, %v1293_v14  ;;  %v1699_v11 = vmax.f32 %v1603_v0, 0.0 }
 0x24d   :  { %v4906_v52 = vpop.f32.mrf.mxu1  ;;  %v1296_v55 = vpop.f32.mrf.mxu0 }
 0x24e   :  { %v1606_v30 = vadd.f32 %v4805_v38, %v1295_v63  ;;  %v1297_v40 = vadd.f32 %v1296_v55, %v4782_v44  ;;  %2177 = vmatprep.mubr.bf16.mxu1 %v1775_v35  ;;  %v1700_v62 = vmax.f32 %v1604_v13, 0.0 }
 0x24f   :  { %v4912_v1 = vpop.f32.mrf.mxu1  ;;  %v1300_v37 = vpop.f32.mrf.mxu0  ;;  %2178 = vmatmul.mubr.bf16.gmra.mxu1 %v1774_v8 }
 0x250   :  { %v1607_v47 = vadd.f32 %v4801_v34, %v1297_v40  ;;  %v1702_v21 = vmax.f32 %v1606_v30, 0.0  ;;  %v1301_v44 = vadd.f32 %v1300_v37, %v4785_v59 }
 0x251   :  { %v4915_v4 = vpop.f32.mrf.mxu1  ;;  %v1302_v24 = vpop.f32.mrf.mxu0 }
 0x252   :  { %v1703_v39 = vmax.f32 %v1607_v47, 0.0  ;;  %v1303_v56 = vadd.f32 %v1302_v24, %v4797_v27  ;;  %v1777_v50 = vpack.c.bf16 %v1702_v21, %v1699_v11  ;;  %v1609_v27 = vadd.f32 %v4805_v38, %v1301_v44 }
 0x253   :  { %v4919_v18 = vpop.f32.mrf.mxu1  ;;  %v1304_v58 = vpop.f32.mrf.mxu0 }
 0x254   :  { %v1305_v26 = vadd.f32 %v1304_v58, %v4807_v5  ;;  %v1778_v48 = vpack.c.bf16 %v1703_v39, %v1700_v62  ;;  %v1610_v42 = vadd.f32 %v4801_v34, %v1303_v56  ;;  %v1705_v30 = vmax.f32 %v1609_v27, 0.0 }
 0x255   :  { %v4922_v60 = vpop.f32.mrf.mxu1  ;;  %v1306_v15 = vpop.f32.mrf.mxu0 }
 0x256   :  { %v1612_v14 = vadd.f32 %v4805_v38, %v1305_v26  ;;  %v1307_v43 = vadd.f32 %v1306_v15, %v4810_v49  ;;  %2187 = vmatprep.mubr.bf16.mxu1 %v1778_v48  ;;  %v1706_v8 = vmax.f32 %v1610_v42, 0.0 }
 0x257   :  { %v4928_v59 = vpop.f32.mrf.mxu1  ;;  %v1310_v51 = vpop.f32.mrf.mxu0  ;;  %2188 = vmatmul.mubr.bf16.gmra.mxu1 %v1777_v50 }
 0x258   :  { %v1613_v5 = vadd.f32 %v4801_v34, %v1307_v43  ;;  %v1708_v33 = vmax.f32 %v1612_v14, 0.0  ;;  %v1311_v49 = vadd.f32 %v1310_v51, %v4816_v19 }
 0x259   :  { %v4931_v63 = vpop.f32.mrf.mxu1  ;;  %v1312_v35 = vpop.f32.mrf.mxu0 }
 0x25a   :  { %v1709_v55 = vmax.f32 %v1613_v5, 0.0  ;;  %v1313_v13 = vadd.f32 %v1312_v35, %v4819_v10  ;;  %v1780_v21 = vpack.c.bf16 %v1708_v33, %v1705_v30  ;;  %v1615_v10 = vadd.f32 %v4805_v38, %v1311_v49 }
 0x25b   :  { %v4935_v40 = vpop.f32.mrf.mxu1  ;;  %v1314_v0 = vpop.f32.mrf.mxu0 }
 0x25c   :  { %v1315_v37 = vadd.f32 %v1314_v0, %v4823_v61  ;;  %v1781_v47 = vpack.c.bf16 %v1709_v55, %v1706_v8  ;;  %v1616_v39 = vadd.f32 %v4801_v34, %v1313_v13  ;;  %v1711_v14 = vmax.f32 %v1615_v10, 0.0 }
 0x25d   :  { %v4938_v24 = vpop.f32.mrf.mxu1  ;;  %v1316_v62 = vpop.f32.mrf.mxu0 }
 0x25e   :  { %v1618_v56 = vadd.f32 %v4805_v38, %v1315_v37  ;;  %v1317_v11 = vadd.f32 %v1316_v62, %v4826_v31  ;;  %2197 = vmatprep.mubr.bf16.mxu1 %v1781_v47  ;;  %v1712_v50 = vmax.f32 %v1616_v39, 0.0 }
 0x25f   :  { %v4944_v19 = vpop.f32.mrf.mxu1  ;;  %v1320_v44 = vpop.f32.mrf.mxu0  ;;  %2198 = vmatmul.mubr.bf16.gmra.mxu1 %v1780_v21 }
 0x260   :  { %v1619_v61 = vadd.f32 %v4801_v34, %v1317_v11  ;;  %v1714_v58 = vmax.f32 %v1618_v56, 0.0  ;;  %v1321_v31 = vadd.f32 %v1320_v44, %v4832_v46 }
 0x261   :  { %v4947_v26 = vpop.f32.mrf.mxu1  ;;  %v1322_v48 = vpop.f32.mrf.mxu0 }
 0x262   :  { %v1715_v15 = vmax.f32 %v1619_v61, 0.0  ;;  %v1323_v42 = vadd.f32 %v1322_v48, %v4835_v53  ;;  %v1783_v33 = vpack.c.bf16 %v1714_v58, %v1711_v14  ;;  %v1621_v53 = vadd.f32 %v4805_v38, %v1321_v31 }
 0x263   :  { %v4951_v43 = vpop.f32.mrf.mxu1  ;;  %v1324_v27 = vpop.f32.mrf.mxu0 }
 0x264   :  { %v1325_v51 = vadd.f32 %v1324_v27, %v4839_v16  ;;  %v1784_v5 = vpack.c.bf16 %v1715_v15, %v1712_v50  ;;  %v1622_v55 = vadd.f32 %v4801_v34, %v1323_v42  ;;  %v1717_v56 = vmax.f32 %v1621_v53, 0.0 }
 0x265   :  { %v4954_v35 = vpop.f32.mrf.mxu1  ;;  %v1326_v8 = vpop.f32.mrf.mxu0 }
 0x266   :  { %v1624_v13 = vadd.f32 %v4805_v38, %v1325_v51  ;;  %v1327_v30 = vadd.f32 %v1326_v8, %v4842_v9  ;;  %2207 = vmatprep.mubr.bf16.mxu1 %v1784_v5  ;;  %v1718_v21 = vmax.f32 %v1622_v55, 0.0 }
 0x267   :  { %v4960_v46 = vpop.f32.mrf.mxu1  ;;  %v1330_v49 = vpop.f32.mrf.mxu0  ;;  %2208 = vmatmul.mubr.bf16.gmra.mxu1 %v1783_v33 }
 0x268   :  { %v1625_v16 = vadd.f32 %v4801_v34, %v1327_v30  ;;  %v1720_v0 = vmax.f32 %v1624_v13, 0.0  ;;  %v1331_v9 = vadd.f32 %v1330_v49, %v4848_v23 }
 0x269   :  { %v4963_v37 = vpop.f32.mrf.mxu1  ;;  %v1332_v47 = vpop.f32.mrf.mxu0 }
 0x26a   :  { %v1721_v62 = vmax.f32 %v1625_v16, 0.0  ;;  %v1333_v39 = vadd.f32 %v1332_v47, %v4851_v32  ;;  %v1786_v58 = vpack.c.bf16 %v1720_v0, %v1717_v56  ;;  %v1627_v32 = vadd.f32 %v4805_v38, %v1331_v9 }
 0x26b   :  { %v4967_v11 = vpop.f32.mrf.mxu1  ;;  %v1334_v10 = vpop.f32.mrf.mxu0 }
 0x26c   :  { %v1335_v44 = vadd.f32 %v1334_v10, %v4855_v22  ;;  %v1787_v61 = vpack.c.bf16 %v1721_v62, %v1718_v21  ;;  %v1628_v15 = vadd.f32 %v4801_v34, %v1333_v39  ;;  %v1723_v13 = vmax.f32 %v1627_v32, 0.0 }
 0x26d   :  { %v4970_v48 = vpop.f32.mrf.mxu1  ;;  %v1336_v50 = vpop.f32.mrf.mxu0 }
 0x26e   :  { %v1630_v42 = vadd.f32 %v4805_v38, %v1335_v44  ;;  %v1337_v14 = vadd.f32 %v1336_v50, %v4858_v6  ;;  %2217 = vmatprep.mubr.bf16.mxu1 %v1787_v61  ;;  %v1724_v33 = vmax.f32 %v1628_v15, 0.0 }
 0x26f   :  { %v4976_v23 = vpop.f32.mrf.mxu1  ;;  %v1340_v31 = vpop.f32.mrf.mxu0  ;;  %2218 = vmatmul.mubr.bf16.gmra.mxu1 %v1786_v58 }
 0x270   :  { %v1631_v22 = vadd.f32 %v4801_v34, %v1337_v14  ;;  %v1726_v27 = vmax.f32 %v1630_v42, 0.0  ;;  %v1341_v6 = vadd.f32 %v1340_v31, %v4864_v17 }
 0x271   :  { %v4979_v51 = vpop.f32.mrf.mxu1  ;;  %v1342_v5 = vpop.f32.mrf.mxu0 }
 0x272   :  { %v1727_v8 = vmax.f32 %v1631_v22, 0.0  ;;  %v1343_v55 = vadd.f32 %v1342_v5, %v4867_v29  ;;  %v1789_v0 = vpack.c.bf16 %v1726_v27, %v1723_v13  ;;  %v1633_v29 = vadd.f32 %v4805_v38, %v1341_v6 }
 0x273   :  { %v4983_v30 = vpop.f32.mrf.mxu1  ;;  %v1344_v53 = vpop.f32.mrf.mxu0 }
 0x274   :  { %v1345_v49 = vadd.f32 %v1344_v53, %v4871_v57  ;;  %v1790_v16 = vpack.c.bf16 %v1727_v8, %v1724_v33  ;;  %v1634_v62 = vadd.f32 %v4801_v34, %v1343_v55  ;;  %v1729_v42 = vmax.f32 %v1633_v29, 0.0 }
 0x275   :  { %v4986_v47 = vpop.f32.mrf.mxu1  ;;  %v1346_v21 = vpop.f32.mrf.mxu0 }
 0x276   :  { %v1636_v39 = vadd.f32 %v4805_v38, %v1345_v49  ;;  %v1347_v56 = vadd.f32 %v1346_v21, %v4874_v36  ;;  %2227 = vmatprep.mubr.bf16.mxu1 %v1790_v16  ;;  %v1730_v58 = vmax.f32 %v1634_v62, 0.0 }
 0x277   :  { %v4992_v17 = vpop.f32.mrf.mxu1  ;;  %v1350_v9 = vpop.f32.mrf.mxu0  ;;  %2228 = vmatmul.mubr.bf16.gmra.mxu1 %v1789_v0 }
 0x278   :  { %v1637_v57 = vadd.f32 %v4801_v34, %v1347_v56  ;;  %v1732_v10 = vmax.f32 %v1636_v39, 0.0  ;;  %v1351_v36 = vadd.f32 %v1350_v9, %v4880_v28 }
 0x279   :  { %v4995_v44 = vpop.f32.mrf.mxu1  ;;  %v1352_v61 = vpop.f32.mrf.mxu0 }
 0x27a   :  { %v1733_v50 = vmax.f32 %v1637_v57, 0.0  ;;  %v1353_v15 = vadd.f32 %v1352_v61, %v4883_v3  ;;  %v1792_v27 = vpack.c.bf16 %v1732_v10, %v1729_v42  ;;  %v1639_v3 = vadd.f32 %v4805_v38, %v1351_v36 }
 0x27b   :  { %v4999_v14 = vpop.f32.mrf.mxu1  ;;  %v1354_v32 = vpop.f32.mrf.mxu0 }
 0x27c   :  { %v1355_v31 = vadd.f32 %v1354_v32, %v4887_v2  ;;  %v1793_v22 = vpack.c.bf16 %v1733_v50, %v1730_v58  ;;  %v1640_v8 = vadd.f32 %v4801_v34, %v1353_v15  ;;  %v1735_v39 = vmax.f32 %v1639_v3, 0.0 }
 0x27d   :  { %v5002_v5 = vpop.f32.mrf.mxu1  ;;  %v1356_v33 = vpop.f32.mrf.mxu0 }
 0x27e   :  { %v1642_v55 = vadd.f32 %v4805_v38, %v1355_v31  ;;  %v1357_v13 = vadd.f32 %v1356_v33, %v4890_v7  ;;  %2237 = vmatprep.mubr.bf16.mxu1 %v1793_v22  ;;  %v1736_v0 = vmax.f32 %v1640_v8, 0.0 }
 0x27f   :  { %v5008_v28 = vpop.f32.mrf.mxu1  ;;  %v1360_v6 = vpop.f32.mrf.mxu0  ;;  %2238 = vmatmul.mubr.bf16.gmra.mxu1 %v1792_v27 }
 0x280   :  { %v1643_v2 = vadd.f32 %v4801_v34, %v1357_v13  ;;  %v1738_v53 = vmax.f32 %v1642_v55, 0.0  ;;  %v1361_v7 = vadd.f32 %v1360_v6, %v4896_v41 }
 0x281   :  { %v5011_v49 = vpop.f32.mrf.mxu1  ;;  %v1362_v16 = vpop.f32.mrf.mxu0 }
 0x282   :  { %v1739_v21 = vmax.f32 %v1643_v2, 0.0  ;;  %v1363_v62 = vadd.f32 %v1362_v16, %v4899_v25  ;;  %v1795_v10 = vpack.c.bf16 %v1738_v53, %v1735_v39  ;;  %v1645_v25 = vadd.f32 %v4805_v38, %v1361_v7 }
 0x283   :  { %v5015_v56 = vpop.f32.mrf.mxu1  ;;  %v1364_v29 = vpop.f32.mrf.mxu0 }
 0x284   :  { %v1365_v9 = vadd.f32 %v1364_v29, %v4903_v54  ;;  %v1796_v57 = vpack.c.bf16 %v1739_v21, %v1736_v0  ;;  %v1646_v50 = vadd.f32 %v4801_v34, %v1363_v62  ;;  %v1741_v55 = vmax.f32 %v1645_v25, 0.0 }
 0x285   :  { %v5018_v61 = vpop.f32.mrf.mxu1  ;;  %v1366_v58 = vpop.f32.mrf.mxu0 }
 0x286   :  { %v1648_v15 = vadd.f32 %v4805_v38, %v1365_v9  ;;  %v1367_v42 = vadd.f32 %v1366_v58, %v4906_v52  ;;  %2247 = vmatprep.mubr.bf16.mxu1 %v1796_v57  ;;  %v1742_v27 = vmax.f32 %v1646_v50, 0.0 }
 0x287   :  { %v5024_v41 = vpop.f32.mrf.mxu1  ;;  %v1370_v36 = vpop.f32.mrf.mxu0  ;;  %2248 = vmatmul.mubr.bf16.gmra.mxu1 %v1795_v10 }
 0x288   :  { %v1649_v54 = vadd.f32 %v4801_v34, %v1367_v42  ;;  %v1744_v32 = vmax.f32 %v1648_v15, 0.0  ;;  %v1371_v52 = vadd.f32 %v1370_v36, %v4912_v1 }
 0x289   :  { %v5027_v31 = vpop.f32.mrf.mxu1  ;;  %v1372_v22 = vpop.f32.mrf.mxu0 }
 0x28a   :  { %v1745_v33 = vmax.f32 %v1649_v54, 0.0  ;;  %v1373_v8 = vadd.f32 %v1372_v22, %v4915_v4  ;;  %v1798_v53 = vpack.c.bf16 %v1744_v32, %v1741_v55  ;;  %v1651_v4 = vadd.f32 %v4805_v38, %v1371_v52 }
 0x28b   :  { %v5031_v13 = vpop.f32.mrf.mxu1  ;;  %v1374_v3 = vpop.f32.mrf.mxu0 }
 0x28c   :  { %v1375_v6 = vadd.f32 %v1374_v3, %v4919_v18  ;;  %v1799_v2 = vpack.c.bf16 %v1745_v33, %v1742_v27  ;;  %v1652_v21 = vadd.f32 %v4801_v34, %v1373_v8  ;;  %v1747_v15 = vmax.f32 %v1651_v4, 0.0 }
 0x28d   :  { %v5034_v16 = vpop.f32.mrf.mxu1  ;;  %v1376_v0 = vpop.f32.mrf.mxu0 }
 0x28e   :  { %v1654_v62 = vadd.f32 %v4805_v38, %v1375_v6  ;;  %v1377_v39 = vadd.f32 %v1376_v0, %v4922_v60  ;;  %2257 = vmatprep.mubr.bf16.mxu1 %v1799_v2  ;;  %v1748_v10 = vmax.f32 %v1652_v21, 0.0  ;;  %v1562_v6 = vsub.s32 2, %v4780_v12 }
 0x28f   :  { %v5040_v1 = vpop.f32.mrf.mxu1  ;;  %v1380_v7 = vpop.f32.mrf.mxu0  ;;  %2258 = vmatmul.mubr.bf16.gmra.mxu1 %v1798_v53 }
 0x290   :  { %v1655_v18 = vadd.f32 %v4801_v34, %v1377_v39  ;;  %v1750_v29 = vmax.f32 %v1654_v62, 0.0  ;;  %v1381_v60 = vadd.f32 %v1380_v7, %v4928_v59  ;;  %v5070_v7 = vld [vmem:[#allocation2 + $0x4] ss:$8 sps:$4 sm:$0xff]  }
 0x291   :  { %v5043_v9 = vpop.f32.mrf.mxu1  ;;  %v1382_v57 = vpop.f32.mrf.mxu0 }
 0x292   :  { %v1751_v58 = vmax.f32 %v1655_v18, 0.0  ;;  %v1383_v50 = vadd.f32 %v1382_v57, %v4931_v63  ;;  %v1801_v32 = vpack.c.bf16 %v1750_v29, %v1747_v15  ;;  %v1657_v63 = vadd.f32 %v4805_v38, %v1381_v60 }
 0x293   :  { %v5047_v42 = vpop.f32.mrf.mxu1  ;;  %v1384_v25 = vpop.f32.mrf.mxu0 }
 0x294   :  { %v1385_v36 = vadd.f32 %v1384_v25, %v4935_v40  ;;  %v1802_v54 = vpack.c.bf16 %v1751_v58, %v1748_v10  ;;  %v1658_v33 = vadd.f32 %v4801_v34, %v1383_v50  ;;  %v1753_v0 = vmax.f32 %v1657_v63, 0.0 }
 0x295   :  { %v5050_v22 = vpop.f32.mrf.mxu1  ;;  %v1386_v27 = vpop.f32.mrf.mxu0 }
 0x296   :  { %v1660_v8 = vadd.f32 %v4805_v38, %v1385_v36  ;;  %v1387_v55 = vadd.f32 %v1386_v27, %v4938_v24  ;;  %2267 = vmatprep.mubr.bf16.mxu1 %v1802_v54  ;;  %v1754_v2 = vmax.f32 %v1658_v33, 0.0  ;;  %v5067_v38 = vrot.slane %v4795_v20, %v1562_v6 }
 0x297   :  { %v5056_v59 = vpop.f32.mrf.mxu1  ;;  %2268 = vmatmul.mubr.bf16.gmra.mxu1 %v1801_v32 }
 0x298   :  { %v1661_v52 = vadd.f32 %v4801_v34, %v1387_v55  ;;  %v1756_v40 = vmax.f32 %v1660_v8, 0.0 }
 0x299   :  { %v5059_v3 = vpop.f32.mrf.mxu1 }
 0x29a   :  { %v1757_v53 = vmax.f32 %v1661_v52, 0.0  ;;  %v1804_v24 = vpack.c.bf16 %v1756_v40, %v1753_v0 }
 0x29b   :  { %v5062_v21 = vpop.f32.mrf.mxu1 }
 0x29c   :  { %v1805_v62 = vpack.c.bf16 %v1757_v53, %v1754_v2 }
 0x29d   :  { %v5064_v39 = vpop.f32.mrf.mxu1 }
 0x29e   :  { %2277 = vmatprep.mubr.bf16.mxu1 %v1805_v62 }
 0x29f   :  { %v3981_v4 = vpop.f32.mrf.mxu1  ;;  %2278 = vmatmul.mubr.bf16.gmra.mxu1 %v1804_v24 }
 0x2a0   :  { %v1432_v34 = vadd.f32 %v3981_v4, %v4944_v19  ;;  %2529 = vmatprep.mubr.bf16.mxu1 %v5070_v7 }
 0x2a1   :  { %v1423_v12 = vpop.f32.mrf.mxu1 }
 0x2a2   :  { %v1575_v18 = vadd.f32 %v5067_v38, %v1432_v34  ;;  %v1424_v29 = vadd.f32 %v1423_v12, %v4947_v26 }
 0x2a3   :  { %v3982_v57 = vpop.f32.mrf.mxu1 }
 0x2a4   :  { %v1569_v10 = vadd.f32 %v5067_v38, %v1424_v29  ;;  %v1435_v58 = vadd.f32 %v3982_v57, %v4951_v43  ;;  %v1671_v60 = vmax.f32 %v1575_v18, 0.0 }
 0x2a5   :  { %v1426_v20 = vpop.f32.mrf.mxu1 }
 0x2a6   :  { %v1578_v50 = vadd.f32 %v5067_v38, %v1435_v58  ;;  %v1427_v15 = vadd.f32 %v1426_v20, %v4954_v35  ;;  %v1665_v32 = vmax.f32 %v1569_v10, 0.0 }
 0x2a7   :  { %v3985_v19 = vpop.f32.mrf.mxu1 }
 0x2a8   :  { %v1674_v25 = vmax.f32 %v1578_v50, 0.0  ;;  %v1572_v36 = vadd.f32 %v5067_v38, %v1427_v15  ;;  %v1448_v54 = vadd.f32 %v3985_v19, %v4960_v46 }
 0x2a9   :  { %v1439_v27 = vpop.f32.mrf.mxu1 }
 0x2aa   :  { %v1764_v26 = vpack.c.bf16 %v1674_v25, %v1671_v60  ;;  %v1668_v33 = vmax.f32 %v1572_v36, 0.0  ;;  %v1587_v8 = vadd.f32 %v5067_v38, %v1448_v54  ;;  %v1440_v43 = vadd.f32 %v1439_v27, %v4963_v37 }
 0x2ab   :  { %v3986_v55 = vpop.f32.mrf.mxu1 }
 0x2ac   :  { %v1761_v63 = vpack.c.bf16 %v1668_v33, %v1665_v32  ;;  %v1581_v52 = vadd.f32 %v5067_v38, %v1440_v43  ;;  %v1451_v35 = vadd.f32 %v3986_v55, %v4967_v11  ;;  %v1683_v53 = vmax.f32 %v1587_v8, 0.0 }
 0x2ad   :  { %v1442_v40 = vpop.f32.mrf.mxu1 }
 0x2ae   :  { %v1590_v6 = vadd.f32 %v5067_v38, %v1451_v35  ;;  %v1443_v2 = vadd.f32 %v1442_v40, %v4970_v48  ;;  %2321 = vmatmul.mubr.bf16.vlgmr.msra.gmra.mxu0 %v1761_v63  ;;  %v1677_v24 = vmax.f32 %v1581_v52, 0.0 }
 0x2af   :  { %v3989_v46 = vpop.f32.mrf.mxu1  ;;  %2330 = vmatprep.mubr.bf16.mxu0 %v5976_v45 }
 0x2b0   :  { %v1686_v0 = vmax.f32 %v1590_v6, 0.0  ;;  %v1584_v62 = vadd.f32 %v5067_v38, %v1443_v2  ;;  %v1464_v37 = vadd.f32 %v3989_v46, %v4976_v23 }
 0x2b1   :  { %v1455_v4 = vpop.f32.mrf.mxu1 }
 0x2b2   :  { %v1770_v34 = vpack.c.bf16 %v1686_v0, %v1683_v53  ;;  %v1680_v12 = vmax.f32 %v1584_v62, 0.0  ;;  %v1599_v11 = vadd.f32 %v5067_v38, %v1464_v37  ;;  %v1456_v18 = vadd.f32 %v1455_v4, %v4979_v51 }
 0x2b3   :  { %v3990_v29 = vpop.f32.mrf.mxu1 }
 0x2b4   :  { %v1767_v48 = vpack.c.bf16 %v1680_v12, %v1677_v24  ;;  %v1593_v57 = vadd.f32 %v5067_v38, %v1456_v18  ;;  %v1467_v10 = vadd.f32 %v3990_v29, %v4983_v30  ;;  %v1695_v15 = vmax.f32 %v1599_v11, 0.0 }
 0x2b5   :  { %v1458_v58 = vpop.f32.mrf.mxu1 }
 0x2b6   :  { %v1602_v20 = vadd.f32 %v5067_v38, %v1467_v10  ;;  %v1459_v50 = vadd.f32 %v1458_v58, %v4986_v47  ;;  %2331 = vmatmul.mubr.bf16.gmra.mxu0 %v1764_v26  ;;  %v1689_v25 = vmax.f32 %v1593_v57, 0.0 }
 0x2b7   :  { %v3993_v23 = vpop.f32.mrf.mxu1  ;;  %2340 = vmatprep.mubr.bf16.mxu0 %v5976_v45 }
 0x2b8   :  { %v1698_v19 = vmax.f32 %v1602_v20, 0.0  ;;  %v1596_v60 = vadd.f32 %v5067_v38, %v1459_v50  ;;  %v1480_v51 = vadd.f32 %v3993_v23, %v4992_v17 }
 0x2b9   :  { %v1471_v36 = vpop.f32.mrf.mxu1 }
 0x2ba   :  { %v5099_v54 = vpack.c.bf16 %v1698_v19, %v1695_v15  ;;  %v1692_v30 = vmax.f32 %v1596_v60, 0.0  ;;  %v1611_v32 = vadd.f32 %v5067_v38, %v1480_v51  ;;  %v1472_v27 = vadd.f32 %v1471_v36, %v4995_v44 }
 0x2bb   :  { %v3994_v47 = vpop.f32.mrf.mxu1 }
 0x2bc   :  { %v1773_v26 = vpack.c.bf16 %v1692_v30, %v1689_v25  ;;  %v1605_v33 = vadd.f32 %v5067_v38, %v1472_v27  ;;  %v1483_v8 = vadd.f32 %v3994_v47, %v4999_v14  ;;  %v1707_v52 = vmax.f32 %v1611_v32, 0.0 }
 0x2bd   :  { %v1474_v43 = vpop.f32.mrf.mxu1 }
 0x2be   :  { %v1614_v55 = vadd.f32 %v5067_v38, %v1483_v8  ;;  %v1475_v17 = vadd.f32 %v1474_v43, %v5002_v5  ;;  %2341 = vmatmul.mubr.bf16.gmra.mxu0 %v1767_v48  ;;  %v1701_v6 = vmax.f32 %v1605_v33, 0.0 }
 0x2bf   :  { %v3997_v63 = vpop.f32.mrf.mxu1  ;;  %2350 = vmatprep.mubr.bf16.mxu0 %v5976_v45 }
 0x2c0   :  { %v1710_v35 = vmax.f32 %v1614_v55, 0.0  ;;  %v1608_v40 = vadd.f32 %v5067_v38, %v1475_v17  ;;  %v1496_v44 = vadd.f32 %v3997_v63, %v5008_v28 }
 0x2c1   :  { %v1487_v2 = vpop.f32.mrf.mxu1 }
 0x2c2   :  { %v5110_v46 = vpack.c.bf16 %v1710_v35, %v1707_v52  ;;  %v1704_v14 = vmax.f32 %v1608_v40, 0.0  ;;  %v1623_v53 = vadd.f32 %v5067_v38, %v1496_v44  ;;  %v1488_v0 = vadd.f32 %v1487_v2, %v5011_v49 }
 0x2c3   :  { %v3998_v5 = vpop.f32.mrf.mxu1 }
 0x2c4   :  { %v5114_v62 = vpack.c.bf16 %v1704_v14, %v1701_v6  ;;  %v1617_v37 = vadd.f32 %v5067_v38, %v1488_v0  ;;  %v1499_v24 = vadd.f32 %v3998_v5, %v5015_v56  ;;  %v1719_v18 = vmax.f32 %v1623_v53, 0.0 }
 0x2c5   :  { %v1490_v4 = vpop.f32.mrf.mxu1 }
 0x2c6   :  { %v1626_v12 = vadd.f32 %v5067_v38, %v1499_v24  ;;  %v1491_v28 = vadd.f32 %v1490_v4, %v5018_v61  ;;  %2351 = vmatmul.mubr.bf16.gmra.mxu0 %v1770_v34  ;;  %v1713_v57 = vmax.f32 %v1617_v37, 0.0 }
 0x2c7   :  { %v4001_v11 = vpop.f32.mrf.mxu1  ;;  %2360 = vmatprep.mubr.bf16.mxu0 %v5976_v45 }
 0x2c8   :  { %v1722_v29 = vmax.f32 %v1626_v12, 0.0  ;;  %v1620_v49 = vadd.f32 %v5067_v38, %v1491_v28  ;;  %v1512_v48 = vadd.f32 %v4001_v11, %v5024_v41 }
 0x2c9   :  { %v1503_v10 = vpop.f32.mrf.mxu1 }
 0x2ca   :  { %v5123_v58 = vpack.c.bf16 %v1722_v29, %v1719_v18  ;;  %v1716_v56 = vmax.f32 %v1620_v49, 0.0  ;;  %v1635_v20 = vadd.f32 %v5067_v38, %v1512_v48  ;;  %v1504_v50 = vadd.f32 %v1503_v10, %v5027_v31 }
 0x2cb   :  { %v4002_v61 = vpop.f32.mrf.mxu1 }
 0x2cc   :  { %v1785_v34 = vpack.c.bf16 %v1716_v56, %v1713_v57  ;;  %v1629_v23 = vadd.f32 %v5067_v38, %v1504_v50  ;;  %v1515_v15 = vadd.f32 %v4002_v61, %v5031_v13  ;;  %v1731_v25 = vmax.f32 %v1635_v20, 0.0 }
 0x2cd   :  { %v1506_v19 = vpop.f32.mrf.mxu1 }
 0x2ce   :  { %v1638_v60 = vadd.f32 %v5067_v38, %v1515_v15  ;;  %v1507_v41 = vadd.f32 %v1506_v19, %v5034_v16  ;;  %2361 = vmatmul.mubr.bf16.gmra.mxu0 %v1773_v26  ;;  %v1725_v32 = vmax.f32 %v1629_v23, 0.0 }
 0x2cf   :  { %v4005_v51 = vpop.f32.mrf.mxu1  ;;  %2370 = vmatprep.mubr.bf16.mxu0 %v5976_v45 }
 0x2d0   :  { %v1734_v36 = vmax.f32 %v1638_v60, 0.0  ;;  %v1632_v30 = vadd.f32 %v5067_v38, %v1507_v41  ;;  %v1528_v31 = vadd.f32 %v4005_v51, %v5040_v1 }
 0x2d1   :  { %v1519_v27 = vpop.f32.mrf.mxu1 }
 0x2d2   :  { %v1794_v47 = vpack.c.bf16 %v1734_v36, %v1731_v25  ;;  %v1728_v33 = vmax.f32 %v1632_v30, 0.0  ;;  %v1647_v13 = vadd.f32 %v5067_v38, %v1528_v31  ;;  %v1520_v8 = vadd.f32 %v1519_v27, %v5043_v9 }
 0x2d3   :  { %v4006_v43 = vpop.f32.mrf.mxu1 }
 0x2d4   :  { %v1791_v16 = vpack.c.bf16 %v1728_v33, %v1725_v32  ;;  %v1641_v26 = vadd.f32 %v5067_v38, %v1520_v8  ;;  %v1531_v55 = vadd.f32 %v4006_v43, %v5047_v42  ;;  %v1743_v35 = vmax.f32 %v1647_v13, 0.0 }
 0x2d5   :  { %v1522_v17 = vpop.f32.mrf.mxu1 }
 0x2d6   :  { %v1650_v63 = vadd.f32 %v5067_v38, %v1531_v55  ;;  %v1523_v52 = vadd.f32 %v1522_v17, %v5050_v22  ;;  %2371 = vmatmul.mubr.bf16.gmra.mxu0 %v5099_v54  ;;  %v1737_v6 = vmax.f32 %v1641_v26, 0.0 }
 0x2d7   :  { %v4009_v1 = vpop.f32.mrf.mxu1  ;;  %2380 = vmatprep.mubr.bf16.mxu0 %v5976_v45 }
 0x2d8   :  { %v1746_v40 = vmax.f32 %v1650_v63, 0.0  ;;  %v1644_v9 = vadd.f32 %v5067_v38, %v1523_v52  ;;  %v1544_v44 = vadd.f32 %v4009_v1, %v5056_v59 }
 0x2d9   :  { %v1535_v2 = vpop.f32.mrf.mxu1 }
 0x2da   :  { %v1800_v14 = vpack.c.bf16 %v1746_v40, %v1743_v35  ;;  %v1740_v42 = vmax.f32 %v1644_v9, 0.0  ;;  %v1659_v53 = vadd.f32 %v5067_v38, %v1544_v44  ;;  %v1536_v0 = vadd.f32 %v1535_v2, %v5059_v3 }
 0x2db   :  { %v4010_v22 = vpop.f32.mrf.mxu1 }
 0x2dc   :  { %v1797_v5 = vpack.c.bf16 %v1740_v42, %v1737_v6  ;;  %v1653_v54 = vadd.f32 %v5067_v38, %v1536_v0  ;;  %v1547_v37 = vadd.f32 %v4010_v22, %v5062_v21  ;;  %v1755_v59 = vmax.f32 %v1659_v53, 0.0 }
 0x2dd   :  { %v1538_v24 = vpop.f32.mrf.mxu1 }
 0x2de   :  { %v1662_v4 = vadd.f32 %v5067_v38, %v1547_v37  ;;  %v1539_v12 = vadd.f32 %v1538_v24, %v5064_v39  ;;  %2381 = vmatmul.mubr.bf16.gmra.mxu0 %v5114_v62  ;;  %v1749_v3 = vmax.f32 %v1653_v54, 0.0 }
 0x2df   :  { %2390 = vmatprep.mubr.bf16.mxu0 %v5976_v45 }
 0x2e0   :  { %v1758_v28 = vmax.f32 %v1662_v4, 0.0  ;;  %v1656_v11 = vadd.f32 %v5067_v38, %v1539_v12 }
 0x2e2   :  { %v1806_v18 = vpack.c.bf16 %v1758_v28, %v1755_v59  ;;  %v1752_v29 = vmax.f32 %v1656_v11, 0.0 }
 0x2e4   :  { %v1803_v49 = vpack.c.bf16 %v1752_v29, %v1749_v3 }
 0x2e6   :  { %2391 = vmatmul.mubr.bf16.gmra.mxu0 %v5110_v46 }
 0x2e7   :  { %2400 = vmatprep.mubr.bf16.mxu0 %v5976_v45  ;;  %v5156_v21 = vpop.f32.mrf.mxu1 }
 0x2e8   :  { %5979 = vst [vmem:[#allocation12_spill] sm:$0xff] %v5156_v21 }
 0x2e9   :  { %v5158_v39 = vpop.f32.mrf.mxu1 }
 0x2eb   :  { %v5162_v38 = vpop.f32.mrf.mxu1 }
 0x2ec   :  { %5980 = vst [vmem:[#allocation13_spill] sm:$0xff] %v5162_v38 }
 0x2ed   :  { %v5164_v62 = vpop.f32.mrf.mxu1 }
 0x2ee   :  { %2401 = vmatmul.mubr.bf16.gmra.mxu0 %v1785_v34 }
 0x2ef   :  { %2410 = vmatprep.mubr.bf16.mxu0 %v5976_v45  ;;  %v5167_v46 = vpop.f32.mrf.mxu1 }
 0x2f0   :  { %5981 = vst [vmem:[#allocation14_spill] sm:$0xff] %v5167_v46 }
 0x2f1   :  { %v5169_v48 = vpop.f32.mrf.mxu1 }
 0x2f3   :  { %v5172_v57 = vpop.f32.mrf.mxu1 }
 0x2f4   :  { %5982 = vst [vmem:[#allocation15_spill] sm:$0xff] %v5172_v57 }
 0x2f5   :  { %v5174_v10 = vpop.f32.mrf.mxu1 }
 0x2f6   :  { %2411 = vmatmul.mubr.bf16.gmra.mxu0 %v5123_v58 }
 0x2f7   :  { %2420 = vmatprep.mubr.bf16.mxu0 %v5976_v45  ;;  %v5177_v58 = vpop.f32.mrf.mxu1 }
 0x2f8   :  { %5983 = vst [vmem:[#allocation16_spill] sm:$0xff] %v5177_v58 }
 0x2f9   :  { %v5179_v56 = vpop.f32.mrf.mxu1 }
 0x2fb   :  { %v5182_v20 = vpop.f32.mrf.mxu1 }
 0x2fc   :  { %5984 = vst [vmem:[#allocation17_spill] sm:$0xff] %v5182_v20 }
 0x2fd   :  { %v5184_v50 = vpop.f32.mrf.mxu1 }
 0x2fe   :  { %2421 = vmatmul.mubr.bf16.gmra.mxu0 %v1791_v16 }
 0x2ff   :  { %2430 = vmatprep.mubr.bf16.mxu0 %v5976_v45  ;;  %v5187_v61 = vpop.f32.mrf.mxu1 }
 0x300   :  { %5985 = vst [vmem:[#allocation18_spill] sm:$0xff] %v5187_v61 }
 0x301   :  { %v5189_v34 = vpop.f32.mrf.mxu1 }
 0x303   :  { %v5192_v23 = vpop.f32.mrf.mxu1 }
 0x304   :  { %5986 = vst [vmem:[#allocation19_spill] sm:$0xff] %v5192_v23 }
 0x305   :  { %v5194_v15 = vpop.f32.mrf.mxu1 }
 0x306   :  { %2431 = vmatmul.mubr.bf16.gmra.mxu0 %v1794_v47 }
 0x307   :  { %2440 = vmatprep.mubr.bf16.mxu0 %v5976_v45  ;;  %v5196_v19 = vpop.f32.mrf.mxu1 }
 0x308   :  { %5987 = vst [vmem:[#allocation20_spill] sm:$0xff] %v5196_v19 }
 0x309   :  { %v2171_v60 = vpop.f32.mrf.mxu1 }
 0x30b   :  { %v5198_v41 = vpop.f32.mrf.mxu1 }
 0x30c   :  { %5988 = vst [vmem:[#allocation21_spill] sm:$0xff] %v5198_v41 }
 0x30d   :  { %v2175_v51 = vpop.f32.mrf.mxu1 }
 0x30e   :  { %2441 = vmatmul.mubr.bf16.gmra.mxu0 %v1797_v5 }
 0x30f   :  { %2450 = vmatprep.mubr.bf16.mxu0 %v5976_v45  ;;  %v5200_v25 = vpop.f32.mrf.mxu1 }
 0x310   :  { %5989 = vst [vmem:[#allocation22_spill] sm:$0xff] %v5200_v25 }
 0x311   :  { %v2181_v36 = vpop.f32.mrf.mxu1 }
 0x313   :  { %v5202_v30 = vpop.f32.mrf.mxu1 }
 0x314   :  { %5990 = vst [vmem:[#allocation23_spill] sm:$0xff] %v5202_v30 }
 0x315   :  { %v2185_v31 = vpop.f32.mrf.mxu1 }
 0x316   :  { %2451 = vmatmul.mubr.bf16.gmra.mxu0 %v1800_v14 }
 0x317   :  { %2460 = vmatprep.mubr.bf16.mxu0 %v5976_v45  ;;  %v5204_v32 = vpop.f32.mrf.mxu1 }
 0x318   :  { %5991 = vst [vmem:[#allocation24_spill] sm:$0xff] %v5204_v32 }
 0x319   :  { %v2191_v27 = vpop.f32.mrf.mxu1 }
 0x31b   :  { %v5206_v47 = vpop.f32.mrf.mxu1 }
 0x31c   :  { %5992 = vst [vmem:[#allocation25_spill] sm:$0xff] %v5206_v47 }
 0x31d   :  { %v2195_v33 = vpop.f32.mrf.mxu1 }
 0x31e   :  { %2461 = vmatmul.mubr.bf16.gmra.mxu0 %v1803_v49 }
 0x31f   :  { %2470 = vmatprep.mubr.bf16.mxu0 %v5976_v45  ;;  %v5208_v13 = vpop.f32.mrf.mxu1 }
 0x320   :  { %5993 = vst [vmem:[#allocation26_spill] sm:$0xff] %v5208_v13 }
 0x321   :  { %v2201_v8 = vpop.f32.mrf.mxu1 }
 0x323   :  { %v5210_v43 = vpop.f32.mrf.mxu1 }
 0x324   :  { %5994 = vst [vmem:[#allocation27_spill] sm:$0xff] %v5210_v43 }
 0x325   :  { %v2205_v16 = vpop.f32.mrf.mxu1 }
 0x326   :  { %2471 = vmatmul.mubr.bf16.gmra.mxu0 %v1806_v18 }
 0x327   :  { %2905 = vmatprep.mubr.bf16.mxu0 %v5976_v45  ;;  %v5214_v55 = vpop.f32.mrf.mxu1 }
 0x328   :  { %5996 = vst [vmem:[#allocation29_spill] sm:$0xff] %v5214_v55 }
 0x329   :  { %v2211_v52 = vpop.f32.mrf.mxu1 }
 0x32b   :  { %v5224_v40 = vpop.f32.mrf.mxu1 }
 0x32c   :  { %5999 = vst [vmem:[#allocation32_spill] sm:$0xff] %v5224_v40 }
 0x32d   :  { %v2215_v6 = vpop.f32.mrf.mxu1 }
 0x32f   :  { %v5234_v42 = vpop.f32.mrf.mxu1 }
 0x330   :  { %6002 = vst [vmem:[#allocation35_spill] sm:$0xff] %v5234_v42 }
 0x331   :  { %v2221_v22 = vpop.f32.mrf.mxu1 }
 0x333   :  { %v5244_v37 = vpop.f32.mrf.mxu1 }
 0x334   :  { %6005 = vst [vmem:[#allocation38_spill] sm:$0xff] %v5244_v37 }
 0x335   :  { %v2225_v12 = vpop.f32.mrf.mxu1 }
 0x337   :  { %v5254_v11 = vpop.f32.mrf.mxu1 }
 0x338   :  { %6008 = vst [vmem:[#allocation41_spill] sm:$0xff] %v5254_v11 }
 0x339   :  { %v5258_v29 = vpop.f32.mrf.mxu1 }
 0x33b   :  { %v5268_v55 = vpop.f32.mrf.mxu1 }
 0x33c   :  { %6011 = vst [vmem:[#allocation44_spill] sm:$0xff] %v5268_v55 }
 0x33d   :  { %v5272_v11 = vpop.f32.mrf.mxu1 }
 0x36e   :  { %v5212_v26 = vpop.f32.mrf.mxu0 }
 0x36f   :  { %5995 = vst [vmem:[#allocation28_spill] sm:$0xff] %v5212_v26 }
 0x370   :  { %v5216_v17 = vpop.f32.mrf.mxu0 }
 0x372   :  { %v5218_v63 = vpop.f32.mrf.mxu0 }
 0x373   :  { %5997 = vst [vmem:[#allocation30_spill] sm:$0xff] %v5218_v63 }
 0x374   :  { %v5220_v1 = vpop.f32.mrf.mxu0 }
 0x376   :  { %v5222_v35 = vpop.f32.mrf.mxu0 }
 0x377   :  { %5998 = vst [vmem:[#allocation31_spill] sm:$0xff] %v5222_v35 }
 0x378   :  { %v5226_v9 = vpop.f32.mrf.mxu0 }
 0x37a   :  { %v5228_v44 = vpop.f32.mrf.mxu0 }
 0x37b   :  { %6000 = vst [vmem:[#allocation33_spill] sm:$0xff] %v5228_v44 }
 0x37c   :  { %v5230_v2 = vpop.f32.mrf.mxu0 }
 0x37e   :  { %v5232_v14 = vpop.f32.mrf.mxu0 }
 0x37f   :  { %6001 = vst [vmem:[#allocation34_spill] sm:$0xff] %v5232_v14 }
 0x380   :  { %v5236_v53 = vpop.f32.mrf.mxu0 }
 0x382   :  { %v5238_v0 = vpop.f32.mrf.mxu0 }
 0x383   :  { %6003 = vst [vmem:[#allocation36_spill] sm:$0xff] %v5238_v0 }
 0x384   :  { %v5240_v5 = vpop.f32.mrf.mxu0 }
 0x386   :  { %v5242_v54 = vpop.f32.mrf.mxu0 }
 0x387   :  { %6004 = vst [vmem:[#allocation37_spill] sm:$0xff] %v5242_v54 }
 0x388   :  { %v5246_v24 = vpop.f32.mrf.mxu0 }
 0x38a   :  { %v5248_v4 = vpop.f32.mrf.mxu0 }
 0x38b   :  { %6006 = vst [vmem:[#allocation39_spill] sm:$0xff] %v5248_v4 }
 0x38c   :  { %v5250_v59 = vpop.f32.mrf.mxu0 }
 0x38e   :  { %v5252_v28 = vpop.f32.mrf.mxu0 }
 0x38f   :  { %6007 = vst [vmem:[#allocation40_spill] sm:$0xff] %v5252_v28 }
 0x390   :  { %v2364_v3 = vpop.f32.mrf.mxu0 }
 0x391   :  { %v5260_v45 = vadd.f32 %v2364_v3, %v2171_v60  ;;  %v5282_v3 = vpop.f32.mrf.mxu1 }
 0x392   :  { %v5256_v18 = vpop.f32.mrf.mxu0  ;;  %6014 = vst [vmem:[#allocation47_spill] sm:$0xff] %v5282_v3 }
 0x393   :  { %6009 = vst [vmem:[#allocation42_spill] sm:$0xff] %v5256_v18  ;;  %v5286_v55 = vpop.f32.mrf.mxu1 }
 0x394   :  { %v2368_v49 = vpop.f32.mrf.mxu0 }
 0x395   :  { %v5262_v37 = vadd.f32 %v2368_v49, %v2175_v51 }
 0x396   :  { %v5264_v42 = vpop.f32.mrf.mxu0 }
 0x397   :  { %6010 = vst [vmem:[#allocation43_spill] sm:$0xff] %v5264_v42 }
 0x398   :  { %v2374_v43 = vpop.f32.mrf.mxu0 }
 0x399   :  { %v5274_v32 = vadd.f32 %v2374_v43, %v2181_v36 }
 0x39a   :  { %v5270_v13 = vpop.f32.mrf.mxu0 }
 0x39b   :  { %6012 = vst [vmem:[#allocation45_spill] sm:$0xff] %v5270_v13 }
 0x39c   :  { %v2378_v47 = vpop.f32.mrf.mxu0 }
 0x39d   :  { %v5276_v30 = vadd.f32 %v2378_v47, %v2185_v31  ;;  %v5296_v47 = vpop.f32.mrf.mxu1 }
 0x39e   :  { %v5278_v60 = vpop.f32.mrf.mxu0  ;;  %6017 = vst [vmem:[#allocation50_spill] sm:$0xff] %v5296_v47 }
 0x39f   :  { %6013 = vst [vmem:[#allocation46_spill] sm:$0xff] %v5278_v60  ;;  %v5300_v3 = vpop.f32.mrf.mxu1 }
 0x3a0   :  { %v2384_v49 = vpop.f32.mrf.mxu0 }
 0x3a1   :  { %v5288_v42 = vadd.f32 %v2384_v49, %v2191_v27 }
 0x3a2   :  { %v5284_v40 = vpop.f32.mrf.mxu0 }
 0x3a3   :  { %6015 = vst [vmem:[#allocation48_spill] sm:$0xff] %v5284_v40 }
 0x3a4   :  { %v2388_v13 = vpop.f32.mrf.mxu0 }
 0x3a5   :  { %v5290_v25 = vadd.f32 %v2388_v13, %v2195_v33  ;;  %v5310_v13 = vpop.f32.mrf.mxu1 }
 0x3a6   :  { %v5292_v36 = vpop.f32.mrf.mxu0  ;;  %6020 = vst [vmem:[#allocation53_spill] sm:$0xff] %v5310_v13 }
 0x3a7   :  { %6016 = vst [vmem:[#allocation49_spill] sm:$0xff] %v5292_v36  ;;  %v5314_v47 = vpop.f32.mrf.mxu1 }
 0x3a8   :  { %v2394_v43 = vpop.f32.mrf.mxu0 }
 0x3a9   :  { %v5302_v60 = vadd.f32 %v2394_v43, %v2201_v8 }
 0x3aa   :  { %v5298_v51 = vpop.f32.mrf.mxu0 }
 0x3ab   :  { %6018 = vst [vmem:[#allocation51_spill] sm:$0xff] %v5298_v51 }
 0x3ac   :  { %v2398_v40 = vpop.f32.mrf.mxu0 }
 0x3ad   :  { %v5304_v18 = vadd.f32 %v2398_v40, %v2205_v16  ;;  %v5324_v40 = vpop.f32.mrf.mxu1 }
 0x3ae   :  { %v5306_v27 = vpop.f32.mrf.mxu0  ;;  %6023 = vst [vmem:[#allocation56_spill] sm:$0xff] %v5324_v40 }
 0x3af   :  { %6019 = vst [vmem:[#allocation52_spill] sm:$0xff] %v5306_v27  ;;  %v2488_v33 = vpack.c.bf16 %v5304_v18, %v5302_v60  ;;  %v2255_v43 = vpop.f32.mrf.mxu1 }
 0x3b0   :  { %v2404_v49 = vpop.f32.mrf.mxu0 }
 0x3b1   :  { %v5316_v36 = vadd.f32 %v2404_v49, %v2211_v52 }
 0x3b2   :  { %v5312_v31 = vpop.f32.mrf.mxu0 }
 0x3b3   :  { %6021 = vst [vmem:[#allocation54_spill] sm:$0xff] %v5312_v31 }
 0x3b4   :  { %v2408_v51 = vpop.f32.mrf.mxu0 }
 0x3b5   :  { %v5318_v41 = vadd.f32 %v2408_v51, %v2215_v6  ;;  %v5336_v51 = vpop.f32.mrf.mxu1 }
 0x3b6   :  { %v5320_v8 = vpop.f32.mrf.mxu0  ;;  %6026 = vst [vmem:[#allocation59_spill] sm:$0xff] %v5336_v51 }
 0x3b7   :  { %6022 = vst [vmem:[#allocation55_spill] sm:$0xff] %v5320_v8  ;;  %v2261_v40 = vpop.f32.mrf.mxu1 }
 0x3b8   :  { %v2414_v18 = vpop.f32.mrf.mxu0 }
 0x3b9   :  { %v5328_v31 = vadd.f32 %v2414_v18, %v2221_v22 }
 0x3ba   :  { %v5326_v60 = vpop.f32.mrf.mxu0 }
 0x3bb   :  { %6024 = vst [vmem:[#allocation57_spill] sm:$0xff] %v5326_v60  ;;  %v5342_v60 = vpop.f32.mrf.mxu1 }
 0x3bc   :  { %v2418_v13 = vpop.f32.mrf.mxu0  ;;  %6029 = vst [vmem:[#allocation62_spill] sm:$0xff] %v5342_v60 }
 0x3bd   :  { %v5330_v27 = vadd.f32 %v2418_v13, %v2225_v12  ;;  %v2265_v12 = vpop.f32.mrf.mxu1 }
 0x3be   :  { %v5332_v52 = vpop.f32.mrf.mxu0 }
 0x3bf   :  { %6025 = vst [vmem:[#allocation58_spill] sm:$0xff] %v5332_v52  ;;  %v5348_v19 = vpop.f32.mrf.mxu1 }
 0x3c0   :  { %v2424_v49 = vpop.f32.mrf.mxu0  ;;  %6032 = vst [vmem:[#allocation65_spill] sm:$0xff] %v5348_v19 }
 0x3c1   :  { %v2271_v4 = vpop.f32.mrf.mxu1 }
 0x3c2   :  { %v5338_v16 = vpop.f32.mrf.mxu0 }
 0x3c3   :  { %6027 = vst [vmem:[#allocation60_spill] sm:$0xff] %v5338_v16  ;;  %v5354_v54 = vpop.f32.mrf.mxu1 }
 0x3c4   :  { %v2428_v8 = vpop.f32.mrf.mxu0  ;;  %6035 = vst [vmem:[#allocation68_spill] sm:$0xff] %v5354_v54 }
 0x3c5   :  { %v2275_v61 = vpop.f32.mrf.mxu1 }
 0x3c6   :  { %v5340_v28 = vpop.f32.mrf.mxu0 }
 0x3c7   :  { %6028 = vst [vmem:[#allocation61_spill] sm:$0xff] %v5340_v28  ;;  %v5360_v20 = vpop.f32.mrf.mxu1 }
 0x3c8   :  { %v2434_v22 = vpop.f32.mrf.mxu0  ;;  %6038 = vst [vmem:[#allocation71_spill] sm:$0xff] %v5360_v20 }
 0x3c9   :  { %v2281_v14 = vpop.f32.mrf.mxu1 }
 0x3ca   :  { %v5344_v18 = vpop.f32.mrf.mxu0 }
 0x3cb   :  { %6030 = vst [vmem:[#allocation63_spill] sm:$0xff] %v5344_v18  ;;  %v5366_v44 = vpop.f32.mrf.mxu1 }
 0x3cc   :  { %v2438_v13 = vpop.f32.mrf.mxu0  ;;  %6041 = vst [vmem:[#allocation74_spill] sm:$0xff] %v5366_v44  ;;  %v6043_v44 = vpack.c.bf16 %v5290_v25, %v5288_v42  ;;  %v2355_v25 = vadd.f32 %v5246_v24, %v5189_v34  ;;  %v2339_v34 = vadd.f32 %v5230_v2, %v5174_v10  ;;  %v4198_v10 = vld [vmem:[%s5973_s7 + $0x74] ss:$8 sps:$4 sm:$0xff]   ;;  %v4207_v2 = vld [vmem:[%s5973_s7 + $0x44] ss:$8 sps:$4 sm:$0xff]  }
 0x3cd   :  { %v2285_v57 = vpop.f32.mrf.mxu1  ;;  %2873 = vmatprep.subr.bf16.mxu0 %v4198_v10  ;;  %v4205_v42 = vld [vmem:[%s5973_s7 + $0x40] ss:$8 sps:$4 sm:$0xff]   ;;  %v5451_v24 = vld [vmem:[#allocation2 + $0x44] ss:$8 sps:$4 sm:$0xff]  }
 0x3ce   :  { %v5346_v52 = vpop.f32.mrf.mxu0 }
 0x3cf   :  { %6031 = vst [vmem:[#allocation64_spill] sm:$0xff] %v5346_v52 }
 0x3d0   :  { %v2444_v6 = vpop.f32.mrf.mxu0 }
 0x3d2   :  { %v5350_v51 = vpop.f32.mrf.mxu0 }
 0x3d3   :  { %6033 = vst [vmem:[#allocation66_spill] sm:$0xff] %v5350_v51 }
 0x3d4   :  { %v2448_v16 = vpop.f32.mrf.mxu0 }
 0x3d5   :  { %v2449_v21 = vadd.f32 %v2448_v16, %v2255_v43  ;;  %v4213_v16 = vld [vmem:[%s5973_s7 + $0x24] ss:$8 sps:$4 sm:$0xff]   ;;  %v5499_v43 = vld [vmem:[#allocation2 + $0x90] ss:$8 sps:$4 sm:$0xff]  }
 0x3d6   :  { %v5352_v23 = vpop.f32.mrf.mxu0 }
 0x3d7   :  { %6034 = vst [vmem:[#allocation67_spill] sm:$0xff] %v5352_v23 }
 0x3d8   :  { %v2454_v28 = vpop.f32.mrf.mxu0 }
 0x3da   :  { %v5356_v60 = vpop.f32.mrf.mxu0 }
 0x3db   :  { %6036 = vst [vmem:[#allocation69_spill] sm:$0xff] %v5356_v60 }
 0x3dc   :  { %v2458_v18 = vpop.f32.mrf.mxu0 }
 0x3dd   :  { %v2459_v20 = vadd.f32 %v2458_v18, %v2265_v12  ;;  %v5517_v18 = vld [vmem:[#allocation2 + $0xb4] ss:$8 sps:$4 sm:$0xff]   ;;  %v5520_v12 = vld [vmem:[#allocation2 + $0xb0] ss:$8 sps:$4 sm:$0xff]  }
 0x3de   :  { %v5358_v0 = vpop.f32.mrf.mxu0 }
 0x3df   :  { %6037 = vst [vmem:[#allocation70_spill] sm:$0xff] %v5358_v0 }
 0x3e0   :  { %v2464_v52 = vpop.f32.mrf.mxu0 }
 0x3e1   :  { %v2465_v0 = vadd.f32 %v2464_v52, %v2271_v4  ;;  %v5454_v4 = vld [vmem:[#allocation2 + $0x40] ss:$8 sps:$4 sm:$0xff]   ;;  %v4214_v52 = vld [vmem:[%s5973_s7 + $0x10] ss:$8 sps:$4 sm:$0xff]  }
 0x3e2   :  { %v5362_v19 = vpop.f32.mrf.mxu0 }
 0x3e3   :  { %6039 = vst [vmem:[#allocation72_spill] sm:$0xff] %v5362_v19  ;;  %v2455_v19 = vadd.f32 %v2454_v28, %v2261_v40  ;;  %v5460_v28 = vld [vmem:[#allocation2 + $0x50] ss:$8 sps:$4 sm:$0xff]   ;;  %v4211_v40 = vld [vmem:[%s5973_s7 + $0x20] ss:$8 sps:$4 sm:$0xff]  }
 0x3e4   :  { %v2468_v51 = vpop.f32.mrf.mxu0 }
 0x3e5   :  { %v2469_v35 = vadd.f32 %v2468_v51, %v2275_v61  ;;  %v2439_v61 = vadd.f32 %v2438_v13, %v5300_v3  ;;  %v5469_v3 = vld [vmem:[#allocation2 + $0x74] ss:$8 sps:$4 sm:$0xff]   ;;  %v4219_v51 = vld [vmem:[%s5973_s7 + $0x4] ss:$8 sps:$4 sm:$0xff]  }
 0x3e6   :  { %v5364_v58 = vpop.f32.mrf.mxu0  ;;  %v5523_v13 = vld [vmem:[#allocation2 + $0xc4] ss:$8 sps:$4 sm:$0xff]  }
 0x3e7   :  { %6040 = vst [vmem:[#allocation73_spill] sm:$0xff] %v5364_v58  ;;  %v2495_v26 = vpack.c.bf16 %v2469_v35, %v2465_v0  ;;  %v2494_v58 = vpack.c.bf16 %v2459_v20, %v2455_v19  ;;  %v2359_v20 = vadd.f32 %v5250_v59, %v5194_v15  ;;  %v2345_v15 = vadd.f32 %v5236_v53, %v5179_v56  ;;  %v4196_v56 = vld [vmem:[%s5973_s7 + $0x70] ss:$8 sps:$4 sm:$0xff]   ;;  %v5439_v0 = vld [vmem:[#allocation2 + $0x24] ss:$8 sps:$4 sm:$0xff]  }
 0x3e8   :  { %v2474_v23 = vpop.f32.mrf.mxu0  ;;  %2874 = vmatpush1.bf16.msra.mxu0 %v4196_v56  ;;  %v5436_v53 = vld [vmem:[#allocation2 + $0x10] ss:$8 sps:$4 sm:$0xff]   ;;  %v5457_v59 = vld [vmem:[#allocation2 + $0x54] ss:$8 sps:$4 sm:$0xff]  }
 0x3e9   :  { %v2475_v46 = vadd.f32 %v2474_v23, %v2281_v14  ;;  %v2429_v23 = vadd.f32 %v2428_v8, %v5272_v11  ;;  %v5430_v14 = vld [vmem:[#allocation2 + $0x14] ss:$8 sps:$4 sm:$0xff]   ;;  %v5463_v11 = vld [vmem:[#allocation2 + $0x64] ss:$8 sps:$4 sm:$0xff]  }
 0x3ea   :  { %v5368_v54 = vpop.f32.mrf.mxu0  ;;  %v5487_v8 = vld [vmem:[#allocation2 + $0x94] ss:$8 sps:$4 sm:$0xff]  }
 0x3eb   :  { %6042 = vst [vmem:[#allocation75_spill] sm:$0xff] %v5368_v54  ;;  %v2445_v54 = vadd.f32 %v2444_v6, %v5314_v47  ;;  %v4210_v47 = vld [vmem:[%s5973_s7 + $0x34] ss:$8 sps:$4 sm:$0xff]   ;;  %v5505_v6 = vld [vmem:[#allocation2 + $0xa4] ss:$8 sps:$4 sm:$0xff]  }
 0x3ec   :  { %v2478_v60 = vpop.f32.mrf.mxu0 }
 0x3ed   :  { %v2479_v63 = vadd.f32 %v2478_v60, %v2285_v57  ;;  %v2493_v57 = vpack.c.bf16 %v2449_v21, %v2445_v54  ;;  %v2425_v21 = vadd.f32 %v2424_v49, %v5258_v29  ;;  %v5445_v54 = vld [vmem:[#allocation2 + $0x34] ss:$8 sps:$4 sm:$0xff]   ;;  %v5466_v29 = vld [vmem:[#allocation2 + $0x60] ss:$8 sps:$4 sm:$0xff]  }
 0x3ee   :  { %v4216_v60 = vld [vmem:[%s5973_s7 + $0x14] ss:$8 sps:$4 sm:$0xff]   ;;  %v4217_v49 = vld [vmem:[%s5973_s7] ss:$8 sps:$4 sm:$0xff]  }
 0x3ef   :  { %v2496_v38 = vpack.c.bf16 %v2479_v63, %v2475_v46  ;;  %v6044_v46 = vpack.c.bf16 %v5276_v30, %v5274_v32  ;;  %v2349_v30 = vadd.f32 %v5240_v5, %v5184_v50  ;;  %v2484_v32 = vpack.c.bf16 %v2359_v20, %v2355_v25  ;;  %v5442_v5 = vld [vmem:[#allocation2 + $0x20] ss:$8 sps:$4 sm:$0xff]  }
 0x3f0   :  { %v6046_v63 = vpack.c.bf16 %v5330_v27, %v5328_v31  ;;  %v2329_v50 = vadd.f32 %v5220_v1, %v5164_v62  ;;  %v6047_v62 = vpack.c.bf16 %v5318_v41, %v5316_v36  ;;  %v5424_v41 = vld [vmem:[#allocation2] ss:$8 sps:$4 sm:$0xff]   ;;  %v5472_v36 = vld [vmem:[#allocation2 + $0x70] ss:$8 sps:$4 sm:$0xff]   ;;  %v5475_v31 = vld [vmem:[#allocation2 + $0x84] ss:$8 sps:$4 sm:$0xff]  }
 0x3f1   :  { %3707 = vmatprep.subr.bf16.mxu1 %v2496_v38  ;;  %v2435_v38 = vadd.f32 %v2434_v22, %v5286_v55  ;;  %v2483_v55 = vpack.c.bf16 %v2349_v30, %v2345_v15  ;;  %v5481_v27 = vld [vmem:[#allocation2 + $0x80] ss:$8 sps:$4 sm:$0xff]  }
 0x3f2   :  { %3708 = vmatpush3.bf16.msra.mxu1 %v2488_v33  ;;  %v4208_v33 = vld [vmem:[%s5973_s7 + $0x30] ss:$8 sps:$4 sm:$0xff]   ;;  %v5514_v22 = vld [vmem:[#allocation2 + $0xa0] ss:$8 sps:$4 sm:$0xff]  }
 0x3f3   :  { %3709 = vmatprep.subr.bf16.mxu1 %v2495_v26  ;;  %v2492_v19 = vpack.c.bf16 %v2439_v61, %v2435_v38  ;;  %v2491_v26 = vpack.c.bf16 %v2429_v23, %v2425_v21  ;;  %v5526_v61 = vld [vmem:[#allocation2 + $0xc0] ss:$8 sps:$4 sm:$0xff]   ;;  %v5535_v38 = vld [vmem:[#allocation2 + $0xe4] ss:$8 sps:$4 sm:$0xff]   ;;  %v5541_v23 = vld [vmem:[#allocation2 + $0xf4] ss:$8 sps:$4 sm:$0xff]  }
 0x3f4   :  { %v5538_v20 = vld [vmem:[#allocation2 + $0xe0] ss:$8 sps:$4 sm:$0xff]  }
 0x3f5   :  { %v6049_v21 = vld [vmem:[#allocation12_spill] sm:$0xff] }
 0x3f6   :  { %3710 = vmatpush3.bf16.msra.mxu1 %v6043_v44  ;;  %v4199_v44 = vld [vmem:[%s5973_s7 + $0x60] ss:$8 sps:$4 sm:$0xff]  }
 0x3f7   :  { %3711 = vmatprep.subr.bf16.mxu1 %v2494_v58  ;;  %v6045_v58 = vpack.c.bf16 %v5262_v37, %v5260_v45  ;;  %v2335_v45 = vadd.f32 %v5226_v9, %v5169_v48  ;;  %v2325_v48 = vadd.f32 %v5216_v17, %v5158_v39  ;;  %v4201_v9 = vld [vmem:[%s5973_s7 + $0x64] ss:$8 sps:$4 sm:$0xff]   ;;  %v4204_v39 = vld [vmem:[%s5973_s7 + $0x54] ss:$8 sps:$4 sm:$0xff]   ;;  %v4202_v17 = vld [vmem:[%s5973_s7 + $0x50] ss:$8 sps:$4 sm:$0xff]  }
 0x3f8   :  { %2875 = vmatprep.subr.bf16.mxu0 %v4201_v9  ;;  %v5448_v37 = vld [vmem:[#allocation2 + $0x30] ss:$8 sps:$4 sm:$0xff]   ;;  %v6050_v30 = vld [vmem:[#allocation28_spill] sm:$0xff] }
 0x3f9   :  { %v2482_v35 = vpack.c.bf16 %v2339_v34, %v2335_v45  ;;  %v2481_v1 = vpack.c.bf16 %v2329_v50, %v2325_v48  ;;  %2876 = vmatpush1.bf16.msra.mxu0 %v4199_v44  ;;  %v6052_v50 = vld [vmem:[#allocation30_spill] sm:$0xff] }
 0x3fa   :  { %3712 = vmatpush3.bf16.msra.mxu1 %v6044_v46  ;;  %2877 = vmatprep.subr.bf16.mxu0 %v4204_v39  ;;  %v5532_v46 = vld [vmem:[#allocation2 + $0xd0] ss:$8 sps:$4 sm:$0xff]  }
 0x3fb   :  { %3713 = vmatprep.subr.bf16.mxu1 %v2493_v57  ;;  %v5529_v57 = vld [vmem:[#allocation2 + $0xd4] ss:$8 sps:$4 sm:$0xff]  }
 0x3fd   :  { %2878 = vmatpush1.bf16.msra.mxu0 %v4202_v17 }
 0x3fe   :  { %3714 = vmatpush3.bf16.msra.mxu1 %v6045_v58  ;;  %2879 = vmatprep.subr.bf16.mxu0 %v4207_v2 }
 0x3ff   :  { %3715 = vmatprep.subr.bf16.mxu1 %v2492_v19  ;;  %v5544_v19 = vld [vmem:[#allocation2 + $0xf0] ss:$8 sps:$4 sm:$0xff]  }
 0x400   :  { %6048 = vst [vmem:[#allocation76_spill] sm:$0xff] %v5544_v19 }
 0x401   :  { %2880 = vmatpush1.bf16.msra.mxu0 %v4205_v42 }
 0x402   :  { %3716 = vmatpush3.bf16.msra.mxu1 %v2484_v32  ;;  %2881 = vmatprep.subr.bf16.mxu0 %v4210_v47  ;;  %v2323_v32 = vadd.f32 %v6050_v30, %v6049_v21 }
 0x403   :  { %3717 = vmatprep.subr.bf16.mxu1 %v2491_v26 }
 0x405   :  { %2882 = vmatpush1.bf16.msra.mxu0 %v4208_v33 }
 0x406   :  { %3718 = vmatpush3.bf16.msra.mxu1 %v2483_v55  ;;  %2883 = vmatprep.subr.bf16.mxu0 %v4213_v16  ;;  %v5553_v55 = vld [vmem:[%s5972_s6] ss:$0 sm:$0xff] }
 0x407   :  { %3719 = vmatprep.subr.bf16.mxu1 %v6046_v63  ;;  %v6051_v63 = vld [vmem:[#allocation13_spill] sm:$0xff] }
 0x409   :  { %2884 = vmatpush1.bf16.msra.mxu0 %v4211_v40  ;;  %v6055_v40 = vld [vmem:[#allocation15_spill] sm:$0xff] }
 0x40a   :  { %3720 = vmatpush3.bf16.msra.mxu1 %v2482_v35  ;;  %2885 = vmatprep.subr.bf16.mxu0 %v4216_v60  ;;  %v2327_v35 = vadd.f32 %v6052_v50, %v6051_v63  ;;  %v6056_v60 = vld [vmem:[#allocation33_spill] sm:$0xff] }
 0x40b   :  { %3721 = vmatprep.subr.bf16.mxu1 %v6047_v62  ;;  %v6053_v62 = vld [vmem:[#allocation14_spill] sm:$0xff] }
 0x40d   :  { %2886 = vmatpush1.bf16.msra.mxu0 %v4214_v52  ;;  %v2337_v52 = vadd.f32 %v6056_v60, %v6055_v40 }
 0x40e   :  { %3722 = vmatpush3.bf16.msra.mxu1 %v2481_v1  ;;  %2887 = vmatprep.subr.bf16.mxu0 %v4219_v51  ;;  %v6054_v1 = vld [vmem:[#allocation31_spill] sm:$0xff] }
 0x40f   :  { %v2333_v44 = vadd.f32 %v6054_v1, %v6053_v62 }
 0x411   :  { %2530 = vmatmul.mubr.bf16.vlgmr.msra.gmra.mxu1 %v5424_v41  ;;  %2888 = vmatpush1.bf16.msra.mxu0 %v4217_v49 }
 0x412   :  { %2537 = vmatprep.mubr.bf16.mxu1 %v5430_v14 }
 0x419   :  { %2538 = vmatmul.mubr.bf16.gmra.mxu1 %v5436_v53 }
 0x41a   :  { %2545 = vmatprep.mubr.bf16.mxu1 %v5439_v0 }
 0x421   :  { %2546 = vmatmul.mubr.bf16.gmra.mxu1 %v5442_v5 }
 0x422   :  { %2553 = vmatprep.mubr.bf16.mxu1 %v5445_v54 }
 0x429   :  { %2554 = vmatmul.mubr.bf16.gmra.mxu1 %v5448_v37 }
 0x42a   :  { %2561 = vmatprep.mubr.bf16.mxu1 %v5451_v24 }
 0x431   :  { %2562 = vmatmul.mubr.bf16.gmra.mxu1 %v5454_v4 }
 0x432   :  { %2569 = vmatprep.mubr.bf16.mxu1 %v5457_v59 }
 0x439   :  { %2570 = vmatmul.mubr.bf16.gmra.mxu1 %v5460_v28 }
 0x43a   :  { %2577 = vmatprep.mubr.bf16.mxu1 %v5463_v11 }
 0x441   :  { %2578 = vmatmul.mubr.bf16.gmra.mxu1 %v5466_v29 }
 0x442   :  { %2585 = vmatprep.mubr.bf16.mxu1 %v5469_v3 }
 0x449   :  { %2586 = vmatmul.mubr.bf16.gmra.mxu1 %v5472_v36 }
 0x44a   :  { %2593 = vmatprep.mubr.bf16.mxu1 %v5475_v31 }
 0x451   :  { %2594 = vmatmul.mubr.bf16.gmra.mxu1 %v5481_v27 }
 0x452   :  { %2601 = vmatprep.mubr.bf16.mxu1 %v5487_v8 }
 0x459   :  { %2602 = vmatmul.mubr.bf16.gmra.mxu1 %v5499_v43 }
 0x45a   :  { %2609 = vmatprep.mubr.bf16.mxu1 %v5505_v6 }
 0x461   :  { %2610 = vmatmul.mubr.bf16.gmra.mxu1 %v5514_v22 }
 0x462   :  { %2617 = vmatprep.mubr.bf16.mxu1 %v5517_v18 }
 0x469   :  { %2618 = vmatmul.mubr.bf16.gmra.mxu1 %v5520_v12 }
 0x46a   :  { %2625 = vmatprep.mubr.bf16.mxu1 %v5523_v13 }
 0x471   :  { %2626 = vmatmul.mubr.bf16.gmra.mxu1 %v5526_v61 }
 0x472   :  { %2633 = vmatprep.mubr.bf16.mxu1 %v5529_v57 }
 0x479   :  { %2634 = vmatmul.mubr.bf16.gmra.mxu1 %v5532_v46 }
 0x47a   :  { %2641 = vmatprep.mubr.bf16.mxu1 %v5535_v38 }
 0x481   :  { %2642 = vmatmul.mubr.bf16.gmra.mxu1 %v5538_v20 }
 0x482   :  { %2649 = vmatprep.mubr.bf16.mxu1 %v5541_v23 }
 0x489   :  { %2650 = vmatmul.mubr.bf16.gmra.mxu1 %v5544_v19 }
 0x48a   :  { %3114 = vmatprep.mubr.bf16.mxu1 %v5070_v7 }
 0x4d1   :  { %v3723_v25 = vpop.f32.mrf.mxu1 }
 0x4d3   :  { %v3724_v58 = vpop.f32.mrf.mxu1 }
 0x4d4   :  { %v3725_v26 = vadd.f32 %v3724_v58, %v3723_v25 }
 0x4d5   :  { %v3726_v15 = vpop.f32.mrf.mxu1 }
 0x4d6   :  { %v2658_v34 = vadd.f32 %v3725_v26, %v2323_v32  ;;  %v6057_v32 = vmov 0   ;;  %v6058_v26 = vld [vmem:[#allocation16_spill] sm:$0xff] }
 0x4d7   :  { %v3727_v45 = vpop.f32.mrf.mxu1 }
 0x4d8   :  { %v3728_v56 = vadd.f32 %v3727_v45, %v3726_v15  ;;  %v2697_v7 = vadd.f32 %v5553_v55, %v2658_v34  ;;  %v6059_v15 = vld [vmem:[#allocation34_spill] sm:$0xff] }
 0x4d9   :  { %v3729_v10 = vpop.f32.mrf.mxu1  ;;  %v2343_v34 = vadd.f32 %v6059_v15, %v6058_v26 }
 0x4da   :  { %v2659_v48 = vadd.f32 %v3728_v56, %v2327_v35  ;;  %v2729_v42 = vmax.f32 %v2697_v7, 0.0 }
 0x4db   :  { %v3730_v9 = vpop.f32.mrf.mxu1 }
 0x4dc   :  { %v2698_v39 = vadd.f32 %v5553_v55, %v2659_v48  ;;  %v3731_v17 = vadd.f32 %v3730_v9, %v3729_v10  ;;  %v6060_v48 = vld [vmem:[#allocation17_spill] sm:$0xff]  ;;  %v6061_v9 = vld [vmem:[#allocation36_spill] sm:$0xff] }
 0x4dd   :  { %v3732_v2 = vpop.f32.mrf.mxu1  ;;  %v2347_v62 = vadd.f32 %v6061_v9, %v6060_v48 }
 0x4de   :  { %v2730_v47 = vmax.f32 %v2698_v39, 0.0  ;;  %v2660_v33 = vadd.f32 %v3731_v17, %v2333_v44 }
 0x4df   :  { %v3733_v16 = vpop.f32.mrf.mxu1 }
 0x4e0   :  { %v2761_v51 = vpack.c.bf16 %v2730_v47, %v2729_v42  ;;  %v3734_v49 = vadd.f32 %v3733_v16, %v3732_v2  ;;  %v2699_v58 = vadd.f32 %v5553_v55, %v2660_v33  ;;  %v6062_v47 = vld [vmem:[#allocation18_spill] sm:$0xff]  ;;  %v6063_v33 = vld [vmem:[#allocation37_spill] sm:$0xff] }
 0x4e1   :  { %v3735_v25 = vpop.f32.mrf.mxu1  ;;  %v2353_v16 = vadd.f32 %v6063_v33, %v6062_v47 }
 0x4e2   :  { %v2661_v21 = vadd.f32 %v3734_v49, %v2337_v52  ;;  %2906 = vmatmul.mubr.bf16.vlgmr.msra.gmra.mxu0 %v2761_v51  ;;  %v2731_v35 = vmax.f32 %v2699_v58, 0.0 }
 0x4e3   :  { %v3736_v30 = vpop.f32.mrf.mxu1  ;;  %2915 = vmatprep.mubr.bf16.mxu0 %v6057_v32 }
 0x4e4   :  { %v2700_v45 = vadd.f32 %v5553_v55, %v2661_v21  ;;  %v3737_v63 = vadd.f32 %v3736_v30, %v3735_v25  ;;  %v6064_v21 = vld [vmem:[#allocation19_spill] sm:$0xff] }
 0x4e5   :  { %v3738_v50 = vpop.f32.mrf.mxu1  ;;  %v6065_v30 = vld [vmem:[#allocation39_spill] sm:$0xff] }
 0x4e6   :  { %v2732_v56 = vmax.f32 %v2700_v45, 0.0  ;;  %v2662_v10 = vadd.f32 %v3737_v63, %v2343_v34  ;;  %v2357_v26 = vadd.f32 %v6065_v30, %v6064_v21 }
 0x4e7   :  { %v3739_v7 = vpop.f32.mrf.mxu1 }
 0x4e8   :  { %v3740_v1 = vadd.f32 %v3739_v7, %v3738_v50  ;;  %v2762_v44 = vpack.c.bf16 %v2732_v56, %v2731_v35  ;;  %v2701_v17 = vadd.f32 %v5553_v55, %v2662_v10  ;;  %v6066_v56 = vld [vmem:[#allocation20_spill] sm:$0xff] }
 0x4e9   :  { %v3741_v39 = vpop.f32.mrf.mxu1  ;;  %v6067_v10 = vld [vmem:[#allocation40_spill] sm:$0xff] }
 0x4ea   :  { %v2663_v2 = vadd.f32 %v3740_v1, %v2347_v62  ;;  %2916 = vmatmul.mubr.bf16.gmra.mxu0 %v2762_v44  ;;  %v2733_v51 = vmax.f32 %v2701_v17, 0.0  ;;  %v2363_v7 = vadd.f32 %v6067_v10, %v6066_v56 }
 0x4eb   :  { %v3742_v42 = vpop.f32.mrf.mxu1  ;;  %2925 = vmatprep.mubr.bf16.mxu0 %v6057_v32 }
 0x4ec   :  { %v2702_v40 = vadd.f32 %v5553_v55, %v2663_v2  ;;  %v3743_v60 = vadd.f32 %v3742_v42, %v3741_v39  ;;  %v6068_v2 = vld [vmem:[#allocation21_spill] sm:$0xff]  ;;  %v6069_v42 = vld [vmem:[#allocation42_spill] sm:$0xff] }
 0x4ed   :  { %v3744_v52 = vpop.f32.mrf.mxu1  ;;  %v2367_v47 = vadd.f32 %v6069_v42, %v6068_v2 }
 0x4ee   :  { %v2734_v49 = vmax.f32 %v2702_v40, 0.0  ;;  %v2664_v25 = vadd.f32 %v3743_v60, %v2353_v16 }
 0x4ef   :  { %v3745_v58 = vpop.f32.mrf.mxu1 }
 0x4f0   :  { %v3746_v15 = vadd.f32 %v3745_v58, %v3744_v52  ;;  %v2763_v34 = vpack.c.bf16 %v2734_v49, %v2733_v51  ;;  %v2703_v63 = vadd.f32 %v5553_v55, %v2664_v25  ;;  %v6070_v49 = vld [vmem:[#allocation22_spill] sm:$0xff]  ;;  %v6071_v25 = vld [vmem:[#allocation43_spill] sm:$0xff] }
 0x4f1   :  { %v3747_v45 = vpop.f32.mrf.mxu1  ;;  %v2373_v58 = vadd.f32 %v6071_v25, %v6070_v49 }
 0x4f2   :  { %v2665_v50 = vadd.f32 %v3746_v15, %v2357_v26  ;;  %2926 = vmatmul.mubr.bf16.gmra.mxu0 %v2763_v34  ;;  %v2735_v1 = vmax.f32 %v2703_v63, 0.0 }
 0x4f3   :  { %v3748_v35 = vpop.f32.mrf.mxu1  ;;  %2935 = vmatprep.mubr.bf16.mxu0 %v6057_v32 }
 0x4f4   :  { %v2704_v48 = vadd.f32 %v5553_v55, %v2665_v50  ;;  %v3749_v9 = vadd.f32 %v3748_v35, %v3747_v45  ;;  %v6072_v50 = vld [vmem:[#allocation23_spill] sm:$0xff]  ;;  %v6073_v35 = vld [vmem:[#allocation45_spill] sm:$0xff] }
 0x4f5   :  { %v3750_v62 = vpop.f32.mrf.mxu1  ;;  %v2377_v56 = vadd.f32 %v6073_v35, %v6072_v50 }
 0x4f6   :  { %v2736_v44 = vmax.f32 %v2704_v48, 0.0  ;;  %v2666_v39 = vadd.f32 %v3749_v9, %v2363_v7 }
 0x4f7   :  { %v3751_v17 = vpop.f32.mrf.mxu1 }
 0x4f8   :  { %v3752_v33 = vadd.f32 %v3751_v17, %v3750_v62  ;;  %v2764_v16 = vpack.c.bf16 %v2736_v44, %v2735_v1  ;;  %v2705_v60 = vadd.f32 %v5553_v55, %v2666_v39  ;;  %v6074_v44 = vld [vmem:[#allocation24_spill] sm:$0xff]  ;;  %v6075_v39 = vld [vmem:[#allocation46_spill] sm:$0xff] }
 0x4f9   :  { %v3753_v40 = vpop.f32.mrf.mxu1  ;;  %v2383_v17 = vadd.f32 %v6075_v39, %v6074_v44 }
 0x4fa   :  { %v2667_v52 = vadd.f32 %v3752_v33, %v2367_v47  ;;  %2936 = vmatmul.mubr.bf16.gmra.mxu0 %v2764_v16  ;;  %v2737_v15 = vmax.f32 %v2705_v60, 0.0 }
 0x4fb   :  { %v3754_v51 = vpop.f32.mrf.mxu1  ;;  %2945 = vmatprep.mubr.bf16.mxu0 %v6057_v32 }
 0x4fc   :  { %v2706_v21 = vadd.f32 %v5553_v55, %v2667_v52  ;;  %v3755_v30 = vadd.f32 %v3754_v51, %v3753_v40  ;;  %v6076_v52 = vld [vmem:[#allocation25_spill] sm:$0xff]  ;;  %v6077_v51 = vld [vmem:[#allocation48_spill] sm:$0xff] }
 0x4fd   :  { %v3756_v26 = vpop.f32.mrf.mxu1  ;;  %v2387_v49 = vadd.f32 %v6077_v51, %v6076_v52 }
 0x4fe   :  { %v2738_v34 = vmax.f32 %v2706_v21, 0.0  ;;  %v2668_v45 = vadd.f32 %v3755_v30, %v2373_v58 }
 0x4ff   :  { %v3757_v63 = vpop.f32.mrf.mxu1 }
 0x500   :  { %v2765_v10 = vpack.c.bf16 %v2738_v34, %v2737_v15  ;;  %v3758_v7 = vadd.f32 %v3757_v63, %v3756_v26  ;;  %v2707_v9 = vadd.f32 %v5553_v55, %v2668_v45  ;;  %v6078_v34 = vld [vmem:[#allocation26_spill] sm:$0xff]  ;;  %v6079_v45 = vld [vmem:[#allocation49_spill] sm:$0xff] }
 0x501   :  { %v3759_v48 = vpop.f32.mrf.mxu1  ;;  %v2393_v63 = vadd.f32 %v6079_v45, %v6078_v34 }
 0x502   :  { %v2669_v62 = vadd.f32 %v3758_v7, %v2377_v56  ;;  %2946 = vmatmul.mubr.bf16.gmra.mxu0 %v2765_v10  ;;  %v2739_v33 = vmax.f32 %v2707_v9, 0.0 }
 0x503   :  { %v3760_v1 = vpop.f32.mrf.mxu1  ;;  %2955 = vmatprep.mubr.bf16.mxu0 %v6057_v32 }
 0x504   :  { %v2708_v2 = vadd.f32 %v5553_v55, %v2669_v62  ;;  %v3761_v42 = vadd.f32 %v3760_v1, %v3759_v48  ;;  %v6080_v62 = vld [vmem:[#allocation27_spill] sm:$0xff] }
 0x505   :  { %v3762_v47 = vpop.f32.mrf.mxu1  ;;  %v6081_v1 = vld [vmem:[#allocation51_spill] sm:$0xff] }
 0x506   :  { %v2740_v16 = vmax.f32 %v2708_v2, 0.0  ;;  %v2670_v40 = vadd.f32 %v3761_v42, %v2383_v17  ;;  %v2397_v44 = vadd.f32 %v6081_v1, %v6080_v62 }
 0x507   :  { %v3763_v60 = vpop.f32.mrf.mxu1 }
 0x508   :  { %v2766_v25 = vpack.c.bf16 %v2740_v16, %v2739_v33  ;;  %v3764_v58 = vadd.f32 %v3763_v60, %v3762_v47  ;;  %v2709_v30 = vadd.f32 %v5553_v55, %v2670_v40  ;;  %v6082_v16 = vld [vmem:[#allocation29_spill] sm:$0xff]  ;;  %v6083_v40 = vld [vmem:[#allocation52_spill] sm:$0xff] }
 0x509   :  { %v3765_v21 = vpop.f32.mrf.mxu1  ;;  %v2403_v60 = vadd.f32 %v6083_v40, %v6082_v16 }
 0x50a   :  { %v2671_v26 = vadd.f32 %v3764_v58, %v2387_v49  ;;  %2956 = vmatmul.mubr.bf16.gmra.mxu0 %v2766_v25  ;;  %v2741_v10 = vmax.f32 %v2709_v30, 0.0 }
 0x50b   :  { %v3766_v15 = vpop.f32.mrf.mxu1  ;;  %2965 = vmatprep.mubr.bf16.mxu0 %v6057_v32 }
 0x50c   :  { %v2710_v50 = vadd.f32 %v5553_v55, %v2671_v26  ;;  %v3767_v35 = vadd.f32 %v3766_v15, %v3765_v21  ;;  %v6084_v26 = vld [vmem:[#allocation32_spill] sm:$0xff]  ;;  %v6085_v15 = vld [vmem:[#allocation54_spill] sm:$0xff] }
 0x50d   :  { %v3768_v56 = vpop.f32.mrf.mxu1  ;;  %v2407_v34 = vadd.f32 %v6085_v15, %v6084_v26 }
 0x50e   :  { %v2742_v7 = vmax.f32 %v2710_v50, 0.0  ;;  %v2672_v48 = vadd.f32 %v3767_v35, %v2393_v63 }
 0x50f   :  { %v3769_v9 = vpop.f32.mrf.mxu1 }
 0x510   :  { %v2767_v39 = vpack.c.bf16 %v2742_v7, %v2741_v10  ;;  %v3770_v17 = vadd.f32 %v3769_v9, %v3768_v56  ;;  %v2711_v42 = vadd.f32 %v5553_v55, %v2672_v48  ;;  %v6086_v7 = vld [vmem:[#allocation35_spill] sm:$0xff] }
 0x511   :  { %v3771_v2 = vpop.f32.mrf.mxu1  ;;  %v6087_v48 = vld [vmem:[#allocation55_spill] sm:$0xff] }
 0x512   :  { %v2673_v47 = vadd.f32 %v3770_v17, %v2397_v44  ;;  %2966 = vmatmul.mubr.bf16.gmra.mxu0 %v2767_v39  ;;  %v2743_v25 = vmax.f32 %v2711_v42, 0.0  ;;  %v2413_v9 = vadd.f32 %v6087_v48, %v6086_v7 }
 0x513   :  { %v3772_v33 = vpop.f32.mrf.mxu1  ;;  %2975 = vmatprep.mubr.bf16.mxu0 %v6057_v32 }
 0x514   :  { %v2712_v52 = vadd.f32 %v5553_v55, %v2673_v47  ;;  %v3773_v51 = vadd.f32 %v3772_v33, %v3771_v2  ;;  %v6088_v47 = vld [vmem:[#allocation38_spill] sm:$0xff]  ;;  %v6089_v33 = vld [vmem:[#allocation57_spill] sm:$0xff] }
 0x515   :  { %v3774_v49 = vpop.f32.mrf.mxu1  ;;  %v2417_v16 = vadd.f32 %v6089_v33, %v6088_v47 }
 0x516   :  { %v2744_v58 = vmax.f32 %v2712_v52, 0.0  ;;  %v2674_v21 = vadd.f32 %v3773_v51, %v2403_v60 }
 0x517   :  { %v3775_v30 = vpop.f32.mrf.mxu1 }
 0x518   :  { %v2768_v45 = vpack.c.bf16 %v2744_v58, %v2743_v25  ;;  %v3776_v63 = vadd.f32 %v3775_v30, %v3774_v49  ;;  %v2713_v35 = vadd.f32 %v5553_v55, %v2674_v21  ;;  %v6090_v58 = vld [vmem:[#allocation41_spill] sm:$0xff]  ;;  %v6091_v21 = vld [vmem:[#allocation58_spill] sm:$0xff] }
 0x519   :  { %v3777_v50 = vpop.f32.mrf.mxu1  ;;  %v2423_v30 = vadd.f32 %v6091_v21, %v6090_v58 }
 0x51a   :  { %v2675_v56 = vadd.f32 %v3776_v63, %v2407_v34  ;;  %2976 = vmatmul.mubr.bf16.gmra.mxu0 %v2768_v45  ;;  %v2745_v39 = vmax.f32 %v2713_v35, 0.0 }
 0x51b   :  { %v3778_v10 = vpop.f32.mrf.mxu1  ;;  %2985 = vmatprep.mubr.bf16.mxu0 %v6057_v32 }
 0x51c   :  { %v2714_v62 = vadd.f32 %v5553_v55, %v2675_v56  ;;  %v3779_v1 = vadd.f32 %v3778_v10, %v3777_v50  ;;  %v6092_v56 = vld [vmem:[#allocation44_spill] sm:$0xff] }
 0x51d   :  { %v3780_v44 = vpop.f32.mrf.mxu1  ;;  %v6093_v10 = vld [vmem:[#allocation60_spill] sm:$0xff] }
 0x51e   :  { %v2746_v17 = vmax.f32 %v2714_v62, 0.0  ;;  %v2676_v2 = vadd.f32 %v3779_v1, %v2413_v9  ;;  %v2427_v7 = vadd.f32 %v6093_v10, %v6092_v56 }
 0x51f   :  { %v3781_v42 = vpop.f32.mrf.mxu1 }
 0x520   :  { %v2769_v40 = vpack.c.bf16 %v2746_v17, %v2745_v39  ;;  %v3782_v60 = vadd.f32 %v3781_v42, %v3780_v44  ;;  %v2715_v51 = vadd.f32 %v5553_v55, %v2676_v2  ;;  %v6094_v17 = vld [vmem:[#allocation47_spill] sm:$0xff]  ;;  %v6095_v2 = vld [vmem:[#allocation61_spill] sm:$0xff] }
 0x521   :  { %v3783_v52 = vpop.f32.mrf.mxu1  ;;  %v2433_v42 = vadd.f32 %v6095_v2, %v6094_v17 }
 0x522   :  { %v2677_v49 = vadd.f32 %v3782_v60, %v2417_v16  ;;  %2986 = vmatmul.mubr.bf16.gmra.mxu0 %v2769_v40  ;;  %v2747_v45 = vmax.f32 %v2715_v51, 0.0 }
 0x523   :  { %v3784_v25 = vpop.f32.mrf.mxu1  ;;  %2995 = vmatprep.mubr.bf16.mxu0 %v6057_v32 }
 0x524   :  { %v2716_v26 = vadd.f32 %v5553_v55, %v2677_v49  ;;  %v3785_v15 = vadd.f32 %v3784_v25, %v3783_v52  ;;  %v6096_v49 = vld [vmem:[#allocation50_spill] sm:$0xff]  ;;  %v6097_v25 = vld [vmem:[#allocation63_spill] sm:$0xff] }
 0x525   :  { %v3786_v34 = vpop.f32.mrf.mxu1  ;;  %v2437_v58 = vadd.f32 %v6097_v25, %v6096_v49 }
 0x526   :  { %v2748_v63 = vmax.f32 %v2716_v26, 0.0  ;;  %v2678_v50 = vadd.f32 %v3785_v15, %v2423_v30 }
 0x527   :  { %v3787_v35 = vpop.f32.mrf.mxu1 }
 0x528   :  { %v2770_v48 = vpack.c.bf16 %v2748_v63, %v2747_v45  ;;  %v3788_v9 = vadd.f32 %v3787_v35, %v3786_v34  ;;  %v2717_v1 = vadd.f32 %v5553_v55, %v2678_v50  ;;  %v6098_v63 = vld [vmem:[#allocation53_spill] sm:$0xff]  ;;  %v6099_v50 = vld [vmem:[#allocation64_spill] sm:$0xff] }
 0x529   :  { %v3789_v62 = vpop.f32.mrf.mxu1  ;;  %v2443_v35 = vadd.f32 %v6099_v50, %v6098_v63 }
 0x52a   :  { %v2679_v44 = vadd.f32 %v3788_v9, %v2427_v7  ;;  %2996 = vmatmul.mubr.bf16.gmra.mxu0 %v2770_v48  ;;  %v2749_v40 = vmax.f32 %v2717_v1, 0.0 }
 0x52b   :  { %v3790_v39 = vpop.f32.mrf.mxu1  ;;  %3005 = vmatprep.mubr.bf16.mxu0 %v6057_v32 }
 0x52c   :  { %v2718_v47 = vadd.f32 %v5553_v55, %v2679_v44  ;;  %v3791_v33 = vadd.f32 %v3790_v39, %v3789_v62  ;;  %v6100_v44 = vld [vmem:[#allocation56_spill] sm:$0xff]  ;;  %v6101_v39 = vld [vmem:[#allocation66_spill] sm:$0xff] }
 0x52d   :  { %v3792_v16 = vpop.f32.mrf.mxu1  ;;  %v2447_v17 = vadd.f32 %v6101_v39, %v6100_v44 }
 0x52e   :  { %v2750_v60 = vmax.f32 %v2718_v47, 0.0  ;;  %v2680_v52 = vadd.f32 %v3791_v33, %v2433_v42 }
 0x52f   :  { %v3793_v51 = vpop.f32.mrf.mxu1 }
 0x530   :  { %v2771_v21 = vpack.c.bf16 %v2750_v60, %v2749_v40  ;;  %v3794_v30 = vadd.f32 %v3793_v51, %v3792_v16  ;;  %v2719_v15 = vadd.f32 %v5553_v55, %v2680_v52  ;;  %v6102_v60 = vld [vmem:[#allocation59_spill] sm:$0xff] }
 0x531   :  { %v3795_v26 = vpop.f32.mrf.mxu1  ;;  %v6103_v52 = vld [vmem:[#allocation67_spill] sm:$0xff] }
 0x532   :  { %v2681_v34 = vadd.f32 %v3794_v30, %v2437_v58  ;;  %3006 = vmatmul.mubr.bf16.gmra.mxu0 %v2771_v21  ;;  %v2751_v48 = vmax.f32 %v2719_v15, 0.0  ;;  %v2453_v51 = vadd.f32 %v6103_v52, %v6102_v60 }
 0x533   :  { %v3796_v45 = vpop.f32.mrf.mxu1  ;;  %3015 = vmatprep.mubr.bf16.mxu0 %v6057_v32 }
 0x534   :  { %v2720_v56 = vadd.f32 %v5553_v55, %v2681_v34  ;;  %v3797_v10 = vadd.f32 %v3796_v45, %v3795_v26  ;;  %v6104_v34 = vld [vmem:[#allocation62_spill] sm:$0xff]  ;;  %v6105_v45 = vld [vmem:[#allocation69_spill] sm:$0xff] }
 0x535   :  { %v3798_v7 = vpop.f32.mrf.mxu1  ;;  %v2457_v63 = vadd.f32 %v6105_v45, %v6104_v34 }
 0x536   :  { %v2752_v9 = vmax.f32 %v2720_v56, 0.0  ;;  %v2682_v62 = vadd.f32 %v3797_v10, %v2443_v35 }
 0x537   :  { %v3799_v1 = vpop.f32.mrf.mxu1 }
 0x538   :  { %v2772_v2 = vpack.c.bf16 %v2752_v9, %v2751_v48  ;;  %v3800_v42 = vadd.f32 %v3799_v1, %v3798_v7  ;;  %v2721_v33 = vadd.f32 %v5553_v55, %v2682_v62  ;;  %v6106_v9 = vld [vmem:[#allocation65_spill] sm:$0xff]  ;;  %v6107_v62 = vld [vmem:[#allocation70_spill] sm:$0xff] }
 0x539   :  { %v3801_v47 = vpop.f32.mrf.mxu1  ;;  %v2463_v1 = vadd.f32 %v6107_v62, %v6106_v9 }
 0x53a   :  { %v2683_v16 = vadd.f32 %v3800_v42, %v2447_v17  ;;  %3016 = vmatmul.mubr.bf16.gmra.mxu0 %v2772_v2  ;;  %v2753_v21 = vmax.f32 %v2721_v33, 0.0 }
 0x53b   :  { %v3802_v40 = vpop.f32.mrf.mxu1  ;;  %3025 = vmatprep.mubr.bf16.mxu0 %v6057_v32 }
 0x53c   :  { %v2722_v49 = vadd.f32 %v5553_v55, %v2683_v16  ;;  %v3803_v25 = vadd.f32 %v3802_v40, %v3801_v47  ;;  %v6108_v16 = vld [vmem:[#allocation68_spill] sm:$0xff] }
 0x53d   :  { %v3804_v58 = vpop.f32.mrf.mxu1  ;;  %v6109_v40 = vld [vmem:[#allocation72_spill] sm:$0xff] }
 0x53e   :  { %v2754_v30 = vmax.f32 %v2722_v49, 0.0  ;;  %v2684_v26 = vadd.f32 %v3803_v25, %v2453_v51  ;;  %v2467_v60 = vadd.f32 %v6109_v40, %v6108_v16 }
 0x53f   :  { %v3805_v15 = vpop.f32.mrf.mxu1 }
 0x540   :  { %v2773_v50 = vpack.c.bf16 %v2754_v30, %v2753_v21  ;;  %v3806_v35 = vadd.f32 %v3805_v15, %v3804_v58  ;;  %v2723_v10 = vadd.f32 %v5553_v55, %v2684_v26  ;;  %v6110_v30 = vld [vmem:[#allocation71_spill] sm:$0xff]  ;;  %v6111_v26 = vld [vmem:[#allocation73_spill] sm:$0xff] }
 0x541   :  { %v3807_v56 = vpop.f32.mrf.mxu1  ;;  %v2473_v15 = vadd.f32 %v6111_v26, %v6110_v30 }
 0x542   :  { %v2685_v7 = vadd.f32 %v3806_v35, %v2457_v63  ;;  %3026 = vmatmul.mubr.bf16.gmra.mxu0 %v2773_v50  ;;  %v2755_v2 = vmax.f32 %v2723_v10, 0.0 }
 0x543   :  { %v3808_v48 = vpop.f32.mrf.mxu1  ;;  %3035 = vmatprep.mubr.bf16.mxu0 %v6057_v32 }
 0x544   :  { %v2724_v44 = vadd.f32 %v5553_v55, %v2685_v7  ;;  %v3809_v39 = vadd.f32 %v3808_v48, %v3807_v56  ;;  %v6112_v7 = vld [vmem:[#allocation74_spill] sm:$0xff]  ;;  %v6113_v48 = vld [vmem:[#allocation75_spill] sm:$0xff] }
 0x545   :  { %v3810_v17 = vpop.f32.mrf.mxu1  ;;  %v2477_v9 = vadd.f32 %v6113_v48, %v6112_v7 }
 0x546   :  { %v2756_v42 = vmax.f32 %v2724_v44, 0.0  ;;  %v2686_v47 = vadd.f32 %v3809_v39, %v2463_v1 }
 0x547   :  { %v3811_v33 = vpop.f32.mrf.mxu1 }
 0x548   :  { %v2774_v52 = vpack.c.bf16 %v2756_v42, %v2755_v2  ;;  %v3812_v51 = vadd.f32 %v3811_v33, %v3810_v17  ;;  %v2725_v25 = vadd.f32 %v5553_v55, %v2686_v47 }
 0x549   :  { %v3813_v49 = vpop.f32.mrf.mxu1 }
 0x54a   :  { %v2687_v58 = vadd.f32 %v3812_v51, %v2467_v60  ;;  %3036 = vmatmul.mubr.bf16.gmra.mxu0 %v2774_v52  ;;  %v2757_v50 = vmax.f32 %v2725_v25, 0.0 }
 0x54b   :  { %v3814_v21 = vpop.f32.mrf.mxu1  ;;  %3045 = vmatprep.mubr.bf16.mxu0 %v6057_v32 }
 0x54c   :  { %v2726_v34 = vadd.f32 %v5553_v55, %v2687_v58  ;;  %v3815_v45 = vadd.f32 %v3814_v21, %v3813_v49 }
 0x54d   :  { %v3816_v63 = vpop.f32.mrf.mxu1 }
 0x54e   :  { %v2758_v35 = vmax.f32 %v2726_v34, 0.0  ;;  %v2688_v56 = vadd.f32 %v3815_v45, %v2473_v15 }
 0x54f   :  { %v3817_v10 = vpop.f32.mrf.mxu1 }
 0x550   :  { %v2775_v62 = vpack.c.bf16 %v2758_v35, %v2757_v50  ;;  %v3818_v1 = vadd.f32 %v3817_v10, %v3816_v63  ;;  %v2727_v44 = vadd.f32 %v5553_v55, %v2688_v56 }
 0x552   :  { %v2689_v39 = vadd.f32 %v3818_v1, %v2477_v9  ;;  %3046 = vmatmul.mubr.bf16.gmra.mxu0 %v2775_v62  ;;  %v2759_v2 = vmax.f32 %v2727_v44, 0.0 }
 0x553   :  { %3055 = vmatprep.mubr.bf16.mxu0 %v6057_v32 }
 0x554   :  { %v2728_v17 = vadd.f32 %v5553_v55, %v2689_v39 }
 0x556   :  { %v2760_v42 = vmax.f32 %v2728_v17, 0.0 }
 0x558   :  { %v2776_v47 = vpack.c.bf16 %v2760_v42, %v2759_v2 }
 0x55a   :  { %3056 = vmatmul.mubr.bf16.gmra.mxu0 %v2776_v47 }
 0x5a2   :  { %v5664_v33 = vpop.f32.mrf.mxu0 }
 0x5a3   :  { %6114 = vst [vmem:[#allocation12_spill] sm:$0xff] %v5664_v33 }
 0x5a4   :  { %v5666_v16 = vpop.f32.mrf.mxu0 }
 0x5a6   :  { %v5668_v40 = vpop.f32.mrf.mxu0 }
 0x5a7   :  { %6115 = vst [vmem:[#allocation28_spill] sm:$0xff] %v5668_v40 }
 0x5a8   :  { %v5670_v60 = vpop.f32.mrf.mxu0 }
 0x5aa   :  { %v5674_v51 = vpop.f32.mrf.mxu0 }
 0x5ab   :  { %6116 = vst [vmem:[#allocation13_spill] sm:$0xff] %v5674_v51 }
 0x5ac   :  { %v5676_v32 = vpop.f32.mrf.mxu0 }
 0x5ae   :  { %v5678_v55 = vpop.f32.mrf.mxu0 }
 0x5af   :  { %6117 = vst [vmem:[#allocation30_spill] sm:$0xff] %v5678_v55 }
 0x5b0   :  { %v5680_v49 = vpop.f32.mrf.mxu0 }
 0x5b2   :  { %v5684_v58 = vpop.f32.mrf.mxu0 }
 0x5b3   :  { %6118 = vst [vmem:[#allocation14_spill] sm:$0xff] %v5684_v58 }
 0x5b4   :  { %v5686_v21 = vpop.f32.mrf.mxu0 }
 0x5b6   :  { %v5688_v30 = vpop.f32.mrf.mxu0 }
 0x5b7   :  { %6119 = vst [vmem:[#allocation31_spill] sm:$0xff] %v5688_v30 }
 0x5b8   :  { %v5690_v26 = vpop.f32.mrf.mxu0 }
 0x5ba   :  { %v5694_v34 = vpop.f32.mrf.mxu0 }
 0x5bb   :  { %6120 = vst [vmem:[#allocation15_spill] sm:$0xff] %v5694_v34 }
 0x5bc   :  { %v5696_v45 = vpop.f32.mrf.mxu0 }
 0x5be   :  { %v5698_v63 = vpop.f32.mrf.mxu0 }
 0x5bf   :  { %6121 = vst [vmem:[#allocation33_spill] sm:$0xff] %v5698_v63 }
 0x5c0   :  { %v5700_v50 = vpop.f32.mrf.mxu0 }
 0x5c2   :  { %v5704_v56 = vpop.f32.mrf.mxu0 }
 0x5c3   :  { %6122 = vst [vmem:[#allocation16_spill] sm:$0xff] %v5704_v56 }
 0x5c4   :  { %v5706_v10 = vpop.f32.mrf.mxu0 }
 0x5c6   :  { %v5708_v7 = vpop.f32.mrf.mxu0 }
 0x5c7   :  { %6123 = vst [vmem:[#allocation34_spill] sm:$0xff] %v5708_v7 }
 0x5c8   :  { %v5710_v48 = vpop.f32.mrf.mxu0 }
 0x5c9   :  { %v3070_v9 = vpack.c.bf16 %v5710_v48, %v5706_v10 }
 0x5ca   :  { %v5714_v62 = vpop.f32.mrf.mxu0 }
 0x5cb   :  { %6124 = vst [vmem:[#allocation17_spill] sm:$0xff] %v5714_v62 }
 0x5cc   :  { %v2959_v1 = vpop.f32.mrf.mxu0 }
 0x5ce   :  { %v5716_v44 = vpop.f32.mrf.mxu0 }
 0x5cf   :  { %6125 = vst [vmem:[#allocation36_spill] sm:$0xff] %v5716_v44 }
 0x5d0   :  { %v2963_v39 = vpop.f32.mrf.mxu0 }
 0x5d1   :  { %v3071_v17 = vpack.c.bf16 %v2963_v39, %v2959_v1 }
 0x5d2   :  { %v5718_v2 = vpop.f32.mrf.mxu0 }
 0x5d3   :  { %6126 = vst [vmem:[#allocation18_spill] sm:$0xff] %v5718_v2 }
 0x5d4   :  { %v2969_v42 = vpop.f32.mrf.mxu0 }
 0x5d6   :  { %v5720_v47 = vpop.f32.mrf.mxu0 }
 0x5d7   :  { %6127 = vst [vmem:[#allocation37_spill] sm:$0xff] %v5720_v47 }
 0x5d8   :  { %v2973_v52 = vpop.f32.mrf.mxu0 }
 0x5d9   :  { %v3072_v25 = vpack.c.bf16 %v2973_v52, %v2969_v42 }
 0x5da   :  { %v5722_v15 = vpop.f32.mrf.mxu0 }
 0x5db   :  { %6128 = vst [vmem:[#allocation19_spill] sm:$0xff] %v5722_v15 }
 0x5dc   :  { %v2979_v35 = vpop.f32.mrf.mxu0 }
 0x5de   :  { %v5724_v7 = vpop.f32.mrf.mxu0 }
 0x5df   :  { %6129 = vst [vmem:[#allocation39_spill] sm:$0xff] %v5724_v7 }
 0x5e0   :  { %v2983_v10 = vpop.f32.mrf.mxu0 }
 0x5e1   :  { %v3073_v48 = vpack.c.bf16 %v2983_v10, %v2979_v35 }
 0x5e2   :  { %v5726_v62 = vpop.f32.mrf.mxu0 }
 0x5e3   :  { %6130 = vst [vmem:[#allocation20_spill] sm:$0xff] %v5726_v62 }
 0x5e4   :  { %v2989_v56 = vpop.f32.mrf.mxu0 }
 0x5e6   :  { %v5728_v44 = vpop.f32.mrf.mxu0 }
 0x5e7   :  { %6131 = vst [vmem:[#allocation40_spill] sm:$0xff] %v5728_v44 }
 0x5e8   :  { %v2993_v1 = vpop.f32.mrf.mxu0 }
 0x5e9   :  { %v3074_v39 = vpack.c.bf16 %v2993_v1, %v2989_v56 }
 0x5ea   :  { %v5730_v2 = vpop.f32.mrf.mxu0 }
 0x5eb   :  { %6132 = vst [vmem:[#allocation21_spill] sm:$0xff] %v5730_v2 }
 0x5ec   :  { %v2999_v63 = vpop.f32.mrf.mxu0 }
 0x5ee   :  { %v5732_v47 = vpop.f32.mrf.mxu0 }
 0x5ef   :  { %6133 = vst [vmem:[#allocation42_spill] sm:$0xff] %v5732_v47 }
 0x5f0   :  { %v3003_v52 = vpop.f32.mrf.mxu0 }
 0x5f1   :  { %v3075_v42 = vpack.c.bf16 %v3003_v52, %v2999_v63 }
 0x5f2   :  { %v5734_v15 = vpop.f32.mrf.mxu0 }
 0x5f3   :  { %6134 = vst [vmem:[#allocation22_spill] sm:$0xff] %v5734_v15 }
 0x5f4   :  { %v3009_v34 = vpop.f32.mrf.mxu0 }
 0x5f6   :  { %v5736_v7 = vpop.f32.mrf.mxu0 }
 0x5f7   :  { %6135 = vst [vmem:[#allocation43_spill] sm:$0xff] %v5736_v7 }
 0x5f8   :  { %v3013_v35 = vpop.f32.mrf.mxu0 }
 0x5fa   :  { %v5738_v10 = vpop.f32.mrf.mxu0 }
 0x5fb   :  { %6136 = vst [vmem:[#allocation23_spill] sm:$0xff] %v5738_v10 }
 0x5fc   :  { %v3019_v62 = vpop.f32.mrf.mxu0 }
 0x5fe   :  { %v5740_v30 = vpop.f32.mrf.mxu0 }
 0x5ff   :  { %6137 = vst [vmem:[#allocation45_spill] sm:$0xff] %v5740_v30 }
 0x600   :  { %v3023_v44 = vpop.f32.mrf.mxu0 }
 0x602   :  { %v5742_v56 = vpop.f32.mrf.mxu0 }
 0x603   :  { %6138 = vst [vmem:[#allocation24_spill] sm:$0xff] %v5742_v56 }
 0x604   :  { %v3029_v1 = vpop.f32.mrf.mxu0 }
 0x606   :  { %v5744_v2 = vpop.f32.mrf.mxu0 }
 0x607   :  { %6139 = vst [vmem:[#allocation46_spill] sm:$0xff] %v5744_v2 }
 0x608   :  { %v3033_v47 = vpop.f32.mrf.mxu0 }
 0x60a   :  { %v5746_v58 = vpop.f32.mrf.mxu0 }
 0x60b   :  { %6140 = vst [vmem:[#allocation25_spill] sm:$0xff] %v5746_v58 }
 0x60c   :  { %v3039_v63 = vpop.f32.mrf.mxu0 }
 0x60e   :  { %v5748_v52 = vpop.f32.mrf.mxu0 }
 0x60f   :  { %6141 = vst [vmem:[#allocation48_spill] sm:$0xff] %v5748_v52  ;;  %v3078_v52 = vpack.c.bf16 %v3033_v47, %v3029_v1 }
 0x610   :  { %v3043_v15 = vpop.f32.mrf.mxu0 }
 0x611   :  { %v3079_v58 = vpack.c.bf16 %v3043_v15, %v3039_v63 }
 0x612   :  { %v5750_v7 = vpop.f32.mrf.mxu0 }
 0x613   :  { %6142 = vst [vmem:[#allocation26_spill] sm:$0xff] %v5750_v7  ;;  %v3077_v7 = vpack.c.bf16 %v3023_v44, %v3019_v62  ;;  %v6157_v44 = vld [vmem:[#allocation33_spill] sm:$0xff] }
 0x614   :  { %v3049_v55 = vpop.f32.mrf.mxu0 }
 0x616   :  { %v5752_v10 = vpop.f32.mrf.mxu0 }
 0x617   :  { %6143 = vst [vmem:[#allocation49_spill] sm:$0xff] %v5752_v10  ;;  %v3076_v10 = vpack.c.bf16 %v3013_v35, %v3009_v34  ;;  %v6156_v34 = vld [vmem:[#allocation15_spill] sm:$0xff] }
 0x618   :  { %v3053_v51 = vpop.f32.mrf.mxu0 }
 0x619   :  { %v3080_v19 = vpack.c.bf16 %v3053_v51, %v3049_v55 }
 0x61a   :  { %v5754_v30 = vpop.f32.mrf.mxu0 }
 0x61b   :  { %6144 = vst [vmem:[#allocation27_spill] sm:$0xff] %v5754_v30  ;;  %v6145_v30 = vpack.c.bf16 %v5700_v50, %v5696_v45 }
 0x61c   :  { %v3059_v40 = vpop.f32.mrf.mxu0 }
 0x61e   :  { %v5756_v56 = vpop.f32.mrf.mxu0 }
 0x620   :  { %v3063_v33 = vpop.f32.mrf.mxu0 }
 0x621   :  { %v3081_v2 = vpack.c.bf16 %v3063_v33, %v3059_v40  ;;  %v6146_v33 = vpack.c.bf16 %v5690_v26, %v5686_v21  ;;  %v6148_v40 = vpack.c.bf16 %v5670_v60, %v5666_v16  ;;  %v6154_v16 = vld [vmem:[#allocation14_spill] sm:$0xff] }
 0x623   :  { %3819 = vmatprep.subr.bf16.mxu1 %v3081_v2 }
 0x624   :  { %3820 = vmatpush3.bf16.msra.mxu1 %v3073_v48 }
 0x625   :  { %3821 = vmatprep.subr.bf16.mxu1 %v3080_v19  ;;  %v6147_v19 = vpack.c.bf16 %v5680_v49, %v5676_v32 }
 0x628   :  { %3822 = vmatpush3.bf16.msra.mxu1 %v3072_v25  ;;  %v6155_v25 = vld [vmem:[#allocation31_spill] sm:$0xff] }
 0x629   :  { %3823 = vmatprep.subr.bf16.mxu1 %v3079_v58 }
 0x62c   :  { %3824 = vmatpush3.bf16.msra.mxu1 %v3071_v17 }
 0x62d   :  { %3825 = vmatprep.subr.bf16.mxu1 %v3078_v52 }
 0x630   :  { %3826 = vmatpush3.bf16.msra.mxu1 %v3070_v9 }
 0x631   :  { %3827 = vmatprep.subr.bf16.mxu1 %v3077_v7 }
 0x634   :  { %3828 = vmatpush3.bf16.msra.mxu1 %v6145_v30 }
 0x635   :  { %3829 = vmatprep.subr.bf16.mxu1 %v3076_v10 }
 0x638   :  { %3830 = vmatpush3.bf16.msra.mxu1 %v6146_v33  ;;  %v6159_v33 = vld [vmem:[#allocation34_spill] sm:$0xff] }
 0x639   :  { %3831 = vmatprep.subr.bf16.mxu1 %v3075_v42  ;;  %v6158_v42 = vld [vmem:[#allocation16_spill] sm:$0xff] }
 0x63c   :  { %3832 = vmatpush3.bf16.msra.mxu1 %v6147_v19 }
 0x63d   :  { %3833 = vmatprep.subr.bf16.mxu1 %v3074_v39 }
 0x640   :  { %3834 = vmatpush3.bf16.msra.mxu1 %v6148_v40 }
 0x643   :  { %3115 = vmatmul.mubr.bf16.vlgmr.msra.gmra.mxu1 %v5424_v41  ;;  %v6149_v41 = vld [vmem:[#allocation76_spill] sm:$0xff] }
 0x644   :  { %3122 = vmatprep.mubr.bf16.mxu1 %v5430_v14 }
 0x64b   :  { %3123 = vmatmul.mubr.bf16.gmra.mxu1 %v5436_v53 }
 0x64c   :  { %3130 = vmatprep.mubr.bf16.mxu1 %v5439_v0 }
 0x653   :  { %3131 = vmatmul.mubr.bf16.gmra.mxu1 %v5442_v5  ;;  %v5804_v5 = vld [vmem:[%s5974_s8] ss:$0 sm:$0xff] }
 0x654   :  { %3138 = vmatprep.mubr.bf16.mxu1 %v5445_v54 }
 0x65b   :  { %3139 = vmatmul.mubr.bf16.gmra.mxu1 %v5448_v37  ;;  %v6150_v37 = vld [vmem:[#allocation12_spill] sm:$0xff] }
 0x65c   :  { %3146 = vmatprep.mubr.bf16.mxu1 %v5451_v24 }
 0x663   :  { %3147 = vmatmul.mubr.bf16.gmra.mxu1 %v5454_v4 }
 0x664   :  { %3154 = vmatprep.mubr.bf16.mxu1 %v5457_v59 }
 0x66b   :  { %3155 = vmatmul.mubr.bf16.gmra.mxu1 %v5460_v28 }
 0x66c   :  { %3162 = vmatprep.mubr.bf16.mxu1 %v5463_v11 }
 0x673   :  { %3163 = vmatmul.mubr.bf16.gmra.mxu1 %v5466_v29  ;;  %v6151_v29 = vld [vmem:[#allocation28_spill] sm:$0xff] }
 0x674   :  { %3170 = vmatprep.mubr.bf16.mxu1 %v5469_v3 }
 0x67b   :  { %3171 = vmatmul.mubr.bf16.gmra.mxu1 %v5472_v36 }
 0x67c   :  { %3178 = vmatprep.mubr.bf16.mxu1 %v5475_v31 }
 0x683   :  { %3179 = vmatmul.mubr.bf16.gmra.mxu1 %v5481_v27 }
 0x684   :  { %3186 = vmatprep.mubr.bf16.mxu1 %v5487_v8 }
 0x68b   :  { %3187 = vmatmul.mubr.bf16.gmra.mxu1 %v5499_v43  ;;  %v6152_v43 = vld [vmem:[#allocation13_spill] sm:$0xff] }
 0x68c   :  { %3194 = vmatprep.mubr.bf16.mxu1 %v5505_v6 }
 0x693   :  { %3195 = vmatmul.mubr.bf16.gmra.mxu1 %v5514_v22 }
 0x694   :  { %3202 = vmatprep.mubr.bf16.mxu1 %v5517_v18 }
 0x69b   :  { %3203 = vmatmul.mubr.bf16.gmra.mxu1 %v5520_v12 }
 0x69c   :  { %3210 = vmatprep.mubr.bf16.mxu1 %v5523_v13 }
 0x6a3   :  { %3211 = vmatmul.mubr.bf16.gmra.mxu1 %v5526_v61  ;;  %v6153_v61 = vld [vmem:[#allocation30_spill] sm:$0xff] }
 0x6a4   :  { %3218 = vmatprep.mubr.bf16.mxu1 %v5529_v57 }
 0x6ab   :  { %3219 = vmatmul.mubr.bf16.gmra.mxu1 %v5532_v46 }
 0x6ac   :  { %3226 = vmatprep.mubr.bf16.mxu1 %v5535_v38 }
 0x6b3   :  { %3227 = vmatmul.mubr.bf16.gmra.mxu1 %v5538_v20 }
 0x6b4   :  { %3234 = vmatprep.mubr.bf16.mxu1 %v5541_v23 }
 0x6bb   :  { %3235 = vmatmul.mubr.bf16.gmra.mxu1 %v6149_v41 }
 0x703   :  { %v3835_v14 = vpop.f32.mrf.mxu1 }
 0x705   :  { %v3836_v53 = vpop.f32.mrf.mxu1 }
 0x706   :  { %v3837_v0 = vadd.f32 %v3836_v53, %v3835_v14 }
 0x707   :  { %v3838_v54 = vpop.f32.mrf.mxu1 }
 0x708   :  { %v3243_v24 = vadd.f32 %v3837_v0, %v6150_v37  ;;  %v6160_v0 = vld [vmem:[#allocation17_spill] sm:$0xff] }
 0x709   :  { %v3839_v4 = vpop.f32.mrf.mxu1 }
 0x70a   :  { %v3282_v59 = vadd.f32 %v5804_v5, %v3243_v24  ;;  %v3840_v28 = vadd.f32 %v3839_v4, %v3838_v54 }
 0x70b   :  { %v3841_v11 = vpop.f32.mrf.mxu1 }
 0x70c   :  { %3314 = vst [vmem:[%s5975_s9] sm:$0xff] %v3282_v59  ;;  %v3244_v3 = vadd.f32 %v3840_v28, %v6151_v29  ;;  %v6161_v28 = vld [vmem:[#allocation36_spill] sm:$0xff] }
 0x70d   :  { %v3842_v36 = vpop.f32.mrf.mxu1 }
 0x70e   :  { %v3283_v31 = vadd.f32 %v5804_v5, %v3244_v3  ;;  %v3843_v27 = vadd.f32 %v3842_v36, %v3841_v11 }
 0x70f   :  { %v3844_v8 = vpop.f32.mrf.mxu1 }
 0x710   :  { %3315 = vst [vmem:[%s5975_s9 + $0x8] sm:$0xff] %v3283_v31  ;;  %v3245_v6 = vadd.f32 %v3843_v27, %v6152_v43  ;;  %v6162_v27 = vld [vmem:[#allocation18_spill] sm:$0xff] }
 0x711   :  { %v3845_v22 = vpop.f32.mrf.mxu1 }
 0x712   :  { %v3284_v18 = vadd.f32 %v5804_v5, %v3245_v6  ;;  %v3846_v12 = vadd.f32 %v3845_v22, %v3844_v8 }
 0x713   :  { %v3847_v13 = vpop.f32.mrf.mxu1 }
 0x714   :  { %3316 = vst [vmem:[%s5975_s9 + $0x10] sm:$0xff] %v3284_v18  ;;  %v3246_v57 = vadd.f32 %v3846_v12, %v6153_v61  ;;  %v6163_v12 = vld [vmem:[#allocation37_spill] sm:$0xff] }
 0x715   :  { %v3848_v46 = vpop.f32.mrf.mxu1 }
 0x716   :  { %v3285_v38 = vadd.f32 %v5804_v5, %v3246_v57  ;;  %v3849_v20 = vadd.f32 %v3848_v46, %v3847_v13 }
 0x717   :  { %v3850_v23 = vpop.f32.mrf.mxu1 }
 0x718   :  { %3317 = vst [vmem:[%s5975_s9 + $0x18] sm:$0xff] %v3285_v38  ;;  %v3247_v60 = vadd.f32 %v3849_v20, %v6154_v16  ;;  %v6164_v20 = vld [vmem:[#allocation19_spill] sm:$0xff] }
 0x719   :  { %v3851_v51 = vpop.f32.mrf.mxu1 }
 0x71a   :  { %v3286_v32 = vadd.f32 %v5804_v5, %v3247_v60  ;;  %v3852_v55 = vadd.f32 %v3851_v51, %v3850_v23 }
 0x71b   :  { %v3853_v49 = vpop.f32.mrf.mxu1 }
 0x71c   :  { %3318 = vst [vmem:[%s5975_s9 + $0x20] sm:$0xff] %v3286_v32  ;;  %v3248_v58 = vadd.f32 %v3852_v55, %v6155_v25  ;;  %v6165_v55 = vld [vmem:[#allocation39_spill] sm:$0xff] }
 0x71d   :  { %v3854_v21 = vpop.f32.mrf.mxu1 }
 0x71e   :  { %v3287_v30 = vadd.f32 %v5804_v5, %v3248_v58  ;;  %v3855_v26 = vadd.f32 %v3854_v21, %v3853_v49 }
 0x71f   :  { %v3856_v15 = vpop.f32.mrf.mxu1 }
 0x720   :  { %3319 = vst [vmem:[%s5975_s9 + $0x28] sm:$0xff] %v3287_v30  ;;  %v3249_v45 = vadd.f32 %v3855_v26, %v6156_v34  ;;  %v6166_v26 = vld [vmem:[#allocation20_spill] sm:$0xff] }
 0x721   :  { %v3857_v50 = vpop.f32.mrf.mxu1 }
 0x722   :  { %v3288_v7 = vadd.f32 %v5804_v5, %v3249_v45  ;;  %v3858_v9 = vadd.f32 %v3857_v50, %v3856_v15 }
 0x723   :  { %v3859_v62 = vpop.f32.mrf.mxu1 }
 0x724   :  { %3320 = vst [vmem:[%s5975_s9 + $0x30] sm:$0xff] %v3288_v7  ;;  %v3250_v17 = vadd.f32 %v3858_v9, %v6157_v44  ;;  %v6167_v9 = vld [vmem:[#allocation40_spill] sm:$0xff] }
 0x725   :  { %v3860_v2 = vpop.f32.mrf.mxu1 }
 0x726   :  { %v3289_v47 = vadd.f32 %v5804_v5, %v3250_v17  ;;  %v3861_v48 = vadd.f32 %v3860_v2, %v3859_v62 }
 0x727   :  { %v3862_v39 = vpop.f32.mrf.mxu1 }
 0x728   :  { %3321 = vst [vmem:[%s5975_s9 + $0x38] sm:$0xff] %v3289_v47  ;;  %v3251_v35 = vadd.f32 %v3861_v48, %v6158_v42  ;;  %v6168_v48 = vld [vmem:[#allocation21_spill] sm:$0xff] }
 0x729   :  { %v3863_v10 = vpop.f32.mrf.mxu1 }
 0x72a   :  { %v3290_v1 = vadd.f32 %v5804_v5, %v3251_v35  ;;  %v3864_v63 = vadd.f32 %v3863_v10, %v3862_v39 }
 0x72b   :  { %v3865_v52 = vpop.f32.mrf.mxu1 }
 0x72c   :  { %3322 = vst [vmem:[%s5975_s9 + $0x40] sm:$0xff] %v3290_v1  ;;  %v3252_v19 = vadd.f32 %v3864_v63, %v6159_v33  ;;  %v6169_v63 = vld [vmem:[#allocation42_spill] sm:$0xff] }
 0x72d   :  { %v3866_v40 = vpop.f32.mrf.mxu1 }
 0x72e   :  { %v3291_v41 = vadd.f32 %v5804_v5, %v3252_v19  ;;  %v3867_v14 = vadd.f32 %v3866_v40, %v3865_v52 }
 0x72f   :  { %v3868_v53 = vpop.f32.mrf.mxu1 }
 0x730   :  { %3323 = vst [vmem:[%s5975_s9 + $0x48] sm:$0xff] %v3291_v41  ;;  %v3253_v54 = vadd.f32 %v3867_v14, %v6160_v0  ;;  %v6170_v14 = vld [vmem:[#allocation22_spill] sm:$0xff] }
 0x731   :  { %v3869_v37 = vpop.f32.mrf.mxu1 }
 0x732   :  { %v3292_v24 = vadd.f32 %v5804_v5, %v3253_v54  ;;  %v3870_v4 = vadd.f32 %v3869_v37, %v3868_v53 }
 0x733   :  { %v3871_v59 = vpop.f32.mrf.mxu1 }
 0x734   :  { %3324 = vst [vmem:[%s5975_s9 + $0x50] sm:$0xff] %v3292_v24  ;;  %v3254_v11 = vadd.f32 %v3870_v4, %v6161_v28  ;;  %v6171_v4 = vld [vmem:[#allocation43_spill] sm:$0xff] }
 0x735   :  { %v3872_v29 = vpop.f32.mrf.mxu1 }
 0x736   :  { %v3293_v3 = vadd.f32 %v5804_v5, %v3254_v11  ;;  %v3873_v36 = vadd.f32 %v3872_v29, %v3871_v59 }
 0x737   :  { %v3874_v31 = vpop.f32.mrf.mxu1 }
 0x738   :  { %3325 = vst [vmem:[%s5975_s9 + $0x58] sm:$0xff] %v3293_v3  ;;  %v3255_v8 = vadd.f32 %v3873_v36, %v6162_v27  ;;  %v6172_v36 = vld [vmem:[#allocation23_spill] sm:$0xff] }
 0x739   :  { %v3875_v43 = vpop.f32.mrf.mxu1 }
 0x73a   :  { %v3294_v6 = vadd.f32 %v5804_v5, %v3255_v8  ;;  %v3876_v22 = vadd.f32 %v3875_v43, %v3874_v31 }
 0x73b   :  { %v3877_v18 = vpop.f32.mrf.mxu1 }
 0x73c   :  { %3326 = vst [vmem:[%s5975_s9 + $0x60] sm:$0xff] %v3294_v6  ;;  %v3256_v13 = vadd.f32 %v3876_v22, %v6163_v12  ;;  %v6173_v22 = vld [vmem:[#allocation45_spill] sm:$0xff] }
 0x73d   :  { %v3878_v61 = vpop.f32.mrf.mxu1 }
 0x73e   :  { %v3295_v57 = vadd.f32 %v5804_v5, %v3256_v13  ;;  %v3879_v46 = vadd.f32 %v3878_v61, %v3877_v18 }
 0x73f   :  { %v3880_v38 = vpop.f32.mrf.mxu1 }
 0x740   :  { %3327 = vst [vmem:[%s5975_s9 + $0x68] sm:$0xff] %v3295_v57  ;;  %v3257_v23 = vadd.f32 %v3879_v46, %v6164_v20  ;;  %v6174_v46 = vld [vmem:[#allocation24_spill] sm:$0xff] }
 0x741   :  { %v3881_v16 = vpop.f32.mrf.mxu1 }
 0x742   :  { %v3296_v60 = vadd.f32 %v5804_v5, %v3257_v23  ;;  %v3882_v51 = vadd.f32 %v3881_v16, %v3880_v38 }
 0x743   :  { %v3883_v32 = vpop.f32.mrf.mxu1 }
 0x744   :  { %3328 = vst [vmem:[%s5975_s9 + $0x70] sm:$0xff] %v3296_v60  ;;  %v3258_v49 = vadd.f32 %v3882_v51, %v6165_v55  ;;  %v6175_v51 = vld [vmem:[#allocation46_spill] sm:$0xff] }
 0x745   :  { %v3884_v25 = vpop.f32.mrf.mxu1 }
 0x746   :  { %v3297_v58 = vadd.f32 %v5804_v5, %v3258_v49  ;;  %v3885_v21 = vadd.f32 %v3884_v25, %v3883_v32 }
 0x747   :  { %v3886_v30 = vpop.f32.mrf.mxu1 }
 0x748   :  { %3329 = vst [vmem:[%s5975_s9 + $0x78] sm:$0xff] %v3297_v58  ;;  %v3259_v15 = vadd.f32 %v3885_v21, %v6166_v26  ;;  %v6176_v21 = vld [vmem:[#allocation25_spill] sm:$0xff] }
 0x749   :  { %v3887_v34 = vpop.f32.mrf.mxu1 }
 0x74a   :  { %v3298_v45 = vadd.f32 %v5804_v5, %v3259_v15  ;;  %v3888_v50 = vadd.f32 %v3887_v34, %v3886_v30 }
 0x74b   :  { %v3889_v7 = vpop.f32.mrf.mxu1 }
 0x74c   :  { %3330 = vst [vmem:[%s5975_s9 + $0x80] sm:$0xff] %v3298_v45  ;;  %v3260_v62 = vadd.f32 %v3888_v50, %v6167_v9  ;;  %v6177_v50 = vld [vmem:[#allocation48_spill] sm:$0xff] }
 0x74d   :  { %v3890_v44 = vpop.f32.mrf.mxu1 }
 0x74e   :  { %v3299_v17 = vadd.f32 %v5804_v5, %v3260_v62  ;;  %v3891_v2 = vadd.f32 %v3890_v44, %v3889_v7 }
 0x74f   :  { %v3892_v47 = vpop.f32.mrf.mxu1 }
 0x750   :  { %3331 = vst [vmem:[%s5975_s9 + $0x88] sm:$0xff] %v3299_v17  ;;  %v3261_v39 = vadd.f32 %v3891_v2, %v6168_v48  ;;  %v6178_v2 = vld [vmem:[#allocation26_spill] sm:$0xff] }
 0x751   :  { %v3893_v42 = vpop.f32.mrf.mxu1 }
 0x752   :  { %v3300_v35 = vadd.f32 %v5804_v5, %v3261_v39  ;;  %v3894_v10 = vadd.f32 %v3893_v42, %v3892_v47 }
 0x753   :  { %v3895_v1 = vpop.f32.mrf.mxu1 }
 0x754   :  { %3332 = vst [vmem:[%s5975_s9 + $0x90] sm:$0xff] %v3300_v35  ;;  %v3262_v52 = vadd.f32 %v3894_v10, %v6169_v63  ;;  %v6179_v10 = vld [vmem:[#allocation49_spill] sm:$0xff] }
 0x755   :  { %v3896_v33 = vpop.f32.mrf.mxu1 }
 0x756   :  { %v3301_v19 = vadd.f32 %v5804_v5, %v3262_v52  ;;  %v3897_v40 = vadd.f32 %v3896_v33, %v3895_v1 }
 0x757   :  { %v3898_v41 = vpop.f32.mrf.mxu1 }
 0x758   :  { %3333 = vst [vmem:[%s5975_s9 + $0x98] sm:$0xff] %v3301_v19  ;;  %v3263_v53 = vadd.f32 %v3897_v40, %v6170_v14  ;;  %v6180_v40 = vld [vmem:[#allocation27_spill] sm:$0xff] }
 0x759   :  { %v3899_v0 = vpop.f32.mrf.mxu1 }
 0x75a   :  { %v3302_v54 = vadd.f32 %v5804_v5, %v3263_v53  ;;  %v3900_v37 = vadd.f32 %v3899_v0, %v3898_v41 }
 0x75b   :  { %v3901_v24 = vpop.f32.mrf.mxu1 }
 0x75c   :  { %3334 = vst [vmem:[%s5975_s9 + $0xa0] sm:$0xff] %v3302_v54  ;;  %v3264_v59 = vadd.f32 %v3900_v37, %v6171_v4 }
 0x75d   :  { %v3902_v28 = vpop.f32.mrf.mxu1 }
 0x75e   :  { %v3303_v11 = vadd.f32 %v5804_v5, %v3264_v59  ;;  %v3903_v29 = vadd.f32 %v3902_v28, %v3901_v24 }
 0x75f   :  { %v3904_v3 = vpop.f32.mrf.mxu1 }
 0x760   :  { %3335 = vst [vmem:[%s5975_s9 + $0xa8] sm:$0xff] %v3303_v11  ;;  %v3265_v31 = vadd.f32 %v3903_v29, %v6172_v36 }
 0x761   :  { %v3905_v27 = vpop.f32.mrf.mxu1 }
 0x762   :  { %v3304_v8 = vadd.f32 %v5804_v5, %v3265_v31  ;;  %v3906_v43 = vadd.f32 %v3905_v27, %v3904_v3 }
 0x763   :  { %v3907_v6 = vpop.f32.mrf.mxu1 }
 0x764   :  { %3336 = vst [vmem:[%s5975_s9 + $0xb0] sm:$0xff] %v3304_v8  ;;  %v3266_v18 = vadd.f32 %v3906_v43, %v6173_v22 }
 0x765   :  { %v3908_v12 = vpop.f32.mrf.mxu1 }
 0x766   :  { %v3305_v13 = vadd.f32 %v5804_v5, %v3266_v18  ;;  %v3909_v61 = vadd.f32 %v3908_v12, %v3907_v6 }
 0x767   :  { %v3910_v57 = vpop.f32.mrf.mxu1 }
 0x768   :  { %3337 = vst [vmem:[%s5975_s9 + $0xb8] sm:$0xff] %v3305_v13  ;;  %v3267_v38 = vadd.f32 %v3909_v61, %v6174_v46 }
 0x769   :  { %v3911_v20 = vpop.f32.mrf.mxu1 }
 0x76a   :  { %v3306_v23 = vadd.f32 %v5804_v5, %v3267_v38  ;;  %v3912_v16 = vadd.f32 %v3911_v20, %v3910_v57 }
 0x76b   :  { %v3913_v60 = vpop.f32.mrf.mxu1 }
 0x76c   :  { %3338 = vst [vmem:[%s5975_s9 + $0xc0] sm:$0xff] %v3306_v23  ;;  %v3268_v32 = vadd.f32 %v3912_v16, %v6175_v51 }
 0x76d   :  { %v3914_v55 = vpop.f32.mrf.mxu1 }
 0x76e   :  { %v3307_v49 = vadd.f32 %v5804_v5, %v3268_v32  ;;  %v3915_v25 = vadd.f32 %v3914_v55, %v3913_v60 }
 0x76f   :  { %v3916_v58 = vpop.f32.mrf.mxu1 }
 0x770   :  { %3339 = vst [vmem:[%s5975_s9 + $0xc8] sm:$0xff] %v3307_v49  ;;  %v3269_v30 = vadd.f32 %v3915_v25, %v6176_v21 }
 0x771   :  { %v3917_v26 = vpop.f32.mrf.mxu1 }
 0x772   :  { %v3308_v15 = vadd.f32 %v5804_v5, %v3269_v30  ;;  %v3918_v34 = vadd.f32 %v3917_v26, %v3916_v58 }
 0x773   :  { %v3919_v45 = vpop.f32.mrf.mxu1 }
 0x774   :  { %3340 = vst [vmem:[%s5975_s9 + $0xd0] sm:$0xff] %v3308_v15  ;;  %v3270_v7 = vadd.f32 %v3918_v34, %v6177_v50 }
 0x775   :  { %v3920_v9 = vpop.f32.mrf.mxu1 }
 0x776   :  { %v3309_v62 = vadd.f32 %v5804_v5, %v3270_v7  ;;  %v3921_v44 = vadd.f32 %v3920_v9, %v3919_v45 }
 0x777   :  { %v3922_v17 = vpop.f32.mrf.mxu1 }
 0x778   :  { %3341 = vst [vmem:[%s5975_s9 + $0xd8] sm:$0xff] %v3309_v62  ;;  %v3271_v47 = vadd.f32 %v3921_v44, %v6178_v2 }
 0x779   :  { %v3923_v48 = vpop.f32.mrf.mxu1 }
 0x77a   :  { %v3310_v39 = vadd.f32 %v5804_v5, %v3271_v47  ;;  %v3924_v42 = vadd.f32 %v3923_v48, %v3922_v17 }
 0x77b   :  { %v3925_v35 = vpop.f32.mrf.mxu1 }
 0x77c   :  { %3342 = vst [vmem:[%s5975_s9 + $0xe0] sm:$0xff] %v3310_v39  ;;  %v3272_v1 = vadd.f32 %v3924_v42, %v6179_v10 }
 0x77d   :  { %v3926_v63 = vpop.f32.mrf.mxu1 }
 0x77e   :  { %v3311_v52 = vadd.f32 %v5804_v5, %v3272_v1  ;;  %v3927_v33 = vadd.f32 %v3926_v63, %v3925_v35 }
 0x77f   :  { %v3928_v19 = vpop.f32.mrf.mxu1 }
 0x780   :  { %3343 = vst [vmem:[%s5975_s9 + $0xe8] sm:$0xff] %v3311_v52  ;;  %v3273_v41 = vadd.f32 %v3927_v33, %v6180_v40 }
 0x781   :  { %v3929_v14 = vpop.f32.mrf.mxu1 }
 0x782   :  { %v3312_v53 = vadd.f32 %v5804_v5, %v3273_v41  ;;  %v3930_v0 = vadd.f32 %v3929_v14, %v3928_v19 }
 0x784   :  { %3344 = vst [vmem:[%s5975_s9 + $0xf0] sm:$0xff] %v3312_v53  ;;  %v3274_v54 = vadd.f32 %v3930_v0, %v5756_v56 }
 0x786   :  { %v3313_v37 = vadd.f32 %v5804_v5, %v3274_v54 }
 0x788   :  { %3345 = vst [vmem:[%s5975_s9 + $0xf8] sm:$0xff] %v3313_v37 }
 0x789   :  { %3350 = vsyncpa [#allocation3], 1 }
 0x78a   :  { %3351 = vsyncpa [#allocation5], 1 }
 0x78b   :  { %3352 = vsyncpa [#allocation8], 1 }

</bundles_post_ra>
